<compile_context>
chip_gen: v7x
topology: tpu7x:2x2x1
jax: 0.10.0
libtpu: 0.0.40
codegen_flags: <defaults>
</compile_context>

<pallas_src>
import functools

import jax
import jax.numpy as jnp
from jax import lax
from jax.experimental import pallas as pl
from jax.experimental.pallas import tpu as pltpu

MEAN_STOP_TIME_S = 60
AVG_TRANSFER_WAIT_TIME_S = 300

_BIG = 1e18            # finite stand-in for "no path" inside the kernel
_NOPATH_THRESH = 1e17  # anything >= this is treated as unreachable


# ----------------------------------------------------------------------------
# Pallas kernel: Floyd-Warshall (min-plus) with hop counts + cost reductions
# ----------------------------------------------------------------------------
def _cost_kernel(edge_ref, demand_ref, tt_ref, stats_ref, dist_ref, hops_ref,
                 *, n, avg_transfer_wait_s):
    e0 = edge_ref[0]                                   # [N, N] float32
    dem = demand_ref[0]                                # [N, N] float32

    # inf (no direct route edge) -> large finite sentinel, so the one-hot MXU
    # matvec below never computes inf * 0 = nan.
    d0 = jnp.where(jnp.isinf(e0), jnp.float32(_BIG), e0)

    row_ids = lax.broadcasted_iota(jnp.int32, (n, n), 0)
    col_ids = lax.broadcasted_iota(jnp.int32, (n, n), 1)
    is_diag = row_ids == col_ids

    # hops = number of route edges on the current shortest path (1 per direct edge).
    hops0 = jnp.where((d0 >= jnp.float32(_NOPATH_THRESH)) | is_diag,
                      0.0, 1.0).astype(jnp.float32)

    dist_ref[...] = d0
    hops_ref[...] = hops0

    col1 = lax.broadcasted_iota(jnp.int32, (n, 1), 0)  # [N,1] node index (hoisted)

    def body(k, carry):
        dist, hops = carry
        # Row k: nearly-free dynamic sublane slice from the scratch refs
        # (kept in sync with the carry at every iteration boundary; the reads
        #  below happen before this iteration's writes).
        d_kj = dist_ref[pl.ds(k, 1), :]                # [1, N]
        h_kj = hops_ref[pl.ds(k, 1), :]                # [1, N]
        # Column k: one-hot matvec on the idle MXU (exact at HIGHEST precision).
        e_k = (col1 == k).astype(jnp.float32)          # [N, 1]
        d_ik = jnp.dot(dist, e_k, precision=lax.Precision.HIGHEST,
                       preferred_element_type=jnp.float32)   # [N, 1]
        h_ik = jnp.dot(hops, e_k, precision=lax.Precision.HIGHEST,
                       preferred_element_type=jnp.float32)   # [N, 1]
        cand = d_ik + d_kj                             # [N, N]
        # Strict '<': hops are not updated on equal-time paths (standard FW,
        # matches the reference floyd_warshall behaviour).
        better = cand < dist
        new_dist = jnp.where(better, cand, dist)
        new_hops = jnp.where(better, h_ik + h_kj, hops)
        dist_ref[...] = new_dist
        hops_ref[...] = new_hops
        return new_dist, new_hops

    unroll = True if n <= 32 else 4
    dist, hops = lax.fori_loop(0, n, body, (d0, hops0), unroll=unroll)

    nopath = dist >= jnp.float32(_NOPATH_THRESH)
    # path_n_transfers = path_lens - 2 = hops - 1; forced to 0 where no path
    # exists (exactly as the reference does for path_lens == 0).
    transfers = jnp.where(nopath, 0.0, hops - 1.0)
    tt = dist + transfers * jnp.float32(avg_transfer_wait_s)
    tt = jnp.where(nopath, 0.0, tt)
    tt_ref[0] = tt

    # --- fused demand-weighted reductions -----------------------------------
    served_dem = jnp.where(nopath, 0.0, dem)
    total_demand = jnp.sum(dem)
    unserved = total_demand - jnp.sum(served_dem)
    total_dmd_time = jnp.sum(dem * tt)
    total_transfers = jnp.sum(dem * transfers)
    n_disc = jnp.sum(jnp.where(nopath & (dem > 0.0), 1.0, 0.0))
    # NOTE: the reference counts unreachable demand in bucket 0 (transfers was
    # forced to 0 there) AND in bucket 3 — we intentionally reproduce that.
    d0t = jnp.sum(jnp.where(transfers == 0.0, dem, 0.0))
    d1t = jnp.sum(jnp.where(transfers == 1.0, dem, 0.0))
    d2t = jnp.sum(jnp.where(transfers == 2.0, dem, 0.0))
    dun = jnp.sum(jnp.where(transfers > 2.0, dem, 0.0)) + unserved

    # Pack the 9 scalars into a lane-dense (1, 128) vector -> unmasked store.
    vals = (total_dmd_time, total_transfers, unserved, total_demand,
            n_disc, d0t, d1t, d2t, dun)
    lane = lax.broadcasted_iota(jnp.int32, (1, 128), 1)
    vec = jnp.zeros((1, 128), jnp.float32)
    for idx, v in enumerate(vals):
        vec = jnp.where(lane == idx, v, vec)
    stats_ref[0] = vec


def floyd_warshall_cost_stats(edge_mat, demand, avg_transfer_wait_s):
    """Runs the Pallas kernel. Returns (trip_times [B,N,N], stats [B,128])."""
    B, N, _ = edge_mat.shape
    kernel = functools.partial(_cost_kernel, n=N,
                               avg_transfer_wait_s=float(avg_transfer_wait_s))
    # 48 MiB scoped VMEM: above the v5e (16 MiB) / v6e (32 MiB) defaults, with
    # headroom under v7x's 64 MiB physical VMEM.
    vmem_limit = 48 * 1024 * 1024
    tt, stats = pl.pallas_call(
        kernel,
        out_shape=(jax.ShapeDtypeStruct((B, N, N), jnp.float32),
                   jax.ShapeDtypeStruct((B, 1, 128), jnp.float32)),
        grid=(B,),
        in_specs=[pl.BlockSpec((1, N, N), lambda b: (b, 0, 0)),
                  pl.BlockSpec((1, N, N), lambda b: (b, 0, 0))],
        out_specs=(pl.BlockSpec((1, N, N), lambda b: (b, 0, 0)),
                   pl.BlockSpec((1, 1, 128), lambda b: (b, 0, 0))),
        scratch_shapes=[pltpu.VMEM((N, N), jnp.float32),
                        pltpu.VMEM((N, N), jnp.float32)],
        compiler_params=pltpu.CompilerParams(
            dimension_semantics=("parallel",),
            vmem_limit_bytes=vmem_limit),
    )(edge_mat.astype(jnp.float32), demand.astype(jnp.float32))
    return tt, stats[:, 0, :]


# ----------------------------------------------------------------------------
# JAX glue: route edge matrix / route leg times (data-dependent gathers)
# ----------------------------------------------------------------------------
# TODO(synk): original helpers (get_route_edge_matrix, get_route_leg_times,
# floyd_warshall, reconstruct_all_paths) were not provided; semantics
# reimplemented as documented here (leg time = drive time + mean stop time,
# inter-stop trip time = sum of leg times, min over routes, symmetric option
# uses transposed drive times for the return direction).

def _route_leg_times(routes, drive_times, mean_stop_time_s):
    B, R, L = routes.shape
    frm = routes[:, :, :-1]
    to = routes[:, :, 1:]
    valid = (frm >= 0) & (to >= 0)
    frm_c = jnp.where(valid, frm, 0)
    to_c = jnp.where(valid, to, 0)
    b_idx = jnp.arange(B)[:, None, None]
    times = drive_times[b_idx, frm_c, to_c] + jnp.float32(mean_stop_time_s)
    return jnp.where(valid, times.astype(jnp.float32), 0.0)  # [B, R, L-1]


def _edge_matrix_one_direction(routes, drive_times, mean_stop_time_s):
    B, R, L = routes.shape
    N = drive_times.shape[-1]
    leg = _route_leg_times(routes, drive_times, mean_stop_time_s)          # [B,R,L-1]
    cum = jnp.concatenate(
        [jnp.zeros((B, R, 1), jnp.float32), jnp.cumsum(leg, axis=-1)], axis=-1)  # [B,R,L]
    trip = cum[:, :, None, :] - cum[:, :, :, None]                         # [B,R,L,L]
    valid = routes >= 0
    pair_valid = valid[:, :, :, None] & valid[:, :, None, :]
    pos = jnp.arange(L)
    upper = (pos[None, :] > pos[:, None])[None, None]
    trip = jnp.where(pair_valid & upper, trip, jnp.inf)
    src = jnp.where(valid, routes, 0)
    ii = jnp.broadcast_to(src[:, :, :, None], (B, R, L, L))
    jj = jnp.broadcast_to(src[:, :, None, :], (B, R, L, L))
    flat = ii * N + jj
    b_idx = jnp.broadcast_to(jnp.arange(B)[:, None, None, None], (B, R, L, L))
    edge = jnp.full((B, N * N), jnp.inf, jnp.float32)
    edge = edge.at[b_idx, flat].min(trip)
    return edge.reshape(B, N, N)


def get_route_edge_matrix(routes, drive_times, mean_stop_time_s, symmetric):
    edge = _edge_matrix_one_direction(routes, drive_times, mean_stop_time_s)
    if symmetric:
        edge_rev = _edge_matrix_one_direction(
            routes, jnp.swapaxes(drive_times, 1, 2), mean_stop_time_s)
        edge = jnp.minimum(edge, jnp.swapaxes(edge_rev, 1, 2))
    N = edge.shape[-1]
    diag = jnp.arange(N)
    edge = edge.at[:, diag, diag].set(0.0)
    return edge


# ----------------------------------------------------------------------------
# The module
# ----------------------------------------------------------------------------
class MyCostModulePallas:
    def __init__(self, mean_stop_time_s=MEAN_STOP_TIME_S,
                 avg_transfer_wait_time_s=AVG_TRANSFER_WAIT_TIME_S,
                 min_route_len=2, max_route_len=None, symmetric_routes=True,
                 demand_time_weight=0.5, route_time_weight=0.5,
                 unserved_weight=5, variable_weights=False):
        self.mean_stop_time_s = mean_stop_time_s
        self.avg_transfer_wait_time_s = avg_transfer_wait_time_s
        self.symmetric_routes = symmetric_routes
        self.min_route_len = min_route_len
        self.max_route_len = max_route_len
        self.demand_time_weight = demand_time_weight
        self.route_time_weight = route_time_weight
        self.unserved_weight = unserved_weight
        self.variable_weights = variable_weights

    def _cost_helper(self, routes, graph_data):
        drive_times = graph_data["drive_times"].astype(jnp.float32)
        demand = graph_data["demand"].astype(jnp.float32)

        edge_mat = get_route_edge_matrix(
            routes, drive_times, self.mean_stop_time_s, self.symmetric_routes)

        trip_times, stats = floyd_warshall_cost_stats(
            edge_mat, demand, self.avg_transfer_wait_time_s)

        total_dmd_time = stats[:, 0]
        total_transfers = stats[:, 1]
        unserved_demand = stats[:, 2]
        total_demand = stats[:, 3]
        n_disconnected = stats[:, 4]
        trips_at_transfers = stats[:, 5:9]   # [B, 4] : 0, 1, 2, >2-or-unreachable

        # total route time (gather over routes, kept in JAX glue)
        leg = _route_leg_times(routes, drive_times, self.mean_stop_time_s)
        total_route_time = leg.sum(axis=(1, 2))
        if self.symmetric_routes:
            leg_r = _route_leg_times(
                routes, jnp.swapaxes(drive_times, 1, 2), self.mean_stop_time_s)
            total_route_time = total_route_time + leg_r.sum(axis=(1, 2))

        # route length constraint violations
        route_lens = (routes > -1).sum(-1)                  # [B, R]
        zero = jnp.zeros_like(route_lens)
        route_len_delta = jnp.maximum(self.min_route_len - route_lens, zero)
        route_len_delta = jnp.where(route_lens == 0, 0, route_len_delta)
        if self.max_route_len is not None:
            route_len_delta = route_len_delta + jnp.maximum(
                route_lens - self.max_route_len, zero)
        n_stops_oob = route_len_delta.sum(-1)               # [B]

        return dict(
            total_demand_time=total_dmd_time,
            total_route_time=total_route_time,
            trips_at_transfers=trips_at_transfers,
            total_demand=total_demand,
            unserved_demand=unserved_demand,
            total_transfers=total_transfers,
            trip_times=trip_times,
            n_disconnected_demand_edges=n_disconnected,
            n_stops_oob=n_stops_oob,
            n_nodes=graph_data["n_nodes"],
            batch_routes=routes,
        )

    @staticmethod
    def _compute_mean_demand_time(cho):
        served = cho["total_demand"] - cho["unserved_demand"]
        return cho["total_demand_time"] / (served + 1e-6)

    def forward(self, routes, graph_data, demand_time_weight=None,
                route_time_weight=None, unserved_weight=None, no_norm=False):
        cho = self._cost_helper(routes, graph_data)
        dtw = self.demand_time_weight if demand_time_weight is None else demand_time_weight
        rtw = self.route_time_weight if route_time_weight is None else route_time_weight
        uw = self.unserved_weight if unserved_weight is None else unserved_weight

        drive_times = graph_data["drive_times"].astype(jnp.float32)
        time_normalizer = jnp.max(drive_times, axis=(1, 2))

        avg_dmd_time = self._compute_mean_demand_time(cho)
        norm_dmd_time = avg_dmd_time / time_normalizer

        batch_routes = cho["batch_routes"]
        route_lens = (batch_routes > -1).sum(-1)
        n_routes = (route_lens > 0).sum(-1)
        norm_route_time = cho["total_route_time"] / (
            3 * time_normalizer * n_routes + 1e-6)

        n_nodes = cho["n_nodes"].astype(jnp.float32)
        frac_uncovered = cho["n_disconnected_demand_edges"] / (n_nodes ** 2)

        if self.max_route_len is None:
            denom = n_routes * self.min_route_len
        else:
            denom = n_routes * self.max_route_len
        rld_frac = cho["n_stops_oob"] / denom

        constraints_violated = (rld_frac > 0) | (frac_uncovered > 0)
        cv_penalty = 0.1 * constraints_violated

        if no_norm:
            cost = avg_dmd_time * dtw + cho["total_route_time"] * rtw
        else:
            cost = norm_dmd_time * dtw + norm_route_time * rtw
        cost = cost + (cv_penalty + frac_uncovered + rld_frac) * uw
        return cost


# ----------------------------------------------------------------------------
if __name__ == "__main__":
    key = jax.random.PRNGKey(0)
    B, N, R, L = 2, 16, 4, 6
    k1, k2, k3 = jax.random.split(key, 3)

    eye = jnp.eye(N, dtype=jnp.float32)
    drive_times = jax.random.uniform(k1, (B, N, N), jnp.float32, 60.0, 600.0)
    drive_times = drive_times * (1.0 - eye)                 # zero self-drive-time
    demand = jax.random.uniform(k2, (B, N, N), jnp.float32, 0.0, 10.0)
    demand = demand * (1.0 - eye)                           # zero self-demand

    # deterministic routes: R routes per graph, -1 padded to length L
    routes = []
    rkey = k3
    for b in range(B):
        rs = []
        for r in range(R):
            rkey, sub = jax.random.split(rkey)
            perm = jax.random.permutation(sub, N)
            length = 3 + ((b + r) % 3)                      # 3..5 stops
            stops = perm[:length].astype(jnp.int32)
            pad = jnp.full((L - length,), -1, jnp.int32)
            rs.append(jnp.concatenate([stops, pad]))
        routes.append(jnp.stack(rs))
    routes = jnp.stack(routes)                              # [B, R, L]

    graph_data = {
        "drive_times": drive_times,
        "demand": demand,
        "n_nodes": jnp.full((B,), N, jnp.int32),
    }

    module = MyCostModulePallas()
    cost = module.forward(routes, graph_data)
    cost = jax.block_until_ready(cost)
    assert cost.shape == (B,)
    assert bool(jnp.all(jnp.isfinite(cost)))
    print("KERNEL_OK")
</pallas_src>

<mosaic_0001>
module attributes {stable_mosaic.version = 11 : i64} {
  func.func @_cost_kernel(%arg0: i32, %arg1: memref<1x16x16xf32, #tpu.memory_space<vmem>>, %arg2: memref<1x16x16xf32, #tpu.memory_space<vmem>>, %arg3: memref<1x16x16xf32, #tpu.memory_space<vmem>>, %arg4: memref<1x1x128xf32, #tpu.memory_space<vmem>>, %arg5: memref<16x16xf32, #tpu.memory_space<vmem>>, %arg6: memref<16x16xf32, #tpu.memory_space<vmem>>) attributes {dimension_semantics = [#tpu.dimension_semantics<parallel>], iteration_bounds = array<i64: 2>, scalar_prefetch = 0 : i64, scratch_operands = 2 : i64, tpu.core_type = #tpu.core_type<tc>, window_params = [{transform_indices = @transform_0, window_bounds = array<i64: 1, 16, 16>}, {transform_indices = @transform_1, window_bounds = array<i64: 1, 16, 16>}, {transform_indices = @transform_2, window_bounds = array<i64: 1, 16, 16>}, {transform_indices = @transform_3, window_bounds = array<i64: 1, 1, 128>}]} {
    %c0 = arith.constant 0 : index
    %c0_0 = arith.constant 0 : index
    %c0_1 = arith.constant 0 : index
    %0 = vector.load %arg1[%c0, %c0_0, %c0_1] : memref<1x16x16xf32, #tpu.memory_space<vmem>>, vector<1x16x16xf32>
    %1 = vector.shape_cast %0 : vector<1x16x16xf32> to vector<16x16xf32>
    %c0_2 = arith.constant 0 : index
    %c0_3 = arith.constant 0 : index
    %c0_4 = arith.constant 0 : index
    %2 = vector.load %arg2[%c0_2, %c0_3, %c0_4] : memref<1x16x16xf32, #tpu.memory_space<vmem>>, vector<1x16x16xf32>
    %3 = vector.shape_cast %2 : vector<1x16x16xf32> to vector<16x16xf32>
    %4 = math.absf %1 : vector<16x16xf32>
    %cst = arith.constant 0x7F800000 : f32
    %5 = vector.broadcast %cst : f32 to vector<16x16xf32>
    %6 = arith.cmpf oeq, %4, %5 : vector<16x16xf32>
    %cst_5 = arith.constant 9.99999984E+17 : f32
    %7 = vector.broadcast %cst_5 : f32 to vector<16x16xf32>
    %8 = arith.select %6, %7, %1 : vector<16x16xi1>, vector<16x16xf32>
    %9 = tpu.iota {dimensions = array<i32: 0>} : vector<16x16xi32>
    %10 = tpu.iota {dimensions = array<i32: 1>} : vector<16x16xi32>
    %11 = arith.cmpi eq, %9, %10 : vector<16x16xi32>
    %cst_6 = arith.constant 9.99999984E+16 : f32
    %12 = vector.broadcast %cst_6 : f32 to vector<16x16xf32>
    %13 = arith.cmpf oge, %8, %12 : vector<16x16xf32>
    %14 = arith.ori %13, %11 : vector<16x16xi1>
    %cst_7 = arith.constant 0.000000e+00 : f32
    %cst_8 = arith.constant 1.000000e+00 : f32
    %15 = vector.broadcast %cst_7 : f32 to vector<16x16xf32>
    %16 = vector.broadcast %cst_8 : f32 to vector<16x16xf32>
    %17 = arith.select %14, %15, %16 : vector<16x16xi1>, vector<16x16xf32>
    %c0_9 = arith.constant 0 : index
    %c0_10 = arith.constant 0 : index
    %18 = vector.load %arg5[%c0_9, %c0_10] : memref<16x16xf32, #tpu.memory_space<vmem>>, vector<16x16xf32>
    tpu.vector_store %arg5[%c0_9, %c0_10], %8 {strides = array<i32>} : memref<16x16xf32, #tpu.memory_space<vmem>>, vector<16x16xf32>,
    %c0_11 = arith.constant 0 : index
    %c0_12 = arith.constant 0 : index
    %19 = vector.load %arg6[%c0_11, %c0_12] : memref<16x16xf32, #tpu.memory_space<vmem>>, vector<16x16xf32>
    tpu.vector_store %arg6[%c0_11, %c0_12], %17 {strides = array<i32>} : memref<16x16xf32, #tpu.memory_space<vmem>>, vector<16x16xf32>,
    %20 = tpu.iota {dimensions = array<i32: 0>} : vector<16x1xi32>
    %c0_i32 = arith.constant 0 : i32
    %21 = arith.index_cast %c0_i32 : i32 to index
    %c0_13 = arith.constant 0 : index
    %22 = vector.load %arg5[%21, %c0_13] : memref<16x16xf32, #tpu.memory_space<vmem>>, vector<1x16xf32>
    %23 = arith.index_cast %c0_i32 : i32 to index
    %c0_14 = arith.constant 0 : index
    %24 = vector.load %arg6[%23, %c0_14] : memref<16x16xf32, #tpu.memory_space<vmem>>, vector<1x16xf32>
    %25 = vector.broadcast %c0_i32 : i32 to vector<16x1xi32>
    %26 = arith.cmpi eq, %20, %25 : vector<16x1xi32>
    %27 = arith.extui %26 : vector<16x1xi1> to vector<16x1xi32>
    %28 = arith.sitofp %27 : vector<16x1xi32> to vector<16x1xf32>
    %cst_15 = arith.constant dense<0.000000e+00> : vector<16x1xf32>
    %29 = tpu.matmul %8, %28, %cst_15 {dimension_numbers = #tpu.dot_dimension_numbers<[1], [0], [0], [1], [0, 0, 1, 1], [], []>, precision = #tpu.contract_precision<fp32>} : vector<16x16xf32>, vector<16x1xf32>, vector<16x1xf32> -> vector<16x1xf32>
    %cst_16 = arith.constant dense<0.000000e+00> : vector<16x1xf32>
    %30 = tpu.matmul %17, %28, %cst_16 {dimension_numbers = #tpu.dot_dimension_numbers<[1], [0], [0], [1], [0, 0, 1, 1], [], []>, precision = #tpu.contract_precision<fp32>} : vector<16x16xf32>, vector<16x1xf32>, vector<16x1xf32> -> vector<16x1xf32>
    %31 = vector.broadcast %29 : vector<16x1xf32> to vector<16x16xf32>
    %32 = vector.broadcast %22 : vector<1x16xf32> to vector<16x16xf32>
    %33 = arith.addf %31, %32 : vector<16x16xf32>
    %34 = arith.cmpf olt, %33, %8 : vector<16x16xf32>
    %35 = arith.select %34, %33, %8 : vector<16x16xi1>, vector<16x16xf32>
    %36 = vector.broadcast %30 : vector<16x1xf32> to vector<16x16xf32>
    %37 = vector.broadcast %24 : vector<1x16xf32> to vector<16x16xf32>
    %38 = arith.addf %36, %37 : vector<16x16xf32>
    %39 = arith.select %34, %38, %17 : vector<16x16xi1>, vector<16x16xf32>
    %c0_17 = arith.constant 0 : index
    %c0_18 = arith.constant 0 : index
    %40 = vector.load %arg5[%c0_17, %c0_18] : memref<16x16xf32, #tpu.memory_space<vmem>>, vector<16x16xf32>
    tpu.vector_store %arg5[%c0_17, %c0_18], %35 {strides = array<i32>} : memref<16x16xf32, #tpu.memory_space<vmem>>, vector<16x16xf32>,
    %c0_19 = arith.constant 0 : index
    %c0_20 = arith.constant 0 : index
    %41 = vector.load %arg6[%c0_19, %c0_20] : memref<16x16xf32, #tpu.memory_space<vmem>>, vector<16x16xf32>
    tpu.vector_store %arg6[%c0_19, %c0_20], %39 {strides = array<i32>} : memref<16x16xf32, #tpu.memory_space<vmem>>, vector<16x16xf32>,
    %c1_i32 = arith.constant 1 : i32
    %42 = arith.index_cast %c1_i32 : i32 to index
    %c0_21 = arith.constant 0 : index
    %43 = vector.load %arg5[%42, %c0_21] : memref<16x16xf32, #tpu.memory_space<vmem>>, vector<1x16xf32>
    %44 = arith.index_cast %c1_i32 : i32 to index
    %c0_22 = arith.constant 0 : index
    %45 = vector.load %arg6[%44, %c0_22] : memref<16x16xf32, #tpu.memory_space<vmem>>, vector<1x16xf32>
    %46 = vector.broadcast %c1_i32 : i32 to vector<16x1xi32>
    %47 = arith.cmpi eq, %20, %46 : vector<16x1xi32>
    %48 = arith.extui %47 : vector<16x1xi1> to vector<16x1xi32>
    %49 = arith.sitofp %48 : vector<16x1xi32> to vector<16x1xf32>
    %cst_23 = arith.constant dense<0.000000e+00> : vector<16x1xf32>
    %50 = tpu.matmul %35, %49, %cst_23 {dimension_numbers = #tpu.dot_dimension_numbers<[1], [0], [0], [1], [0, 0, 1, 1], [], []>, precision = #tpu.contract_precision<fp32>} : vector<16x16xf32>, vector<16x1xf32>, vector<16x1xf32> -> vector<16x1xf32>
    %cst_24 = arith.constant dense<0.000000e+00> : vector<16x1xf32>
    %51 = tpu.matmul %39, %49, %cst_24 {dimension_numbers = #tpu.dot_dimension_numbers<[1], [0], [0], [1], [0, 0, 1, 1], [], []>, precision = #tpu.contract_precision<fp32>} : vector<16x16xf32>, vector<16x1xf32>, vector<16x1xf32> -> vector<16x1xf32>
    %52 = vector.broadcast %50 : vector<16x1xf32> to vector<16x16xf32>
    %53 = vector.broadcast %43 : vector<1x16xf32> to vector<16x16xf32>
    %54 = arith.addf %52, %53 : vector<16x16xf32>
    %55 = arith.cmpf olt, %54, %35 : vector<16x16xf32>
    %56 = arith.select %55, %54, %35 : vector<16x16xi1>, vector<16x16xf32>
    %57 = vector.broadcast %51 : vector<16x1xf32> to vector<16x16xf32>
    %58 = vector.broadcast %45 : vector<1x16xf32> to vector<16x16xf32>
    %59 = arith.addf %57, %58 : vector<16x16xf32>
    %60 = arith.select %55, %59, %39 : vector<16x16xi1>, vector<16x16xf32>
    %c0_25 = arith.constant 0 : index
    %c0_26 = arith.constant 0 : index
    %61 = vector.load %arg5[%c0_25, %c0_26] : memref<16x16xf32, #tpu.memory_space<vmem>>, vector<16x16xf32>
    tpu.vector_store %arg5[%c0_25, %c0_26], %56 {strides = array<i32>} : memref<16x16xf32, #tpu.memory_space<vmem>>, vector<16x16xf32>,
    %c0_27 = arith.constant 0 : index
    %c0_28 = arith.constant 0 : index
    %62 = vector.load %arg6[%c0_27, %c0_28] : memref<16x16xf32, #tpu.memory_space<vmem>>, vector<16x16xf32>
    tpu.vector_store %arg6[%c0_27, %c0_28], %60 {strides = array<i32>} : memref<16x16xf32, #tpu.memory_space<vmem>>, vector<16x16xf32>,
    %c2_i32 = arith.constant 2 : i32
    %63 = arith.index_cast %c2_i32 : i32 to index
    %c0_29 = arith.constant 0 : index
    %64 = vector.load %arg5[%63, %c0_29] : memref<16x16xf32, #tpu.memory_space<vmem>>, vector<1x16xf32>
    %65 = arith.index_cast %c2_i32 : i32 to index
    %c0_30 = arith.constant 0 : index
    %66 = vector.load %arg6[%65, %c0_30] : memref<16x16xf32, #tpu.memory_space<vmem>>, vector<1x16xf32>
    %67 = vector.broadcast %c2_i32 : i32 to vector<16x1xi32>
    %68 = arith.cmpi eq, %20, %67 : vector<16x1xi32>
    %69 = arith.extui %68 : vector<16x1xi1> to vector<16x1xi32>
    %70 = arith.sitofp %69 : vector<16x1xi32> to vector<16x1xf32>
    %cst_31 = arith.constant dense<0.000000e+00> : vector<16x1xf32>
    %71 = tpu.matmul %56, %70, %cst_31 {dimension_numbers = #tpu.dot_dimension_numbers<[1], [0], [0], [1], [0, 0, 1, 1], [], []>, precision = #tpu.contract_precision<fp32>} : vector<16x16xf32>, vector<16x1xf32>, vector<16x1xf32> -> vector<16x1xf32>
    %cst_32 = arith.constant dense<0.000000e+00> : vector<16x1xf32>
    %72 = tpu.matmul %60, %70, %cst_32 {dimension_numbers = #tpu.dot_dimension_numbers<[1], [0], [0], [1], [0, 0, 1, 1], [], []>, precision = #tpu.contract_precision<fp32>} : vector<16x16xf32>, vector<16x1xf32>, vector<16x1xf32> -> vector<16x1xf32>
    %73 = vector.broadcast %71 : vector<16x1xf32> to vector<16x16xf32>
    %74 = vector.broadcast %64 : vector<1x16xf32> to vector<16x16xf32>
    %75 = arith.addf %73, %74 : vector<16x16xf32>
    %76 = arith.cmpf olt, %75, %56 : vector<16x16xf32>
    %77 = arith.select %76, %75, %56 : vector<16x16xi1>, vector<16x16xf32>
    %78 = vector.broadcast %72 : vector<16x1xf32> to vector<16x16xf32>
    %79 = vector.broadcast %66 : vector<1x16xf32> to vector<16x16xf32>
    %80 = arith.addf %78, %79 : vector<16x16xf32>
    %81 = arith.select %76, %80, %60 : vector<16x16xi1>, vector<16x16xf32>
    %c0_33 = arith.constant 0 : index
    %c0_34 = arith.constant 0 : index
    %82 = vector.load %arg5[%c0_33, %c0_34] : memref<16x16xf32, #tpu.memory_space<vmem>>, vector<16x16xf32>
    tpu.vector_store %arg5[%c0_33, %c0_34], %77 {strides = array<i32>} : memref<16x16xf32, #tpu.memory_space<vmem>>, vector<16x16xf32>,
    %c0_35 = arith.constant 0 : index
    %c0_36 = arith.constant 0 : index
    %83 = vector.load %arg6[%c0_35, %c0_36] : memref<16x16xf32, #tpu.memory_space<vmem>>, vector<16x16xf32>
    tpu.vector_store %arg6[%c0_35, %c0_36], %81 {strides = array<i32>} : memref<16x16xf32, #tpu.memory_space<vmem>>, vector<16x16xf32>,
    %c3_i32 = arith.constant 3 : i32
    %84 = arith.index_cast %c3_i32 : i32 to index
    %c0_37 = arith.constant 0 : index
    %85 = vector.load %arg5[%84, %c0_37] : memref<16x16xf32, #tpu.memory_space<vmem>>, vector<1x16xf32>
    %86 = arith.index_cast %c3_i32 : i32 to index
    %c0_38 = arith.constant 0 : index
    %87 = vector.load %arg6[%86, %c0_38] : memref<16x16xf32, #tpu.memory_space<vmem>>, vector<1x16xf32>
    %88 = vector.broadcast %c3_i32 : i32 to vector<16x1xi32>
    %89 = arith.cmpi eq, %20, %88 : vector<16x1xi32>
    %90 = arith.extui %89 : vector<16x1xi1> to vector<16x1xi32>
    %91 = arith.sitofp %90 : vector<16x1xi32> to vector<16x1xf32>
    %cst_39 = arith.constant dense<0.000000e+00> : vector<16x1xf32>
    %92 = tpu.matmul %77, %91, %cst_39 {dimension_numbers = #tpu.dot_dimension_numbers<[1], [0], [0], [1], [0, 0, 1, 1], [], []>, precision = #tpu.contract_precision<fp32>} : vector<16x16xf32>, vector<16x1xf32>, vector<16x1xf32> -> vector<16x1xf32>
    %cst_40 = arith.constant dense<0.000000e+00> : vector<16x1xf32>
    %93 = tpu.matmul %81, %91, %cst_40 {dimension_numbers = #tpu.dot_dimension_numbers<[1], [0], [0], [1], [0, 0, 1, 1], [], []>, precision = #tpu.contract_precision<fp32>} : vector<16x16xf32>, vector<16x1xf32>, vector<16x1xf32> -> vector<16x1xf32>
    %94 = vector.broadcast %92 : vector<16x1xf32> to vector<16x16xf32>
    %95 = vector.broadcast %85 : vector<1x16xf32> to vector<16x16xf32>
    %96 = arith.addf %94, %95 : vector<16x16xf32>
    %97 = arith.cmpf olt, %96, %77 : vector<16x16xf32>
    %98 = arith.select %97, %96, %77 : vector<16x16xi1>, vector<16x16xf32>
    %99 = vector.broadcast %93 : vector<16x1xf32> to vector<16x16xf32>
    %100 = vector.broadcast %87 : vector<1x16xf32> to vector<16x16xf32>
    %101 = arith.addf %99, %100 : vector<16x16xf32>
    %102 = arith.select %97, %101, %81 : vector<16x16xi1>, vector<16x16xf32>
    %c0_41 = arith.constant 0 : index
    %c0_42 = arith.constant 0 : index
    %103 = vector.load %arg5[%c0_41, %c0_42] : memref<16x16xf32, #tpu.memory_space<vmem>>, vector<16x16xf32>
    tpu.vector_store %arg5[%c0_41, %c0_42], %98 {strides = array<i32>} : memref<16x16xf32, #tpu.memory_space<vmem>>, vector<16x16xf32>,
    %c0_43 = arith.constant 0 : index
    %c0_44 = arith.constant 0 : index
    %104 = vector.load %arg6[%c0_43, %c0_44] : memref<16x16xf32, #tpu.memory_space<vmem>>, vector<16x16xf32>
    tpu.vector_store %arg6[%c0_43, %c0_44], %102 {strides = array<i32>} : memref<16x16xf32, #tpu.memory_space<vmem>>, vector<16x16xf32>,
    %c4_i32 = arith.constant 4 : i32
    %105 = arith.index_cast %c4_i32 : i32 to index
    %c0_45 = arith.constant 0 : index
    %106 = vector.load %arg5[%105, %c0_45] : memref<16x16xf32, #tpu.memory_space<vmem>>, vector<1x16xf32>
    %107 = arith.index_cast %c4_i32 : i32 to index
    %c0_46 = arith.constant 0 : index
    %108 = vector.load %arg6[%107, %c0_46] : memref<16x16xf32, #tpu.memory_space<vmem>>, vector<1x16xf32>
    %109 = vector.broadcast %c4_i32 : i32 to vector<16x1xi32>
    %110 = arith.cmpi eq, %20, %109 : vector<16x1xi32>
    %111 = arith.extui %110 : vector<16x1xi1> to vector<16x1xi32>
    %112 = arith.sitofp %111 : vector<16x1xi32> to vector<16x1xf32>
    %cst_47 = arith.constant dense<0.000000e+00> : vector<16x1xf32>
    %113 = tpu.matmul %98, %112, %cst_47 {dimension_numbers = #tpu.dot_dimension_numbers<[1], [0], [0], [1], [0, 0, 1, 1], [], []>, precision = #tpu.contract_precision<fp32>} : vector<16x16xf32>, vector<16x1xf32>, vector<16x1xf32> -> vector<16x1xf32>
    %cst_48 = arith.constant dense<0.000000e+00> : vector<16x1xf32>
    %114 = tpu.matmul %102, %112, %cst_48 {dimension_numbers = #tpu.dot_dimension_numbers<[1], [0], [0], [1], [0, 0, 1, 1], [], []>, precision = #tpu.contract_precision<fp32>} : vector<16x16xf32>, vector<16x1xf32>, vector<16x1xf32> -> vector<16x1xf32>
    %115 = vector.broadcast %113 : vector<16x1xf32> to vector<16x16xf32>
    %116 = vector.broadcast %106 : vector<1x16xf32> to vector<16x16xf32>
    %117 = arith.addf %115, %116 : vector<16x16xf32>
    %118 = arith.cmpf olt, %117, %98 : vector<16x16xf32>
    %119 = arith.select %118, %117, %98 : vector<16x16xi1>, vector<16x16xf32>
    %120 = vector.broadcast %114 : vector<16x1xf32> to vector<16x16xf32>
    %121 = vector.broadcast %108 : vector<1x16xf32> to vector<16x16xf32>
    %122 = arith.addf %120, %121 : vector<16x16xf32>
    %123 = arith.select %118, %122, %102 : vector<16x16xi1>, vector<16x16xf32>
    %c0_49 = arith.constant 0 : index
    %c0_50 = arith.constant 0 : index
    %124 = vector.load %arg5[%c0_49, %c0_50] : memref<16x16xf32, #tpu.memory_space<vmem>>, vector<16x16xf32>
    tpu.vector_store %arg5[%c0_49, %c0_50], %119 {strides = array<i32>} : memref<16x16xf32, #tpu.memory_space<vmem>>, vector<16x16xf32>,
    %c0_51 = arith.constant 0 : index
    %c0_52 = arith.constant 0 : index
    %125 = vector.load %arg6[%c0_51, %c0_52] : memref<16x16xf32, #tpu.memory_space<vmem>>, vector<16x16xf32>
    tpu.vector_store %arg6[%c0_51, %c0_52], %123 {strides = array<i32>} : memref<16x16xf32, #tpu.memory_space<vmem>>, vector<16x16xf32>,
    %c5_i32 = arith.constant 5 : i32
    %126 = arith.index_cast %c5_i32 : i32 to index
    %c0_53 = arith.constant 0 : index
    %127 = vector.load %arg5[%126, %c0_53] : memref<16x16xf32, #tpu.memory_space<vmem>>, vector<1x16xf32>
    %128 = arith.index_cast %c5_i32 : i32 to index
    %c0_54 = arith.constant 0 : index
    %129 = vector.load %arg6[%128, %c0_54] : memref<16x16xf32, #tpu.memory_space<vmem>>, vector<1x16xf32>
    %130 = vector.broadcast %c5_i32 : i32 to vector<16x1xi32>
    %131 = arith.cmpi eq, %20, %130 : vector<16x1xi32>
    %132 = arith.extui %131 : vector<16x1xi1> to vector<16x1xi32>
    %133 = arith.sitofp %132 : vector<16x1xi32> to vector<16x1xf32>
    %cst_55 = arith.constant dense<0.000000e+00> : vector<16x1xf32>
    %134 = tpu.matmul %119, %133, %cst_55 {dimension_numbers = #tpu.dot_dimension_numbers<[1], [0], [0], [1], [0, 0, 1, 1], [], []>, precision = #tpu.contract_precision<fp32>} : vector<16x16xf32>, vector<16x1xf32>, vector<16x1xf32> -> vector<16x1xf32>
    %cst_56 = arith.constant dense<0.000000e+00> : vector<16x1xf32>
    %135 = tpu.matmul %123, %133, %cst_56 {dimension_numbers = #tpu.dot_dimension_numbers<[1], [0], [0], [1], [0, 0, 1, 1], [], []>, precision = #tpu.contract_precision<fp32>} : vector<16x16xf32>, vector<16x1xf32>, vector<16x1xf32> -> vector<16x1xf32>
    %136 = vector.broadcast %134 : vector<16x1xf32> to vector<16x16xf32>
    %137 = vector.broadcast %127 : vector<1x16xf32> to vector<16x16xf32>
    %138 = arith.addf %136, %137 : vector<16x16xf32>
    %139 = arith.cmpf olt, %138, %119 : vector<16x16xf32>
    %140 = arith.select %139, %138, %119 : vector<16x16xi1>, vector<16x16xf32>
    %141 = vector.broadcast %135 : vector<16x1xf32> to vector<16x16xf32>
    %142 = vector.broadcast %129 : vector<1x16xf32> to vector<16x16xf32>
    %143 = arith.addf %141, %142 : vector<16x16xf32>
    %144 = arith.select %139, %143, %123 : vector<16x16xi1>, vector<16x16xf32>
    %c0_57 = arith.constant 0 : index
    %c0_58 = arith.constant 0 : index
    %145 = vector.load %arg5[%c0_57, %c0_58] : memref<16x16xf32, #tpu.memory_space<vmem>>, vector<16x16xf32>
    tpu.vector_store %arg5[%c0_57, %c0_58], %140 {strides = array<i32>} : memref<16x16xf32, #tpu.memory_space<vmem>>, vector<16x16xf32>,
    %c0_59 = arith.constant 0 : index
    %c0_60 = arith.constant 0 : index
    %146 = vector.load %arg6[%c0_59, %c0_60] : memref<16x16xf32, #tpu.memory_space<vmem>>, vector<16x16xf32>
    tpu.vector_store %arg6[%c0_59, %c0_60], %144 {strides = array<i32>} : memref<16x16xf32, #tpu.memory_space<vmem>>, vector<16x16xf32>,
    %c6_i32 = arith.constant 6 : i32
    %147 = arith.index_cast %c6_i32 : i32 to index
    %c0_61 = arith.constant 0 : index
    %148 = vector.load %arg5[%147, %c0_61] : memref<16x16xf32, #tpu.memory_space<vmem>>, vector<1x16xf32>
    %149 = arith.index_cast %c6_i32 : i32 to index
    %c0_62 = arith.constant 0 : index
    %150 = vector.load %arg6[%149, %c0_62] : memref<16x16xf32, #tpu.memory_space<vmem>>, vector<1x16xf32>
    %151 = vector.broadcast %c6_i32 : i32 to vector<16x1xi32>
    %152 = arith.cmpi eq, %20, %151 : vector<16x1xi32>
    %153 = arith.extui %152 : vector<16x1xi1> to vector<16x1xi32>
    %154 = arith.sitofp %153 : vector<16x1xi32> to vector<16x1xf32>
    %cst_63 = arith.constant dense<0.000000e+00> : vector<16x1xf32>
    %155 = tpu.matmul %140, %154, %cst_63 {dimension_numbers = #tpu.dot_dimension_numbers<[1], [0], [0], [1], [0, 0, 1, 1], [], []>, precision = #tpu.contract_precision<fp32>} : vector<16x16xf32>, vector<16x1xf32>, vector<16x1xf32> -> vector<16x1xf32>
    %cst_64 = arith.constant dense<0.000000e+00> : vector<16x1xf32>
    %156 = tpu.matmul %144, %154, %cst_64 {dimension_numbers = #tpu.dot_dimension_numbers<[1], [0], [0], [1], [0, 0, 1, 1], [], []>, precision = #tpu.contract_precision<fp32>} : vector<16x16xf32>, vector<16x1xf32>, vector<16x1xf32> -> vector<16x1xf32>
    %157 = vector.broadcast %155 : vector<16x1xf32> to vector<16x16xf32>
    %158 = vector.broadcast %148 : vector<1x16xf32> to vector<16x16xf32>
    %159 = arith.addf %157, %158 : vector<16x16xf32>
    %160 = arith.cmpf olt, %159, %140 : vector<16x16xf32>
    %161 = arith.select %160, %159, %140 : vector<16x16xi1>, vector<16x16xf32>
    %162 = vector.broadcast %156 : vector<16x1xf32> to vector<16x16xf32>
    %163 = vector.broadcast %150 : vector<1x16xf32> to vector<16x16xf32>
    %164 = arith.addf %162, %163 : vector<16x16xf32>
    %165 = arith.select %160, %164, %144 : vector<16x16xi1>, vector<16x16xf32>
    %c0_65 = arith.constant 0 : index
    %c0_66 = arith.constant 0 : index
    %166 = vector.load %arg5[%c0_65, %c0_66] : memref<16x16xf32, #tpu.memory_space<vmem>>, vector<16x16xf32>
    tpu.vector_store %arg5[%c0_65, %c0_66], %161 {strides = array<i32>} : memref<16x16xf32, #tpu.memory_space<vmem>>, vector<16x16xf32>,
    %c0_67 = arith.constant 0 : index
    %c0_68 = arith.constant 0 : index
    %167 = vector.load %arg6[%c0_67, %c0_68] : memref<16x16xf32, #tpu.memory_space<vmem>>, vector<16x16xf32>
    tpu.vector_store %arg6[%c0_67, %c0_68], %165 {strides = array<i32>} : memref<16x16xf32, #tpu.memory_space<vmem>>, vector<16x16xf32>,
    %c7_i32 = arith.constant 7 : i32
    %168 = arith.index_cast %c7_i32 : i32 to index
    %c0_69 = arith.constant 0 : index
    %169 = vector.load %arg5[%168, %c0_69] : memref<16x16xf32, #tpu.memory_space<vmem>>, vector<1x16xf32>
    %170 = arith.index_cast %c7_i32 : i32 to index
    %c0_70 = arith.constant 0 : index
    %171 = vector.load %arg6[%170, %c0_70] : memref<16x16xf32, #tpu.memory_space<vmem>>, vector<1x16xf32>
    %172 = vector.broadcast %c7_i32 : i32 to vector<16x1xi32>
    %173 = arith.cmpi eq, %20, %172 : vector<16x1xi32>
    %174 = arith.extui %173 : vector<16x1xi1> to vector<16x1xi32>
    %175 = arith.sitofp %174 : vector<16x1xi32> to vector<16x1xf32>
    %cst_71 = arith.constant dense<0.000000e+00> : vector<16x1xf32>
    %176 = tpu.matmul %161, %175, %cst_71 {dimension_numbers = #tpu.dot_dimension_numbers<[1], [0], [0], [1], [0, 0, 1, 1], [], []>, precision = #tpu.contract_precision<fp32>} : vector<16x16xf32>, vector<16x1xf32>, vector<16x1xf32> -> vector<16x1xf32>
    %cst_72 = arith.constant dense<0.000000e+00> : vector<16x1xf32>
    %177 = tpu.matmul %165, %175, %cst_72 {dimension_numbers = #tpu.dot_dimension_numbers<[1], [0], [0], [1], [0, 0, 1, 1], [], []>, precision = #tpu.contract_precision<fp32>} : vector<16x16xf32>, vector<16x1xf32>, vector<16x1xf32> -> vector<16x1xf32>
    %178 = vector.broadcast %176 : vector<16x1xf32> to vector<16x16xf32>
    %179 = vector.broadcast %169 : vector<1x16xf32> to vector<16x16xf32>
    %180 = arith.addf %178, %179 : vector<16x16xf32>
    %181 = arith.cmpf olt, %180, %161 : vector<16x16xf32>
    %182 = arith.select %181, %180, %161 : vector<16x16xi1>, vector<16x16xf32>
    %183 = vector.broadcast %177 : vector<16x1xf32> to vector<16x16xf32>
    %184 = vector.broadcast %171 : vector<1x16xf32> to vector<16x16xf32>
    %185 = arith.addf %183, %184 : vector<16x16xf32>
    %186 = arith.select %181, %185, %165 : vector<16x16xi1>, vector<16x16xf32>
    %c0_73 = arith.constant 0 : index
    %c0_74 = arith.constant 0 : index
    %187 = vector.load %arg5[%c0_73, %c0_74] : memref<16x16xf32, #tpu.memory_space<vmem>>, vector<16x16xf32>
    tpu.vector_store %arg5[%c0_73, %c0_74], %182 {strides = array<i32>} : memref<16x16xf32, #tpu.memory_space<vmem>>, vector<16x16xf32>,
    %c0_75 = arith.constant 0 : index
    %c0_76 = arith.constant 0 : index
    %188 = vector.load %arg6[%c0_75, %c0_76] : memref<16x16xf32, #tpu.memory_space<vmem>>, vector<16x16xf32>
    tpu.vector_store %arg6[%c0_75, %c0_76], %186 {strides = array<i32>} : memref<16x16xf32, #tpu.memory_space<vmem>>, vector<16x16xf32>,
    %c8_i32 = arith.constant 8 : i32
    %189 = arith.index_cast %c8_i32 : i32 to index
    %c0_77 = arith.constant 0 : index
    %190 = vector.load %arg5[%189, %c0_77] : memref<16x16xf32, #tpu.memory_space<vmem>>, vector<1x16xf32>
    %191 = arith.index_cast %c8_i32 : i32 to index
    %c0_78 = arith.constant 0 : index
    %192 = vector.load %arg6[%191, %c0_78] : memref<16x16xf32, #tpu.memory_space<vmem>>, vector<1x16xf32>
    %193 = vector.broadcast %c8_i32 : i32 to vector<16x1xi32>
    %194 = arith.cmpi eq, %20, %193 : vector<16x1xi32>
    %195 = arith.extui %194 : vector<16x1xi1> to vector<16x1xi32>
    %196 = arith.sitofp %195 : vector<16x1xi32> to vector<16x1xf32>
    %cst_79 = arith.constant dense<0.000000e+00> : vector<16x1xf32>
    %197 = tpu.matmul %182, %196, %cst_79 {dimension_numbers = #tpu.dot_dimension_numbers<[1], [0], [0], [1], [0, 0, 1, 1], [], []>, precision = #tpu.contract_precision<fp32>} : vector<16x16xf32>, vector<16x1xf32>, vector<16x1xf32> -> vector<16x1xf32>
    %cst_80 = arith.constant dense<0.000000e+00> : vector<16x1xf32>
    %198 = tpu.matmul %186, %196, %cst_80 {dimension_numbers = #tpu.dot_dimension_numbers<[1], [0], [0], [1], [0, 0, 1, 1], [], []>, precision = #tpu.contract_precision<fp32>} : vector<16x16xf32>, vector<16x1xf32>, vector<16x1xf32> -> vector<16x1xf32>
    %199 = vector.broadcast %197 : vector<16x1xf32> to vector<16x16xf32>
    %200 = vector.broadcast %190 : vector<1x16xf32> to vector<16x16xf32>
    %201 = arith.addf %199, %200 : vector<16x16xf32>
    %202 = arith.cmpf olt, %201, %182 : vector<16x16xf32>
    %203 = arith.select %202, %201, %182 : vector<16x16xi1>, vector<16x16xf32>
    %204 = vector.broadcast %198 : vector<16x1xf32> to vector<16x16xf32>
    %205 = vector.broadcast %192 : vector<1x16xf32> to vector<16x16xf32>
    %206 = arith.addf %204, %205 : vector<16x16xf32>
    %207 = arith.select %202, %206, %186 : vector<16x16xi1>, vector<16x16xf32>
    %c0_81 = arith.constant 0 : index
    %c0_82 = arith.constant 0 : index
    %208 = vector.load %arg5[%c0_81, %c0_82] : memref<16x16xf32, #tpu.memory_space<vmem>>, vector<16x16xf32>
    tpu.vector_store %arg5[%c0_81, %c0_82], %203 {strides = array<i32>} : memref<16x16xf32, #tpu.memory_space<vmem>>, vector<16x16xf32>,
    %c0_83 = arith.constant 0 : index
    %c0_84 = arith.constant 0 : index
    %209 = vector.load %arg6[%c0_83, %c0_84] : memref<16x16xf32, #tpu.memory_space<vmem>>, vector<16x16xf32>
    tpu.vector_store %arg6[%c0_83, %c0_84], %207 {strides = array<i32>} : memref<16x16xf32, #tpu.memory_space<vmem>>, vector<16x16xf32>,
    %c9_i32 = arith.constant 9 : i32
    %210 = arith.index_cast %c9_i32 : i32 to index
    %c0_85 = arith.constant 0 : index
    %211 = vector.load %arg5[%210, %c0_85] : memref<16x16xf32, #tpu.memory_space<vmem>>, vector<1x16xf32>
    %212 = arith.index_cast %c9_i32 : i32 to index
    %c0_86 = arith.constant 0 : index
    %213 = vector.load %arg6[%212, %c0_86] : memref<16x16xf32, #tpu.memory_space<vmem>>, vector<1x16xf32>
    %214 = vector.broadcast %c9_i32 : i32 to vector<16x1xi32>
    %215 = arith.cmpi eq, %20, %214 : vector<16x1xi32>
    %216 = arith.extui %215 : vector<16x1xi1> to vector<16x1xi32>
    %217 = arith.sitofp %216 : vector<16x1xi32> to vector<16x1xf32>
    %cst_87 = arith.constant dense<0.000000e+00> : vector<16x1xf32>
    %218 = tpu.matmul %203, %217, %cst_87 {dimension_numbers = #tpu.dot_dimension_numbers<[1], [0], [0], [1], [0, 0, 1, 1], [], []>, precision = #tpu.contract_precision<fp32>} : vector<16x16xf32>, vector<16x1xf32>, vector<16x1xf32> -> vector<16x1xf32>
    %cst_88 = arith.constant dense<0.000000e+00> : vector<16x1xf32>
    %219 = tpu.matmul %207, %217, %cst_88 {dimension_numbers = #tpu.dot_dimension_numbers<[1], [0], [0], [1], [0, 0, 1, 1], [], []>, precision = #tpu.contract_precision<fp32>} : vector<16x16xf32>, vector<16x1xf32>, vector<16x1xf32> -> vector<16x1xf32>
    %220 = vector.broadcast %218 : vector<16x1xf32> to vector<16x16xf32>
    %221 = vector.broadcast %211 : vector<1x16xf32> to vector<16x16xf32>
    %222 = arith.addf %220, %221 : vector<16x16xf32>
    %223 = arith.cmpf olt, %222, %203 : vector<16x16xf32>
    %224 = arith.select %223, %222, %203 : vector<16x16xi1>, vector<16x16xf32>
    %225 = vector.broadcast %219 : vector<16x1xf32> to vector<16x16xf32>
    %226 = vector.broadcast %213 : vector<1x16xf32> to vector<16x16xf32>
    %227 = arith.addf %225, %226 : vector<16x16xf32>
    %228 = arith.select %223, %227, %207 : vector<16x16xi1>, vector<16x16xf32>
    %c0_89 = arith.constant 0 : index
    %c0_90 = arith.constant 0 : index
    %229 = vector.load %arg5[%c0_89, %c0_90] : memref<16x16xf32, #tpu.memory_space<vmem>>, vector<16x16xf32>
    tpu.vector_store %arg5[%c0_89, %c0_90], %224 {strides = array<i32>} : memref<16x16xf32, #tpu.memory_space<vmem>>, vector<16x16xf32>,
    %c0_91 = arith.constant 0 : index
    %c0_92 = arith.constant 0 : index
    %230 = vector.load %arg6[%c0_91, %c0_92] : memref<16x16xf32, #tpu.memory_space<vmem>>, vector<16x16xf32>
    tpu.vector_store %arg6[%c0_91, %c0_92], %228 {strides = array<i32>} : memref<16x16xf32, #tpu.memory_space<vmem>>, vector<16x16xf32>,
    %c10_i32 = arith.constant 10 : i32
    %231 = arith.index_cast %c10_i32 : i32 to index
    %c0_93 = arith.constant 0 : index
    %232 = vector.load %arg5[%231, %c0_93] : memref<16x16xf32, #tpu.memory_space<vmem>>, vector<1x16xf32>
    %233 = arith.index_cast %c10_i32 : i32 to index
    %c0_94 = arith.constant 0 : index
    %234 = vector.load %arg6[%233, %c0_94] : memref<16x16xf32, #tpu.memory_space<vmem>>, vector<1x16xf32>
    %235 = vector.broadcast %c10_i32 : i32 to vector<16x1xi32>
    %236 = arith.cmpi eq, %20, %235 : vector<16x1xi32>
    %237 = arith.extui %236 : vector<16x1xi1> to vector<16x1xi32>
    %238 = arith.sitofp %237 : vector<16x1xi32> to vector<16x1xf32>
    %cst_95 = arith.constant dense<0.000000e+00> : vector<16x1xf32>
    %239 = tpu.matmul %224, %238, %cst_95 {dimension_numbers = #tpu.dot_dimension_numbers<[1], [0], [0], [1], [0, 0, 1, 1], [], []>, precision = #tpu.contract_precision<fp32>} : vector<16x16xf32>, vector<16x1xf32>, vector<16x1xf32> -> vector<16x1xf32>
    %cst_96 = arith.constant dense<0.000000e+00> : vector<16x1xf32>
    %240 = tpu.matmul %228, %238, %cst_96 {dimension_numbers = #tpu.dot_dimension_numbers<[1], [0], [0], [1], [0, 0, 1, 1], [], []>, precision = #tpu.contract_precision<fp32>} : vector<16x16xf32>, vector<16x1xf32>, vector<16x1xf32> -> vector<16x1xf32>
    %241 = vector.broadcast %239 : vector<16x1xf32> to vector<16x16xf32>
    %242 = vector.broadcast %232 : vector<1x16xf32> to vector<16x16xf32>
    %243 = arith.addf %241, %242 : vector<16x16xf32>
    %244 = arith.cmpf olt, %243, %224 : vector<16x16xf32>
    %245 = arith.select %244, %243, %224 : vector<16x16xi1>, vector<16x16xf32>
    %246 = vector.broadcast %240 : vector<16x1xf32> to vector<16x16xf32>
    %247 = vector.broadcast %234 : vector<1x16xf32> to vector<16x16xf32>
    %248 = arith.addf %246, %247 : vector<16x16xf32>
    %249 = arith.select %244, %248, %228 : vector<16x16xi1>, vector<16x16xf32>
    %c0_97 = arith.constant 0 : index
    %c0_98 = arith.constant 0 : index
    %250 = vector.load %arg5[%c0_97, %c0_98] : memref<16x16xf32, #tpu.memory_space<vmem>>, vector<16x16xf32>
    tpu.vector_store %arg5[%c0_97, %c0_98], %245 {strides = array<i32>} : memref<16x16xf32, #tpu.memory_space<vmem>>, vector<16x16xf32>,
    %c0_99 = arith.constant 0 : index
    %c0_100 = arith.constant 0 : index
    %251 = vector.load %arg6[%c0_99, %c0_100] : memref<16x16xf32, #tpu.memory_space<vmem>>, vector<16x16xf32>
    tpu.vector_store %arg6[%c0_99, %c0_100], %249 {strides = array<i32>} : memref<16x16xf32, #tpu.memory_space<vmem>>, vector<16x16xf32>,
    %c11_i32 = arith.constant 11 : i32
    %252 = arith.index_cast %c11_i32 : i32 to index
    %c0_101 = arith.constant 0 : index
    %253 = vector.load %arg5[%252, %c0_101] : memref<16x16xf32, #tpu.memory_space<vmem>>, vector<1x16xf32>
    %254 = arith.index_cast %c11_i32 : i32 to index
    %c0_102 = arith.constant 0 : index
    %255 = vector.load %arg6[%254, %c0_102] : memref<16x16xf32, #tpu.memory_space<vmem>>, vector<1x16xf32>
    %256 = vector.broadcast %c11_i32 : i32 to vector<16x1xi32>
    %257 = arith.cmpi eq, %20, %256 : vector<16x1xi32>
    %258 = arith.extui %257 : vector<16x1xi1> to vector<16x1xi32>
    %259 = arith.sitofp %258 : vector<16x1xi32> to vector<16x1xf32>
    %cst_103 = arith.constant dense<0.000000e+00> : vector<16x1xf32>
    %260 = tpu.matmul %245, %259, %cst_103 {dimension_numbers = #tpu.dot_dimension_numbers<[1], [0], [0], [1], [0, 0, 1, 1], [], []>, precision = #tpu.contract_precision<fp32>} : vector<16x16xf32>, vector<16x1xf32>, vector<16x1xf32> -> vector<16x1xf32>
    %cst_104 = arith.constant dense<0.000000e+00> : vector<16x1xf32>
    %261 = tpu.matmul %249, %259, %cst_104 {dimension_numbers = #tpu.dot_dimension_numbers<[1], [0], [0], [1], [0, 0, 1, 1], [], []>, precision = #tpu.contract_precision<fp32>} : vector<16x16xf32>, vector<16x1xf32>, vector<16x1xf32> -> vector<16x1xf32>
    %262 = vector.broadcast %260 : vector<16x1xf32> to vector<16x16xf32>
    %263 = vector.broadcast %253 : vector<1x16xf32> to vector<16x16xf32>
    %264 = arith.addf %262, %263 : vector<16x16xf32>
    %265 = arith.cmpf olt, %264, %245 : vector<16x16xf32>
    %266 = arith.select %265, %264, %245 : vector<16x16xi1>, vector<16x16xf32>
    %267 = vector.broadcast %261 : vector<16x1xf32> to vector<16x16xf32>
    %268 = vector.broadcast %255 : vector<1x16xf32> to vector<16x16xf32>
    %269 = arith.addf %267, %268 : vector<16x16xf32>
    %270 = arith.select %265, %269, %249 : vector<16x16xi1>, vector<16x16xf32>
    %c0_105 = arith.constant 0 : index
    %c0_106 = arith.constant 0 : index
    %271 = vector.load %arg5[%c0_105, %c0_106] : memref<16x16xf32, #tpu.memory_space<vmem>>, vector<16x16xf32>
    tpu.vector_store %arg5[%c0_105, %c0_106], %266 {strides = array<i32>} : memref<16x16xf32, #tpu.memory_space<vmem>>, vector<16x16xf32>,
    %c0_107 = arith.constant 0 : index
    %c0_108 = arith.constant 0 : index
    %272 = vector.load %arg6[%c0_107, %c0_108] : memref<16x16xf32, #tpu.memory_space<vmem>>, vector<16x16xf32>
    tpu.vector_store %arg6[%c0_107, %c0_108], %270 {strides = array<i32>} : memref<16x16xf32, #tpu.memory_space<vmem>>, vector<16x16xf32>,
    %c12_i32 = arith.constant 12 : i32
    %273 = arith.index_cast %c12_i32 : i32 to index
    %c0_109 = arith.constant 0 : index
    %274 = vector.load %arg5[%273, %c0_109] : memref<16x16xf32, #tpu.memory_space<vmem>>, vector<1x16xf32>
    %275 = arith.index_cast %c12_i32 : i32 to index
    %c0_110 = arith.constant 0 : index
    %276 = vector.load %arg6[%275, %c0_110] : memref<16x16xf32, #tpu.memory_space<vmem>>, vector<1x16xf32>
    %277 = vector.broadcast %c12_i32 : i32 to vector<16x1xi32>
    %278 = arith.cmpi eq, %20, %277 : vector<16x1xi32>
    %279 = arith.extui %278 : vector<16x1xi1> to vector<16x1xi32>
    %280 = arith.sitofp %279 : vector<16x1xi32> to vector<16x1xf32>
    %cst_111 = arith.constant dense<0.000000e+00> : vector<16x1xf32>
    %281 = tpu.matmul %266, %280, %cst_111 {dimension_numbers = #tpu.dot_dimension_numbers<[1], [0], [0], [1], [0, 0, 1, 1], [], []>, precision = #tpu.contract_precision<fp32>} : vector<16x16xf32>, vector<16x1xf32>, vector<16x1xf32> -> vector<16x1xf32>
    %cst_112 = arith.constant dense<0.000000e+00> : vector<16x1xf32>
    %282 = tpu.matmul %270, %280, %cst_112 {dimension_numbers = #tpu.dot_dimension_numbers<[1], [0], [0], [1], [0, 0, 1, 1], [], []>, precision = #tpu.contract_precision<fp32>} : vector<16x16xf32>, vector<16x1xf32>, vector<16x1xf32> -> vector<16x1xf32>
    %283 = vector.broadcast %281 : vector<16x1xf32> to vector<16x16xf32>
    %284 = vector.broadcast %274 : vector<1x16xf32> to vector<16x16xf32>
    %285 = arith.addf %283, %284 : vector<16x16xf32>
    %286 = arith.cmpf olt, %285, %266 : vector<16x16xf32>
    %287 = arith.select %286, %285, %266 : vector<16x16xi1>, vector<16x16xf32>
    %288 = vector.broadcast %282 : vector<16x1xf32> to vector<16x16xf32>
    %289 = vector.broadcast %276 : vector<1x16xf32> to vector<16x16xf32>
    %290 = arith.addf %288, %289 : vector<16x16xf32>
    %291 = arith.select %286, %290, %270 : vector<16x16xi1>, vector<16x16xf32>
    %c0_113 = arith.constant 0 : index
    %c0_114 = arith.constant 0 : index
    %292 = vector.load %arg5[%c0_113, %c0_114] : memref<16x16xf32, #tpu.memory_space<vmem>>, vector<16x16xf32>
    tpu.vector_store %arg5[%c0_113, %c0_114], %287 {strides = array<i32>} : memref<16x16xf32, #tpu.memory_space<vmem>>, vector<16x16xf32>,
    %c0_115 = arith.constant 0 : index
    %c0_116 = arith.constant 0 : index
    %293 = vector.load %arg6[%c0_115, %c0_116] : memref<16x16xf32, #tpu.memory_space<vmem>>, vector<16x16xf32>
    tpu.vector_store %arg6[%c0_115, %c0_116], %291 {strides = array<i32>} : memref<16x16xf32, #tpu.memory_space<vmem>>, vector<16x16xf32>,
    %c13_i32 = arith.constant 13 : i32
    %294 = arith.index_cast %c13_i32 : i32 to index
    %c0_117 = arith.constant 0 : index
    %295 = vector.load %arg5[%294, %c0_117] : memref<16x16xf32, #tpu.memory_space<vmem>>, vector<1x16xf32>
    %296 = arith.index_cast %c13_i32 : i32 to index
    %c0_118 = arith.constant 0 : index
    %297 = vector.load %arg6[%296, %c0_118] : memref<16x16xf32, #tpu.memory_space<vmem>>, vector<1x16xf32>
    %298 = vector.broadcast %c13_i32 : i32 to vector<16x1xi32>
    %299 = arith.cmpi eq, %20, %298 : vector<16x1xi32>
    %300 = arith.extui %299 : vector<16x1xi1> to vector<16x1xi32>
    %301 = arith.sitofp %300 : vector<16x1xi32> to vector<16x1xf32>
    %cst_119 = arith.constant dense<0.000000e+00> : vector<16x1xf32>
    %302 = tpu.matmul %287, %301, %cst_119 {dimension_numbers = #tpu.dot_dimension_numbers<[1], [0], [0], [1], [0, 0, 1, 1], [], []>, precision = #tpu.contract_precision<fp32>} : vector<16x16xf32>, vector<16x1xf32>, vector<16x1xf32> -> vector<16x1xf32>
    %cst_120 = arith.constant dense<0.000000e+00> : vector<16x1xf32>
    %303 = tpu.matmul %291, %301, %cst_120 {dimension_numbers = #tpu.dot_dimension_numbers<[1], [0], [0], [1], [0, 0, 1, 1], [], []>, precision = #tpu.contract_precision<fp32>} : vector<16x16xf32>, vector<16x1xf32>, vector<16x1xf32> -> vector<16x1xf32>
    %304 = vector.broadcast %302 : vector<16x1xf32> to vector<16x16xf32>
    %305 = vector.broadcast %295 : vector<1x16xf32> to vector<16x16xf32>
    %306 = arith.addf %304, %305 : vector<16x16xf32>
    %307 = arith.cmpf olt, %306, %287 : vector<16x16xf32>
    %308 = arith.select %307, %306, %287 : vector<16x16xi1>, vector<16x16xf32>
    %309 = vector.broadcast %303 : vector<16x1xf32> to vector<16x16xf32>
    %310 = vector.broadcast %297 : vector<1x16xf32> to vector<16x16xf32>
    %311 = arith.addf %309, %310 : vector<16x16xf32>
    %312 = arith.select %307, %311, %291 : vector<16x16xi1>, vector<16x16xf32>
    %c0_121 = arith.constant 0 : index
    %c0_122 = arith.constant 0 : index
    %313 = vector.load %arg5[%c0_121, %c0_122] : memref<16x16xf32, #tpu.memory_space<vmem>>, vector<16x16xf32>
    tpu.vector_store %arg5[%c0_121, %c0_122], %308 {strides = array<i32>} : memref<16x16xf32, #tpu.memory_space<vmem>>, vector<16x16xf32>,
    %c0_123 = arith.constant 0 : index
    %c0_124 = arith.constant 0 : index
    %314 = vector.load %arg6[%c0_123, %c0_124] : memref<16x16xf32, #tpu.memory_space<vmem>>, vector<16x16xf32>
    tpu.vector_store %arg6[%c0_123, %c0_124], %312 {strides = array<i32>} : memref<16x16xf32, #tpu.memory_space<vmem>>, vector<16x16xf32>,
    %c14_i32 = arith.constant 14 : i32
    %315 = arith.index_cast %c14_i32 : i32 to index
    %c0_125 = arith.constant 0 : index
    %316 = vector.load %arg5[%315, %c0_125] : memref<16x16xf32, #tpu.memory_space<vmem>>, vector<1x16xf32>
    %317 = arith.index_cast %c14_i32 : i32 to index
    %c0_126 = arith.constant 0 : index
    %318 = vector.load %arg6[%317, %c0_126] : memref<16x16xf32, #tpu.memory_space<vmem>>, vector<1x16xf32>
    %319 = vector.broadcast %c14_i32 : i32 to vector<16x1xi32>
    %320 = arith.cmpi eq, %20, %319 : vector<16x1xi32>
    %321 = arith.extui %320 : vector<16x1xi1> to vector<16x1xi32>
    %322 = arith.sitofp %321 : vector<16x1xi32> to vector<16x1xf32>
    %cst_127 = arith.constant dense<0.000000e+00> : vector<16x1xf32>
    %323 = tpu.matmul %308, %322, %cst_127 {dimension_numbers = #tpu.dot_dimension_numbers<[1], [0], [0], [1], [0, 0, 1, 1], [], []>, precision = #tpu.contract_precision<fp32>} : vector<16x16xf32>, vector<16x1xf32>, vector<16x1xf32> -> vector<16x1xf32>
    %cst_128 = arith.constant dense<0.000000e+00> : vector<16x1xf32>
    %324 = tpu.matmul %312, %322, %cst_128 {dimension_numbers = #tpu.dot_dimension_numbers<[1], [0], [0], [1], [0, 0, 1, 1], [], []>, precision = #tpu.contract_precision<fp32>} : vector<16x16xf32>, vector<16x1xf32>, vector<16x1xf32> -> vector<16x1xf32>
    %325 = vector.broadcast %323 : vector<16x1xf32> to vector<16x16xf32>
    %326 = vector.broadcast %316 : vector<1x16xf32> to vector<16x16xf32>
    %327 = arith.addf %325, %326 : vector<16x16xf32>
    %328 = arith.cmpf olt, %327, %308 : vector<16x16xf32>
    %329 = arith.select %328, %327, %308 : vector<16x16xi1>, vector<16x16xf32>
    %330 = vector.broadcast %324 : vector<16x1xf32> to vector<16x16xf32>
    %331 = vector.broadcast %318 : vector<1x16xf32> to vector<16x16xf32>
    %332 = arith.addf %330, %331 : vector<16x16xf32>
    %333 = arith.select %328, %332, %312 : vector<16x16xi1>, vector<16x16xf32>
    %c0_129 = arith.constant 0 : index
    %c0_130 = arith.constant 0 : index
    %334 = vector.load %arg5[%c0_129, %c0_130] : memref<16x16xf32, #tpu.memory_space<vmem>>, vector<16x16xf32>
    tpu.vector_store %arg5[%c0_129, %c0_130], %329 {strides = array<i32>} : memref<16x16xf32, #tpu.memory_space<vmem>>, vector<16x16xf32>,
    %c0_131 = arith.constant 0 : index
    %c0_132 = arith.constant 0 : index
    %335 = vector.load %arg6[%c0_131, %c0_132] : memref<16x16xf32, #tpu.memory_space<vmem>>, vector<16x16xf32>
    tpu.vector_store %arg6[%c0_131, %c0_132], %333 {strides = array<i32>} : memref<16x16xf32, #tpu.memory_space<vmem>>, vector<16x16xf32>,
    %c15_i32 = arith.constant 15 : i32
    %336 = arith.index_cast %c15_i32 : i32 to index
    %c0_133 = arith.constant 0 : index
    %337 = vector.load %arg5[%336, %c0_133] : memref<16x16xf32, #tpu.memory_space<vmem>>, vector<1x16xf32>
    %338 = arith.index_cast %c15_i32 : i32 to index
    %c0_134 = arith.constant 0 : index
    %339 = vector.load %arg6[%338, %c0_134] : memref<16x16xf32, #tpu.memory_space<vmem>>, vector<1x16xf32>
    %340 = vector.broadcast %c15_i32 : i32 to vector<16x1xi32>
    %341 = arith.cmpi eq, %20, %340 : vector<16x1xi32>
    %342 = arith.extui %341 : vector<16x1xi1> to vector<16x1xi32>
    %343 = arith.sitofp %342 : vector<16x1xi32> to vector<16x1xf32>
    %cst_135 = arith.constant dense<0.000000e+00> : vector<16x1xf32>
    %344 = tpu.matmul %329, %343, %cst_135 {dimension_numbers = #tpu.dot_dimension_numbers<[1], [0], [0], [1], [0, 0, 1, 1], [], []>, precision = #tpu.contract_precision<fp32>} : vector<16x16xf32>, vector<16x1xf32>, vector<16x1xf32> -> vector<16x1xf32>
    %cst_136 = arith.constant dense<0.000000e+00> : vector<16x1xf32>
    %345 = tpu.matmul %333, %343, %cst_136 {dimension_numbers = #tpu.dot_dimension_numbers<[1], [0], [0], [1], [0, 0, 1, 1], [], []>, precision = #tpu.contract_precision<fp32>} : vector<16x16xf32>, vector<16x1xf32>, vector<16x1xf32> -> vector<16x1xf32>
    %346 = vector.broadcast %344 : vector<16x1xf32> to vector<16x16xf32>
    %347 = vector.broadcast %337 : vector<1x16xf32> to vector<16x16xf32>
    %348 = arith.addf %346, %347 : vector<16x16xf32>
    %349 = arith.cmpf olt, %348, %329 : vector<16x16xf32>
    %350 = arith.select %349, %348, %329 : vector<16x16xi1>, vector<16x16xf32>
    %351 = vector.broadcast %345 : vector<16x1xf32> to vector<16x16xf32>
    %352 = vector.broadcast %339 : vector<1x16xf32> to vector<16x16xf32>
    %353 = arith.addf %351, %352 : vector<16x16xf32>
    %354 = arith.select %349, %353, %333 : vector<16x16xi1>, vector<16x16xf32>
    %c0_137 = arith.constant 0 : index
    %c0_138 = arith.constant 0 : index
    %355 = vector.load %arg5[%c0_137, %c0_138] : memref<16x16xf32, #tpu.memory_space<vmem>>, vector<16x16xf32>
    tpu.vector_store %arg5[%c0_137, %c0_138], %350 {strides = array<i32>} : memref<16x16xf32, #tpu.memory_space<vmem>>, vector<16x16xf32>,
    %c0_139 = arith.constant 0 : index
    %c0_140 = arith.constant 0 : index
    %356 = vector.load %arg6[%c0_139, %c0_140] : memref<16x16xf32, #tpu.memory_space<vmem>>, vector<16x16xf32>
    tpu.vector_store %arg6[%c0_139, %c0_140], %354 {strides = array<i32>} : memref<16x16xf32, #tpu.memory_space<vmem>>, vector<16x16xf32>,
    %c16_i32 = arith.constant 16 : i32
    %cst_141 = arith.constant 9.99999984E+16 : f32
    %357 = vector.broadcast %cst_141 : f32 to vector<16x16xf32>
    %358 = arith.cmpf oge, %350, %357 : vector<16x16xf32>
    %cst_142 = arith.constant 1.000000e+00 : f32
    %359 = vector.broadcast %cst_142 : f32 to vector<16x16xf32>
    %360 = arith.subf %354, %359 : vector<16x16xf32>
    %cst_143 = arith.constant 0.000000e+00 : f32
    %361 = vector.broadcast %cst_143 : f32 to vector<16x16xf32>
    %362 = arith.select %358, %361, %360 : vector<16x16xi1>, vector<16x16xf32>
    %cst_144 = arith.constant 3.000000e+02 : f32
    %363 = vector.broadcast %cst_144 : f32 to vector<16x16xf32>
    %364 = arith.mulf %362, %363 : vector<16x16xf32>
    %365 = arith.addf %350, %364 : vector<16x16xf32>
    %cst_145 = arith.constant 0.000000e+00 : f32
    %366 = vector.broadcast %cst_145 : f32 to vector<16x16xf32>
    %367 = arith.select %358, %366, %365 : vector<16x16xi1>, vector<16x16xf32>
    %c0_146 = arith.constant 0 : index
    %c0_147 = arith.constant 0 : index
    %c0_148 = arith.constant 0 : index
    %368 = vector.load %arg3[%c0_146, %c0_147, %c0_148] : memref<1x16x16xf32, #tpu.memory_space<vmem>>, vector<1x16x16xf32>
    %369 = vector.shape_cast %368 : vector<1x16x16xf32> to vector<16x16xf32>
    %370 = vector.shape_cast %367 : vector<16x16xf32> to vector<1x16x16xf32>
    tpu.vector_store %arg3[%c0_146, %c0_147, %c0_148], %370 {strides = array<i32>} : memref<1x16x16xf32, #tpu.memory_space<vmem>>, vector<1x16x16xf32>,
    %cst_149 = arith.constant 0.000000e+00 : f32
    %371 = vector.broadcast %cst_149 : f32 to vector<16x16xf32>
    %372 = arith.select %358, %371, %3 : vector<16x16xi1>, vector<16x16xf32>
    %373 = vector.shape_cast %3 : vector<16x16xf32> to vector<1x16x16xf32>
    %cst_150 = arith.constant dense<0.000000e+00> : vector<1xf32>
    %374 = vector.multi_reduction <add>, %373, %cst_150 [1, 2] : vector<1x16x16xf32> to vector<1xf32>
    %375 = vector.shape_cast %374 : vector<1xf32> to vector<1x1x1xf32>
    %376 = vector.extract %375[0, 0, 0] : f32 from vector<1x1x1xf32>
    %377 = vector.shape_cast %372 : vector<16x16xf32> to vector<1x16x16xf32>
    %cst_151 = arith.constant dense<0.000000e+00> : vector<1xf32>
    %378 = vector.multi_reduction <add>, %377, %cst_151 [1, 2] : vector<1x16x16xf32> to vector<1xf32>
    %379 = vector.shape_cast %378 : vector<1xf32> to vector<1x1x1xf32>
    %380 = vector.extract %379[0, 0, 0] : f32 from vector<1x1x1xf32>
    %381 = arith.subf %376, %380 : f32
    %382 = arith.mulf %3, %367 : vector<16x16xf32>
    %383 = vector.shape_cast %382 : vector<16x16xf32> to vector<1x16x16xf32>
    %cst_152 = arith.constant dense<0.000000e+00> : vector<1xf32>
    %384 = vector.multi_reduction <add>, %383, %cst_152 [1, 2] : vector<1x16x16xf32> to vector<1xf32>
    %385 = vector.shape_cast %384 : vector<1xf32> to vector<1x1x1xf32>
    %386 = vector.extract %385[0, 0, 0] : f32 from vector<1x1x1xf32>
    %387 = arith.mulf %3, %362 : vector<16x16xf32>
    %388 = vector.shape_cast %387 : vector<16x16xf32> to vector<1x16x16xf32>
    %cst_153 = arith.constant dense<0.000000e+00> : vector<1xf32>
    %389 = vector.multi_reduction <add>, %388, %cst_153 [1, 2] : vector<1x16x16xf32> to vector<1xf32>
    %390 = vector.shape_cast %389 : vector<1xf32> to vector<1x1x1xf32>
    %391 = vector.extract %390[0, 0, 0] : f32 from vector<1x1x1xf32>
    %cst_154 = arith.constant 0.000000e+00 : f32
    %392 = vector.broadcast %cst_154 : f32 to vector<16x16xf32>
    %393 = arith.cmpf ogt, %3, %392 : vector<16x16xf32>
    %394 = arith.andi %358, %393 : vector<16x16xi1>
    %cst_155 = arith.constant 1.000000e+00 : f32
    %cst_156 = arith.constant 0.000000e+00 : f32
    %395 = vector.broadcast %cst_155 : f32 to vector<16x16xf32>
    %396 = vector.broadcast %cst_156 : f32 to vector<16x16xf32>
    %397 = arith.select %394, %395, %396 : vector<16x16xi1>, vector<16x16xf32>
    %398 = vector.shape_cast %397 : vector<16x16xf32> to vector<1x16x16xf32>
    %cst_157 = arith.constant dense<0.000000e+00> : vector<1xf32>
    %399 = vector.multi_reduction <add>, %398, %cst_157 [1, 2] : vector<1x16x16xf32> to vector<1xf32>
    %400 = vector.shape_cast %399 : vector<1xf32> to vector<1x1x1xf32>
    %401 = vector.extract %400[0, 0, 0] : f32 from vector<1x1x1xf32>
    %cst_158 = arith.constant 0.000000e+00 : f32
    %402 = vector.broadcast %cst_158 : f32 to vector<16x16xf32>
    %403 = arith.cmpf oeq, %362, %402 : vector<16x16xf32>
    %cst_159 = arith.constant 0.000000e+00 : f32
    %404 = vector.broadcast %cst_159 : f32 to vector<16x16xf32>
    %405 = arith.select %403, %3, %404 : vector<16x16xi1>, vector<16x16xf32>
    %406 = vector.shape_cast %405 : vector<16x16xf32> to vector<1x16x16xf32>
    %cst_160 = arith.constant dense<0.000000e+00> : vector<1xf32>
    %407 = vector.multi_reduction <add>, %406, %cst_160 [1, 2] : vector<1x16x16xf32> to vector<1xf32>
    %408 = vector.shape_cast %407 : vector<1xf32> to vector<1x1x1xf32>
    %409 = vector.extract %408[0, 0, 0] : f32 from vector<1x1x1xf32>
    %cst_161 = arith.constant 1.000000e+00 : f32
    %410 = vector.broadcast %cst_161 : f32 to vector<16x16xf32>
    %411 = arith.cmpf oeq, %362, %410 : vector<16x16xf32>
    %cst_162 = arith.constant 0.000000e+00 : f32
    %412 = vector.broadcast %cst_162 : f32 to vector<16x16xf32>
    %413 = arith.select %411, %3, %412 : vector<16x16xi1>, vector<16x16xf32>
    %414 = vector.shape_cast %413 : vector<16x16xf32> to vector<1x16x16xf32>
    %cst_163 = arith.constant dense<0.000000e+00> : vector<1xf32>
    %415 = vector.multi_reduction <add>, %414, %cst_163 [1, 2] : vector<1x16x16xf32> to vector<1xf32>
    %416 = vector.shape_cast %415 : vector<1xf32> to vector<1x1x1xf32>
    %417 = vector.extract %416[0, 0, 0] : f32 from vector<1x1x1xf32>
    %cst_164 = arith.constant 2.000000e+00 : f32
    %418 = vector.broadcast %cst_164 : f32 to vector<16x16xf32>
    %419 = arith.cmpf oeq, %362, %418 : vector<16x16xf32>
    %cst_165 = arith.constant 0.000000e+00 : f32
    %420 = vector.broadcast %cst_165 : f32 to vector<16x16xf32>
    %421 = arith.select %419, %3, %420 : vector<16x16xi1>, vector<16x16xf32>
    %422 = vector.shape_cast %421 : vector<16x16xf32> to vector<1x16x16xf32>
    %cst_166 = arith.constant dense<0.000000e+00> : vector<1xf32>
    %423 = vector.multi_reduction <add>, %422, %cst_166 [1, 2] : vector<1x16x16xf32> to vector<1xf32>
    %424 = vector.shape_cast %423 : vector<1xf32> to vector<1x1x1xf32>
    %425 = vector.extract %424[0, 0, 0] : f32 from vector<1x1x1xf32>
    %cst_167 = arith.constant 2.000000e+00 : f32
    %426 = vector.broadcast %cst_167 : f32 to vector<16x16xf32>
    %427 = arith.cmpf ogt, %362, %426 : vector<16x16xf32>
    %cst_168 = arith.constant 0.000000e+00 : f32
    %428 = vector.broadcast %cst_168 : f32 to vector<16x16xf32>
    %429 = arith.select %427, %3, %428 : vector<16x16xi1>, vector<16x16xf32>
    %430 = vector.shape_cast %429 : vector<16x16xf32> to vector<1x16x16xf32>
    %cst_169 = arith.constant dense<0.000000e+00> : vector<1xf32>
    %431 = vector.multi_reduction <add>, %430, %cst_169 [1, 2] : vector<1x16x16xf32> to vector<1xf32>
    %432 = vector.shape_cast %431 : vector<1xf32> to vector<1x1x1xf32>
    %433 = vector.extract %432[0, 0, 0] : f32 from vector<1x1x1xf32>
    %434 = arith.addf %433, %381 : f32
    %435 = tpu.iota {dimensions = array<i32: 1>} : vector<1x128xi32>
    %cst_170 = arith.constant 0.000000e+00 : f32
    %436 = vector.broadcast %cst_170 : f32 to vector<1x128xf32>
    %c0_i32_171 = arith.constant 0 : i32
    %437 = vector.broadcast %c0_i32_171 : i32 to vector<1x128xi32>
    %438 = arith.cmpi eq, %435, %437 : vector<1x128xi32>
    %439 = vector.broadcast %386 : f32 to vector<1x128xf32>
    %440 = arith.select %438, %439, %436 : vector<1x128xi1>, vector<1x128xf32>
    %c1_i32_172 = arith.constant 1 : i32
    %441 = vector.broadcast %c1_i32_172 : i32 to vector<1x128xi32>
    %442 = arith.cmpi eq, %435, %441 : vector<1x128xi32>
    %443 = vector.broadcast %391 : f32 to vector<1x128xf32>
    %444 = arith.select %442, %443, %440 : vector<1x128xi1>, vector<1x128xf32>
    %c2_i32_173 = arith.constant 2 : i32
    %445 = vector.broadcast %c2_i32_173 : i32 to vector<1x128xi32>
    %446 = arith.cmpi eq, %435, %445 : vector<1x128xi32>
    %447 = vector.broadcast %381 : f32 to vector<1x128xf32>
    %448 = arith.select %446, %447, %444 : vector<1x128xi1>, vector<1x128xf32>
    %c3_i32_174 = arith.constant 3 : i32
    %449 = vector.broadcast %c3_i32_174 : i32 to vector<1x128xi32>
    %450 = arith.cmpi eq, %435, %449 : vector<1x128xi32>
    %451 = vector.broadcast %376 : f32 to vector<1x128xf32>
    %452 = arith.select %450, %451, %448 : vector<1x128xi1>, vector<1x128xf32>
    %c4_i32_175 = arith.constant 4 : i32
    %453 = vector.broadcast %c4_i32_175 : i32 to vector<1x128xi32>
    %454 = arith.cmpi eq, %435, %453 : vector<1x128xi32>
    %455 = vector.broadcast %401 : f32 to vector<1x128xf32>
    %456 = arith.select %454, %455, %452 : vector<1x128xi1>, vector<1x128xf32>
    %c5_i32_176 = arith.constant 5 : i32
    %457 = vector.broadcast %c5_i32_176 : i32 to vector<1x128xi32>
    %458 = arith.cmpi eq, %435, %457 : vector<1x128xi32>
    %459 = vector.broadcast %409 : f32 to vector<1x128xf32>
    %460 = arith.select %458, %459, %456 : vector<1x128xi1>, vector<1x128xf32>
    %c6_i32_177 = arith.constant 6 : i32
    %461 = vector.broadcast %c6_i32_177 : i32 to vector<1x128xi32>
    %462 = arith.cmpi eq, %435, %461 : vector<1x128xi32>
    %463 = vector.broadcast %417 : f32 to vector<1x128xf32>
    %464 = arith.select %462, %463, %460 : vector<1x128xi1>, vector<1x128xf32>
    %c7_i32_178 = arith.constant 7 : i32
    %465 = vector.broadcast %c7_i32_178 : i32 to vector<1x128xi32>
    %466 = arith.cmpi eq, %435, %465 : vector<1x128xi32>
    %467 = vector.broadcast %425 : f32 to vector<1x128xf32>
    %468 = arith.select %466, %467, %464 : vector<1x128xi1>, vector<1x128xf32>
    %c8_i32_179 = arith.constant 8 : i32
    %469 = vector.broadcast %c8_i32_179 : i32 to vector<1x128xi32>
    %470 = arith.cmpi eq, %435, %469 : vector<1x128xi32>
    %471 = vector.broadcast %434 : f32 to vector<1x128xf32>
    %472 = arith.select %470, %471, %468 : vector<1x128xi1>, vector<1x128xf32>
    %c0_180 = arith.constant 0 : index
    %c0_181 = arith.constant 0 : index
    %c0_182 = arith.constant 0 : index
    %473 = vector.load %arg4[%c0_180, %c0_181, %c0_182] : memref<1x1x128xf32, #tpu.memory_space<vmem>>, vector<1x1x128xf32>
    %474 = vector.shape_cast %473 : vector<1x1x128xf32> to vector<1x128xf32>
    %475 = vector.shape_cast %472 : vector<1x128xf32> to vector<1x1x128xf32>
    tpu.vector_store %arg4[%c0_180, %c0_181, %c0_182], %475 {strides = array<i32>} : memref<1x1x128xf32, #tpu.memory_space<vmem>>, vector<1x1x128xf32>,
    return
  }
  func.func @transform_0(%arg0: i32) -> (i32, i32, i32) {
    %c0_i32 = arith.constant 0 : i32
    %c0_i32_0 = arith.constant 0 : i32
    %c0_i32_1 = arith.constant 0 : i32
    return %arg0, %c0_i32, %c0_i32_0 : i32, i32, i32
  }
  func.func @transform_1(%arg0: i32) -> (i32, i32, i32) {
    %c0_i32 = arith.constant 0 : i32
    %c0_i32_0 = arith.constant 0 : i32
    %c0_i32_1 = arith.constant 0 : i32
    return %arg0, %c0_i32, %c0_i32_0 : i32, i32, i32
  }
  func.func @transform_2(%arg0: i32) -> (i32, i32, i32) {
    %c0_i32 = arith.constant 0 : i32
    %c0_i32_0 = arith.constant 0 : i32
    %c0_i32_1 = arith.constant 0 : i32
    return %arg0, %c0_i32, %c0_i32_0 : i32, i32, i32
  }
  func.func @transform_3(%arg0: i32) -> (i32, i32, i32) {
    %c0_i32 = arith.constant 0 : i32
    %c0_i32_0 = arith.constant 0 : i32
    %c0_i32_1 = arith.constant 0 : i32
    return %arg0, %c0_i32, %c0_i32_0 : i32, i32, i32
  }
}

</mosaic_0001>

<bundles_post_ra>
// kernel: tpu_custom_call.1
= control target key start
LH: loop header
LB: loop body
LE: loop exit
PB: predicated region body
PF: predicated region fallthrough
CT: control target
= control target key end

     0   :  { %9 = vsyncpa [#allocation5], 0  ;;  %s22686_s0 = inlined_call_operand.hbm [shape: f32[2,16,16], index: 0, kind: input, shape index: {}]   ;;  %s22687_s1 = inlined_call_operand.hbm [shape: f32[2,16,16], index: 1, kind: input, shape index: {}]   ;;  %s22688_s2 = inlined_call_operand.hbm [shape: f32[2,16,16], index: 2, kind: output, shape index: {0}]   ;;  %s22689_s3 = inlined_call_operand.hbm [shape: f32[2,1,128], index: 3, kind: output, shape index: {1}]  }
   0x1   :  { %11 = vsyncpa [#allocation5 + $0x1], 0 }
   0x2   :  { %12 = vsyncpa [#allocation8], 0 }
   0x3   :  { %14 = vsyncpa [#allocation8 + $0x1], 0 }
   0x4   :  { %15 = vsyncpa [#allocation6], 0 }
   0x5   :  { %17 = vsyncpa [#allocation6 + $0x1], 0 }
   0x6   :  { %18 = vsyncpa [#allocation11], 0 }
   0x7   :  { %20 = vsyncpa [#allocation11 + $0x1], 0  ;;  %s20736_s12 = smov 0   ;;  %s20738_s13 = smov 0  }
   0x8   :  { %s20740_s14 = smov 0   ;;  %s20742_s15 = smov 0  }
   0x9 LB: > { %s20757_s16 = sadd.s32 4294967295, %s20702_s15   ;;  %s17658_s17 = sadd.s32 4294967294, %s20702_s15   ;;  %s20702_s15 = sphi %s20742_s15, %s22721_s15   ;;  %s20698_s14 = sphi %s20740_s14, %s22720_s14   ;;  %s20694_s13 = sphi %s20738_s13, %s22719_s13   ;;  %s20690_s12 = sphi %s20736_s12, %s22718_s12  }
   0xa   : > { %s20761_s18 = sadd.s32 1, %s20702_s15   ;;  %s33_s19 = sadd.s32 1, %s20698_s14 }
   0xb   : > { %s30_s20 = ssub.s32 %s20702_s15, %s20761_s18  ;;  %p40_p0 = scmp.ne.s32.totalorder %s20698_s14, %s20694_s13 }
   0xc   : > { %p31_p1 = scmp.eq.s32.totalorder %s30_s20, 0  ;;  %p41_p2 = scmp.eq.s32.totalorder %s20702_s15, 0 }
   0xd   : > { %p46_p3 = scmp.ne.s32.totalorder %s20694_s13, %s20690_s12  ;;  %p47_p4 = scmp.eq.s32.totalorder %s20757_s16, 0 }
   0xe   : > { %s20773_s21 = scalar_select %p31_p1, %s20698_s14, %s33_s19  }
   0xf   : > { %p20775_p5 = por %p41_p2, %p40_p0  ;;  %p20779_p6 = por %p47_p4, %p46_p3 }
  0x10   : > { %p96_p7 = scmp.eq.s32.totalorder %s20757_s16, 1  ;;  %p102_p8 = scmp.eq.s32.totalorder %s17658_s17, 1 }
  0x11   : > { %s22693_s23 = scalar_select %p20779_p6, 1, 0 }
  0x12   : > { %p20496_p10 = scmp.lt.s32.totalorder %s20702_s15, 2  ;;  %p20786_p11 = por %p96_p7, %p40_p0 }
  0x13   : > { %p20790_p12 = por %p102_p8, %p46_p3  ;;  %s20795_s26 = sand.u32 1, %s20698_s14  }
  0x14   : > { %s22694_s24 = scalar_select %p20786_p11, 1, 0 }
  0x15   : > { %s22695_s25 = scalar_select %p20790_p12, 1, 0 }
  0x16   : > { %s17829_s27 = sshll.u32 %s20702_s15, 8  ;;  %s17661_s28 = sshll.u32 %s20795_s26, 4 }
  0x17   : > { %s20804_s4 = scalar_lea.hbm %s22686_s0, %s17829_s27  ;;  %s152_s5 = scalar_lea.vmem [#allocation4], %s17661_s28 }
  0x18   : > { %s159_s6 = sshll.u32 %s152_s5, 4  ;;  %p20810_p13 = pnand %p20496_p10, %p20775_p5  ;;  %s20814_s6 = int_to_ptr.vmem [resolvable:$true] %s159_s6 }
  0x19   : > { %s149_s8 = scalar_lea.sflag [#allocation5], %s20795_s26  ;;  %s20540_s9 = scalar_lea.hbm %s20804_s4, 256 }
  0x1a   : > { %p20541_p0 = scmp.ne.s32.totalorder %s20804_s4, %s20540_s9  ;;  %p20542_p1 = pneg %p20810_p13 }
  0x1b   : > { %s20545_s17 = scalar_lea.hbm %s22686_s0, 512  ;;  %p20546_p4 = scmp.lt.u32.totalorder %s20804_s4, %s22686_s0 }
  0x1c   : > { %p20543_p2 = pnand %p20542_p1, %p20541_p0  ;;  %p20547_p5 = scmp.lt.u32.totalorder %s20545_s17, %s20540_s9 }
  0x1d   : > { %p20549_p8 = scmp.lt.u32.totalorder %s20540_s9, %s20804_s4 }
  0x1e   : > { %p20544_p3 = pneg %p20543_p2  ;;  %p20548_p7 = por %p20547_p5, %p20546_p4 }
  0x20   : > { %p20550_p10 = por %p20549_p8, %p20548_p7 }
  0x22   : > { %p20551_p9 = pnand %p20550_p10, %p20544_p3 }
  0x24   : > { %20554 = shalt.err (!%p20551_p9)
}
  0x25   : > { %s20555_s22 = scalar_lea.vmem %s20814_s6, 256  ;;  %s20704_s29 = smov [#allocation4]  }
  0x26   : > { %p20556_p0 = scmp.ne.s32.totalorder %s20814_s6, %s20555_s22  ;;  %s20560_s30 = sshll.u32 %s20704_s29, 4  ;;  %s20561_s30 = int_to_ptr.vmem [resolvable:$false] %s20560_s30 }
  0x27   : > { %s20562_s5 = scalar_lea.vmem %s20561_s30, 512  ;;  %p20563_p11 = scmp.lt.s32.totalorder %s20814_s6, %s20561_s30 }
  0x28   : > { %p20558_p2 = pnand %p20556_p0, %p20542_p1  ;;  %p20564_p4 = scmp.lt.s32.totalorder %s20562_s5, %s20555_s22 }
  0x2a   : > { %p20559_p12 = pneg %p20558_p2  ;;  %p20565_p5 = por %p20564_p4, %p20563_p11 }
  0x2c   : > { %p20566_p7 = pnand %p20565_p5, %p20559_p12 }
  0x2e   : > { %20569 = shalt.err (!%p20566_p7)
}
  0x2f   : > { %s20705_s9 = smov 128   ;;  %s20706_s10 = smov 8  }
  0x30   : > { %20485 = dma.hbm_to_vmem [thread:$0]  (!%p20810_p13), %s20804_s4, 256, %s20814_s6, %s149_s8, %s20705_s9, %s20705_s9, %s20706_s10  }
  0x31   : > { %p17667_p9 = scmp.ge.s32.totalorder %s20702_s15, 1  ;;  %p188_p11 = scmp.lt.s32.totalorder %s20702_s15, 3 }
  0x32   : > { %s20858_s20 = scalar_lea.hbm %s22687_s1, %s17829_s27  ;;  %s173_s22 = scalar_lea.vmem [#allocation7], %s17661_s28 }
  0x33   : > { %p20849_p12 = pnand %p17667_p9, %p188_p11  ;;  %s180_s29 = sshll.u32 %s173_s22, 4  ;;  %s20862_s29 = int_to_ptr.vmem [resolvable:$true] %s180_s29 }
  0x34   : > { %s170_s4 = scalar_lea.sflag [#allocation8], %s20795_s26  ;;  %s20570_s6 = scalar_lea.hbm %s20858_s20, 256 }
  0x35   : > { %p20571_p3 = scmp.ne.s32.totalorder %s20858_s20, %s20570_s6  ;;  %s20575_s27 = scalar_lea.hbm %s22687_s1, 512 }
  0x36   : > { %p20576_p0 = scmp.lt.u32.totalorder %s20858_s20, %s22687_s1  ;;  %p20577_p2 = scmp.lt.u32.totalorder %s20575_s27, %s20570_s6 }
  0x37   : > { %p20573_p8 = pnand %p20571_p3, %p20542_p1  ;;  %p20579_p5 = scmp.lt.u32.totalorder %s20570_s6, %s20858_s20 }
  0x38   : > { %p20578_p4 = por %p20577_p2, %p20576_p0 }
  0x39   : > { %p20574_p10 = pneg %p20573_p8 }
  0x3a   : > { %p20580_p7 = por %p20579_p5, %p20578_p4 }
  0x3c   : > { %p20581_p9 = pnand %p20580_p7, %p20574_p10 }
  0x3e   : > { %20584 = shalt.err (!%p20581_p9)
}
  0x3f   : > { %s20585_s28 = scalar_lea.vmem %s20862_s29, 256  ;;  %s20707_s19 = smov [#allocation7]  }
  0x40   : > { %p20586_p11 = scmp.ne.s32.totalorder %s20862_s29, %s20585_s28  ;;  %s20590_s22 = sshll.u32 %s20707_s19, 4  ;;  %s20591_s22 = int_to_ptr.vmem [resolvable:$false] %s20590_s22 }
  0x41   : > { %s20592_s8 = scalar_lea.vmem %s20591_s22, 512  ;;  %p20593_p6 = scmp.lt.s32.totalorder %s20862_s29, %s20591_s22 }
  0x42   : > { %p20588_p3 = pnand %p20586_p11, %p20542_p1  ;;  %p20594_p0 = scmp.lt.s32.totalorder %s20592_s8, %s20585_s28 }
  0x44   : > { %p20589_p8 = pneg %p20588_p3  ;;  %p20595_p2 = por %p20594_p0, %p20593_p6 }
  0x46   : > { %p20596_p4 = pnand %p20595_p2, %p20589_p8 }
  0x48   : > { %20599 = shalt.err (!%p20596_p4)
}
  0x49   : > { %20488 = dma.hbm_to_vmem [thread:$0]  (!%p20810_p13), %s20858_s20, 256, %s20862_s29, %s170_s4, %s20705_s9, %s20705_s9, %s20706_s10  }
  0x4a   : > { %192 = sbr.rel (%p20849_p12) target bundleno = 6695 (0x1a27), region = 28  ;;  %s20896_s6 = sand.u32 (!%p20849_p12), 1, %s20694_s13  }
  0x4b   : > { %s20899_s30 = sshll.u32 (!%p20849_p12), %s20896_s6, 4  ;;  %s195_s7 = scalar_lea.sflag (!%p20849_p12), [#allocation5], %s20896_s6 }
  0x4c   : > { %s198_s27 = scalar_lea.vmem (!%p20849_p12), [#allocation4], %s20899_s30  ;;  %p22698_p6 = scmp.ne.s32.totalorder (!%p20849_p12), %s22693_s23, 0 }
  0x51   : > { %20673 = dma.done.wait (%p22698_p6), %s195_s7, 256  }
  0x52   : > { %20675 = vsyncadd (%p22698_p6), %s195_s7, 4294967040  ;;  %s204_s26 = scalar_lea.sflag [#allocation8], %s20896_s6  ;;  %s207_s9 = scalar_lea.vmem [#allocation7], %s20899_s30 }
  0x53   : > { %20677 = dma.done.wait (%p22698_p6), %s204_s26, 256  }
  0x54   : > { %20679 = vsyncadd (%p22698_p6), %s204_s26, 4294967040  ;;  %v249_v0 = vlaneseq  ;;  %v20708_v2 = vmov 1.0   ;;  %v20709_v3 = vmov 0.0   ;;  %v239_v7 = vld [vmem:[%s198_s27] sm:$0xff]  ;;  %v240_v8 = vld [vmem:[%s198_s27 + $0x8] sm:$0xff]  ;;  %vm262_vm1 = vcmask 130048  }
  0x55   : > { %v243_v10 = vand.u32 2147483647, %v239_v7  ;;  %v244_v12 = vand.u32 2147483647, %v240_v8  ;;  %v20710_v41 = vmov 0   ;;  %s22569_s23 = scalar_lea.vmem [#allocation9], %s20899_s30 }
  0x56   : > { %v20913_v1 = vshrl.u32 %v249_v0, 7  ;;  %v20933_v6 = vand.u32 127, %v249_v0  ;;  %20538 = vset.pattern.permute.xlu0 %v20710_v41  ;;  %20539 = vset.pattern.permute.xlu1 %v20710_v41  ;;  %s17831_s10 = sshll.u32 %s20757_s16, 8  ;;  %s17521_s4 = sshll.u32 %s22569_s23, 4  ;;  %s22598_s4 = int_to_ptr.vmem [resolvable:$true] %s17521_s4 }
  0x57   : > { %vm245_vm2 = vcmp.eq.f32.partialorder %v243_v10, inf  ;;  %vm246_vm3 = vcmp.eq.f32.partialorder %v244_v12, inf  ;;  %s22595_s29 = scalar_lea.hbm %s22688_s2, %s17831_s10  ;;  %s17504_s5 = scalar_lea.sflag [#allocation6], %s20896_s6 }
  0x58   : > { %vm269_vm0 = vcmp.eq.s32.totalorder %v20913_v1, 0  ;;  %v20936_v9 = vadd.s32 8, %v20913_v1  ;;  %vm254_vm4 = vcmp.eq.s32.totalorder %v20913_v1, %v20933_v6  ;;  %v20945_v14 = vsel %vm245_vm2, 1e+18, %v239_v7  ;;  %s20600_s17 = scalar_lea.vmem %s22598_s4, 256  ;;  %p22715_p1 = scmp.ne.s32.totalorder %s22694_s24, 0 }
  0x59   : > { %18504 = vmatprep.subr.msk.mxu0 %vm269_vm0, %v20708_v2  ;;  %v17671_v4 = vsel %vm269_vm0, 1.0, %v20709_v3  ;;  %18534 = vmatprep.subr.msk.mxu1 %vm269_vm0, %v20708_v2  ;;  %v20947_v15 = vsel %vm246_vm3, 1e+18, %v240_v8  ;;  %v276_v16 = vsel %vm262_vm1, %v20945_v14, 0  ;;  %263 = vst.msk [vmem:[#allocation2] sm:$0xff] %vm262_vm1, %v20945_v14  ;;  %vm1335_vm10 = vcmp.eq.s32.totalorder %v20913_v1, 1  ;;  %p20601_p13 = scmp.ne.s32.totalorder %s22598_s4, %s20600_s17 }
  0x5a   : > { %18505 = vmatpush3.msk.msra.mxu0 %vm269_vm0, %v20708_v2  ;;  %v20928_v5 = vsub.f32 %v17671_v4, %v17671_v4  ;;  %18535 = vmatpush3.msk.msra.mxu1 %vm269_vm0, %v20708_v2  ;;  %vm255_vm5 = vcmp.eq.s32.totalorder %v20936_v9, %v20933_v6  ;;  %v279_v18 = vsel %vm262_vm1, %v20947_v15, 0  ;;  %264 = vst.msk [vmem:[#allocation2 + $0x8] sm:$0xff] %vm262_vm1, %v20947_v15  ;;  %vm256_vm6 = vcmp.ge.f32.partialorder %v20945_v14, 1e+17  ;;  %s20712_s28 = smov [#allocation9]  }
  0x5b   : > { %v20960_v19 = vand.u32 4294901760, %v276_v16  ;;  %v20962_v20 = vand.u32 4294901760, %v279_v18  ;;  %vm258_vm7 = vmor %vm256_vm6, %vm254_vm4  ;;  %vm257_vm8 = vcmp.ge.f32.partialorder %v20947_v15, 1e+17  ;;  %v17686_v46 = vsel %vm1335_vm10, 1.0, %v20709_v3  ;;  %p20602_p12 = pnand %p20601_p13, %p22715_p1  ;;  %s20604_s19 = sshll.u32 %s20712_s28, 4  ;;  %s20605_s19 = int_to_ptr.vmem [resolvable:$false] %s20604_s19 }
  0x5c   : > { %v20939_v11 = vand.u32 4294901760, %v20928_v5  ;;  %v20966_v21 = vsel %vm258_vm7, 0.0, %v20708_v2  ;;  %vm259_vm9 = vmor %vm257_vm8, %vm255_vm5  ;;  %v21047_v47 = vsub.f32 %v17686_v46, %v17686_v46  ;;  %vm2401_vm13 = vcmp.eq.s32.totalorder %v20913_v1, 2  ;;  %s20606_s22 = scalar_lea.vmem %s20605_s19, 512  ;;  %p20607_p5 = scmp.lt.s32.totalorder %s22598_s4, %s20605_s19 }
  0x5d   : > { %v349_v22 = vsub.f32 %v276_v16, %v20960_v19  ;;  %v359_v23 = vsub.f32 %v279_v18, %v20962_v20  ;;  %v784_v24 = vsel %vm262_vm1, %v20966_v21, 0  ;;  %265 = vst.msk [vmem:[#allocation3] sm:$0xff] %vm262_vm1, %v20966_v21  ;;  %v20975_v25 = vsel %vm259_vm9, 0.0, %v20708_v2  ;;  %p20603_p10 = pneg %p20602_p12  ;;  %p20608_p7 = scmp.lt.s32.totalorder %s20606_s22, %s20600_s17 }
  0x5e   : > { %v372_v13 = vsub.f32 %v20928_v5, %v20939_v11  ;;  %v857_v26 = vsub.f32 %v784_v24, %v784_v24  ;;  %v787_v27 = vsel %vm262_vm1, %v20975_v25, 0  ;;  %266 = vst.msk [vmem:[#allocation3 + $0x8] sm:$0xff] %vm262_vm1, %v20975_v25  ;;  %v21050_v48 = vand.u32 4294901760, %v21047_v47 }
  0x5f   : > { %v350_v28 = vand.u32 4294901760, %v349_v22  ;;  %v360_v29 = vand.u32 4294901760, %v359_v23  ;;  %v867_v30 = vsub.f32 %v787_v27, %v787_v27  ;;  %vm4533_vm4 = vcmp.eq.s32.totalorder %v20913_v1, 4  ;;  %p20609_p9 = por %p20608_p7, %p20607_p5 }
  0x60   : > { %v373_v17 = vand.u32 4294901760, %v372_v13  ;;  %v858_v31 = vand.u32 4294901760, %v857_v26  ;;  %v1438_v49 = vsub.f32 %v21047_v47, %v21050_v48  ;;  %v17684_v51 = vld [vmem:[#allocation2] ss:$0 sm:$0xff]  ;;  %vm5599_vm7 = vcmp.eq.s32.totalorder %v20913_v1, 5 }
  0x61   : > { %v351_v32 = vsub.f32 %v349_v22, %v350_v28  ;;  %v361_v33 = vsub.f32 %v359_v23, %v360_v29  ;;  %v868_v34 = vand.u32 4294901760, %v867_v30  ;;  %p20610_p11 = pnand %p20609_p9, %p20603_p10 }
  0x62   : > { %18509 = vmatprep.subr.mxu0 %v373_v17  ;;  %18539 = vmatprep.subr.mxu1 %v373_v17  ;;  %v859_v35 = vsub.f32 %v857_v26, %v858_v31  ;;  %v1439_v50 = vand.u32 4294901760, %v1438_v49 }
  0x63   : > { %v352_v36 = vand.u32 4294901760, %v351_v32  ;;  %v362_v37 = vand.u32 4294901760, %v361_v33  ;;  %v869_v38 = vsub.f32 %v867_v30, %v868_v34 }
  0x64   : > { %v860_v39 = vand.u32 4294901760, %v859_v35  ;;  %v17685_v52 = vld [vmem:[#allocation3] ss:$0 sm:$0xff] }
  0x65   : > { %18506 = vmatprep.mubr.f32.mxu0 %v352_v36  ;;  %v870_v40 = vand.u32 4294901760, %v869_v38 }
  0x66   : > { %18507 = vmatmul.mubr.f32.vlgmr.msra.gmra.mrb[0].mxu0 %v362_v37  ;;  %18536 = vmatprep.mubr.f32.mxu1 %v860_v39 }
  0x67   : > { %18510 = vmatpush3.msra.mxu0 %v373_v17  ;;  %18537 = vmatmul.mubr.f32.vlgmr.msra.gmra.mrb[0].mxu1 %v870_v40 }
  0x68   : > { %18511 = vmatprep.mubr.f32.mxu0 %v20960_v19  ;;  %18514 = vmatprep.subr.mxu0 %v20928_v5 }
  0x69   : > { %18540 = vmatpush3.msra.mxu1 %v373_v17  ;;  %18541 = vmatprep.mubr.msk.f32.mxu1 %vm262_vm1, %v20966_v21 }
  0x6a   : > { %18544 = vmatprep.subr.mxu1 %v20928_v5 }
  0x6e   : > { %18512 = vmatmul.mubr.f32.vlgmr.msra.gmra.mrb[0].mxu0 %v20962_v20 }
  0x6f   : > { %18515 = vmatpush3.msra.mxu0 %v20928_v5  ;;  %18542 = vmatmul.mubr.msk.f32.vlgmr.msra.gmra.mrb[0].mxu1 %vm262_vm1, %v20975_v25 }
  0x70   : > { %18516 = vmatprep.mubr.f32.mxu0 %v349_v22  ;;  %18519 = vmatprep.subr.msk.mxu0 %vm269_vm0, %v20708_v2 }
  0x71   : > { %18545 = vmatpush3.msra.mxu1 %v20928_v5  ;;  %18546 = vmatprep.mubr.f32.mxu1 %v857_v26 }
  0x72   : > { %18549 = vmatprep.subr.msk.mxu1 %vm269_vm0, %v20708_v2 }
  0x76   : > { %18517 = vmatmul.mubr.f32.vlgmr.msra.gmra.mrb[0].mxu0 %v359_v23 }
  0x77   : > { %18520 = vmatpush3.msk.msra.mxu0 %vm269_vm0, %v20708_v2  ;;  %18547 = vmatmul.mubr.f32.vlgmr.msra.gmra.mrb[0].mxu1 %v867_v30 }
  0x78   : > { %18521 = vmatprep.mubr.f32.mxu0 %v350_v28  ;;  %18524 = vmatprep.subr.mxu0 %v20939_v11 }
  0x79   : > { %18550 = vmatpush3.msk.msra.mxu1 %vm269_vm0, %v20708_v2  ;;  %18551 = vmatprep.mubr.f32.mxu1 %v858_v31 }
  0x7a   : > { %18554 = vmatprep.subr.mxu1 %v20939_v11 }
  0x7e   : > { %18522 = vmatmul.mubr.f32.vlgmr.msra.gmra.mrb[0].mxu0 %v360_v29 }
  0x7f   : > { %18525 = vmatpush3.msra.mxu0 %v20939_v11  ;;  %18552 = vmatmul.mubr.f32.vlgmr.msra.gmra.mrb[0].mxu1 %v868_v34  ;;  %v17695_v34 = vsel %vm2401_vm13, 1.0, %v20709_v3 }
  0x80   : > { %18526 = vmatprep.mubr.f32.mxu0 %v20960_v19  ;;  %18529 = vmatprep.subr.msk.mxu0 %vm269_vm0, %v20708_v2  ;;  %v21141_v35 = vsub.f32 %v17695_v34, %v17695_v34 }
  0x81   : > { %18555 = vmatpush3.msra.mxu1 %v20939_v11  ;;  %18556 = vmatprep.mubr.msk.f32.mxu1 %vm262_vm1, %v20966_v21 }
  0x82   : > { %18559 = vmatprep.subr.msk.mxu1 %vm269_vm0, %v20708_v2  ;;  %v21147_v36 = vand.u32 4294901760, %v21141_v35 }
  0x84   : > { %v2504_v37 = vsub.f32 %v21141_v35, %v21147_v36 }
  0x86   : > { %18527 = vmatmul.mubr.f32.vlgmr.msra.gmra.mrb[0].mxu0 %v20962_v20  ;;  %v2505_v38 = vand.u32 4294901760, %v2504_v37 }
  0x87   : > { %18530 = vmatpush3.msk.msra.mxu0 %vm269_vm0, %v20708_v2  ;;  %18557 = vmatmul.mubr.msk.f32.vlgmr.msra.gmra.mrb[0].mxu1 %vm262_vm1, %v20975_v25 }
  0x88   : > { %18531 = vmatprep.mubr.f32.mxu0 %v20960_v19  ;;  %18560 = vmatpush3.msk.msra.mxu1 %vm269_vm0, %v20708_v2  ;;  %vm3467_vm0 = vcmp.eq.s32.totalorder %v20913_v1, 3 }
  0x89   : > { %18561 = vmatprep.mubr.msk.f32.mxu1 %vm262_vm1, %v20966_v21  ;;  %18564 = vmatprep.subr.msk.mxu0 %vm1335_vm10, %v20708_v2 }
  0x8a   : > { %18594 = vmatprep.subr.msk.mxu1 %vm1335_vm10, %v20708_v2 }
  0x8e   : > { %18532 = vmatmul.mubr.f32.vlgmr.msra.gmra.mrb[0].mxu0 %v20962_v20 }
  0x8f   : > { %18562 = vmatmul.mubr.msk.f32.vlgmr.msra.gmra.mrb[0].mxu1 %vm262_vm1, %v20975_v25  ;;  %18565 = vmatpush3.msk.msra.mxu0 %vm1335_vm10, %v20708_v2 }
  0x90   : > { %18595 = vmatpush3.msk.msra.mxu1 %vm1335_vm10, %v20708_v2  ;;  %18569 = vmatprep.subr.mxu0 %v1439_v50 }
  0x91   : > { %18599 = vmatprep.subr.mxu1 %v1439_v50 }
 0x161   : > { %v18533_v42 = vpop.f32.mrb[0].mxu0 }
 0x162   : > { %v773_v43 = vpop.f32.mrb[1].mxu0  ;;  %v18563_v44 = vpop.f32.mrb[0].mxu1 }
 0x163   : > { %1293 = vperm.xlu0 %20538, %v773_v43   ;;  %v1281_v45 = vpop.f32.mrb[1].mxu1 }
 0x164   : > { %1313 = vperm.xlu1 %20539, %v1281_v45  }
 0x167   : > { %1298 = vperm.xlu0 %20538, %v18533_v42  }
 0x168   : > { %1318 = vperm.xlu1 %20539, %v18563_v44  }
 0x1e2   : > { %v1294_v53 = vpop.permute.xlu0 %1293 }
 0x1e3   : > { %v1305_v54 = vadd.f32 %v17684_v51, %v1294_v53  ;;  %v1314_v55 = vpop.permute.xlu1 %1313 }
 0x1e4   : > { %v1325_v56 = vadd.f32 %v17685_v52, %v1314_v55 }
 0x1e5   : > { %vm1307_vm11 = vcmp.lt.f32.partialorder %v1305_v54, %v20945_v14 }
 0x1e6   : > { %v21056_v57 = vsel %vm1307_vm11, %v1305_v54, %v20945_v14  ;;  %v21059_v58 = vsel %vm1307_vm11, %v1325_v56, %v20966_v21  ;;  %v1299_v59 = vpop.permute.xlu0 %1298 }
 0x1e7   : > { %1329 = vst.msk [vmem:[#allocation2] sm:$0xff] %vm262_vm1, %v21056_v57  ;;  %v1342_v60 = vsel %vm262_vm1, %v21056_v57, 0  ;;  %1331 = vst.msk [vmem:[#allocation3] sm:$0xff] %vm262_vm1, %v21059_v58  ;;  %v1850_v61 = vsel %vm262_vm1, %v21059_v58, 0  ;;  %v1306_v62 = vadd.f32 %v17684_v51, %v1299_v59  ;;  %v1319_v63 = vpop.permute.xlu1 %1318 }
 0x1e8   : > { %v21069_v0 = vand.u32 4294901760, %v1342_v60  ;;  %v21071_v4 = vand.u32 4294901760, %v1850_v61  ;;  %v1326_v5 = vadd.f32 %v17685_v52, %v1319_v63 }
 0x1e9   : > { %vm1308_vm12 = vcmp.lt.f32.partialorder %v1306_v62, %v20947_v15 }
 0x1ea   : > { %v1923_v7 = vsub.f32 %v1850_v61, %v21071_v4  ;;  %v21076_v8 = vsel %vm1308_vm12, %v1306_v62, %v20947_v15  ;;  %v21079_v10 = vsel %vm1308_vm12, %v1326_v5, %v20975_v25  ;;  %v1415_v11 = vsub.f32 %v1342_v60, %v21069_v0 }
 0x1eb   : > { %1330 = vst.msk [vmem:[#allocation2 + $0x8] sm:$0xff] %vm262_vm1, %v21076_v8  ;;  %v1345_v12 = vsel %vm262_vm1, %v21076_v8, 0  ;;  %1332 = vst.msk [vmem:[#allocation3 + $0x8] sm:$0xff] %vm262_vm1, %v21079_v10  ;;  %v1853_v13 = vsel %vm262_vm1, %v21079_v10, 0 }
 0x1ec   : > { %v1424_v14 = vand.u32 4294901760, %v1345_v12  ;;  %v1932_v15 = vand.u32 4294901760, %v1853_v13  ;;  %v1416_v16 = vand.u32 4294901760, %v1415_v11  ;;  %v1924_v17 = vand.u32 4294901760, %v1923_v7 }
 0x1ee   : > { %v1425_v18 = vsub.f32 %v1345_v12, %v1424_v14  ;;  %v1933_v19 = vsub.f32 %v1853_v13, %v1932_v15  ;;  %v1417_v20 = vsub.f32 %v1415_v11, %v1416_v16  ;;  %v1925_v21 = vsub.f32 %v1923_v7, %v1924_v17  ;;  %v17693_v39 = vld [vmem:[#allocation2 + $0x1] ss:$0 sm:$0xff]  ;;  %v17694_v44 = vld [vmem:[#allocation3 + $0x1] ss:$0 sm:$0xff] }
 0x1f0   : > { %v1418_v22 = vand.u32 4294901760, %v1417_v20  ;;  %v1926_v23 = vand.u32 4294901760, %v1925_v21  ;;  %v1426_v24 = vand.u32 4294901760, %v1425_v18  ;;  %v1934_v25 = vand.u32 4294901760, %v1933_v19 }
 0x1f2   : > { %18566 = vmatprep.mubr.f32.mxu0 %v1418_v22  ;;  %18596 = vmatprep.mubr.f32.mxu1 %v1926_v23  ;;  %v1427_v26 = vsub.f32 %v1425_v18, %v1426_v24  ;;  %v1935_v27 = vsub.f32 %v1933_v19, %v1934_v25  ;;  %v17704_v22 = vsel %vm3467_vm0, 1.0, %v20709_v3 }
 0x1f3   : > { %v21236_v23 = vsub.f32 %v17704_v22, %v17704_v22 }
 0x1f4   : > { %v1428_v28 = vand.u32 4294901760, %v1427_v26  ;;  %v1936_v29 = vand.u32 4294901760, %v1935_v27 }
 0x1f6   : > { %18567 = vmatmul.mubr.f32.vlgmr.msra.gmra.mrb[2].mxu0 %v1428_v28  ;;  %18597 = vmatmul.mubr.f32.vlgmr.msra.gmra.mrb[2].mxu1 %v1936_v29 }
 0x1f7   : > { %18570 = vmatpush3.msra.mxu0 %v1439_v50  ;;  %18571 = vmatprep.mubr.f32.mxu0 %v21069_v0 }
 0x1f8   : > { %18601 = vmatprep.mubr.f32.mxu1 %v21071_v4  ;;  %18574 = vmatprep.subr.mxu0 %v21047_v47 }
 0x1f9   : > { %18600 = vmatpush3.msra.mxu1 %v1439_v50 }
 0x1fa   : > { %18604 = vmatprep.subr.mxu1 %v21047_v47 }
 0x1fe   : > { %18572 = vmatmul.mubr.f32.vlgmr.msra.gmra.mrb[2].mxu0 %v1424_v14  ;;  %18602 = vmatmul.mubr.f32.vlgmr.msra.gmra.mrb[2].mxu1 %v1932_v15 }
 0x1ff   : > { %18575 = vmatpush3.msra.mxu0 %v21047_v47  ;;  %18576 = vmatprep.mubr.f32.mxu0 %v1415_v11 }
 0x200   : > { %18606 = vmatprep.mubr.f32.mxu1 %v1923_v7  ;;  %18579 = vmatprep.subr.msk.mxu0 %vm1335_vm10, %v20708_v2 }
 0x201   : > { %18605 = vmatpush3.msra.mxu1 %v21047_v47 }
 0x202   : > { %18609 = vmatprep.subr.msk.mxu1 %vm1335_vm10, %v20708_v2 }
 0x206   : > { %18577 = vmatmul.mubr.f32.vlgmr.msra.gmra.mrb[2].mxu0 %v1425_v18  ;;  %18607 = vmatmul.mubr.f32.vlgmr.msra.gmra.mrb[2].mxu1 %v1933_v19 }
 0x207   : > { %18580 = vmatpush3.msk.msra.mxu0 %vm1335_vm10, %v20708_v2  ;;  %18581 = vmatprep.mubr.f32.mxu0 %v1416_v16 }
 0x208   : > { %18611 = vmatprep.mubr.f32.mxu1 %v1924_v17  ;;  %18584 = vmatprep.subr.mxu0 %v21050_v48 }
 0x209   : > { %18610 = vmatpush3.msk.msra.mxu1 %vm1335_vm10, %v20708_v2 }
 0x20a   : > { %18614 = vmatprep.subr.mxu1 %v21050_v48 }
 0x20e   : > { %18582 = vmatmul.mubr.f32.vlgmr.msra.gmra.mrb[2].mxu0 %v1426_v24  ;;  %18612 = vmatmul.mubr.f32.vlgmr.msra.gmra.mrb[2].mxu1 %v1934_v25  ;;  %v21242_v24 = vand.u32 4294901760, %v21236_v23 }
 0x20f   : > { %18585 = vmatpush3.msra.mxu0 %v21050_v48  ;;  %18586 = vmatprep.mubr.f32.mxu0 %v21069_v0 }
 0x210   : > { %18616 = vmatprep.mubr.f32.mxu1 %v21071_v4  ;;  %18589 = vmatprep.subr.msk.mxu0 %vm1335_vm10, %v20708_v2  ;;  %v3570_v25 = vsub.f32 %v21236_v23, %v21242_v24 }
 0x211   : > { %18615 = vmatpush3.msra.mxu1 %v21050_v48 }
 0x212   : > { %18619 = vmatprep.subr.msk.mxu1 %vm1335_vm10, %v20708_v2  ;;  %v3571_v26 = vand.u32 4294901760, %v3570_v25 }
 0x216   : > { %18587 = vmatmul.mubr.f32.vlgmr.msra.gmra.mrb[2].mxu0 %v1424_v14  ;;  %18617 = vmatmul.mubr.f32.vlgmr.msra.gmra.mrb[2].mxu1 %v1932_v15 }
 0x217   : > { %18590 = vmatpush3.msk.msra.mxu0 %vm1335_vm10, %v20708_v2  ;;  %18591 = vmatprep.mubr.f32.mxu0 %v21069_v0 }
 0x218   : > { %18621 = vmatprep.mubr.f32.mxu1 %v21071_v4  ;;  %18620 = vmatpush3.msk.msra.mxu1 %vm1335_vm10, %v20708_v2  ;;  %vm6665_vm10 = vcmp.eq.s32.totalorder %v20913_v1, 6 }
 0x219   : > { %18624 = vmatprep.subr.msk.mxu0 %vm2401_vm13, %v20708_v2  ;;  %18654 = vmatprep.subr.msk.mxu1 %vm2401_vm13, %v20708_v2 }
 0x21e   : > { %18592 = vmatmul.mubr.f32.vlgmr.msra.gmra.mrb[2].mxu0 %v1424_v14  ;;  %18622 = vmatmul.mubr.f32.vlgmr.msra.gmra.mrb[2].mxu1 %v1932_v15 }
 0x21f   : > { %18625 = vmatpush3.msk.msra.mxu0 %vm2401_vm13, %v20708_v2  ;;  %18655 = vmatpush3.msk.msra.mxu1 %vm2401_vm13, %v20708_v2 }
 0x220   : > { %18629 = vmatprep.subr.mxu0 %v2505_v38  ;;  %18659 = vmatprep.subr.mxu1 %v2505_v38 }
 0x2f1   : > { %v18593_v30 = vpop.f32.mrb[2].mxu0  ;;  %v18623_v31 = vpop.f32.mrb[2].mxu1 }
 0x2f2   : > { %v1839_v32 = vpop.f32.mrb[3].mxu0  ;;  %2364 = vperm.xlu1 %20539, %v18593_v30   ;;  %v2347_v33 = vpop.f32.mrb[3].mxu1 }
 0x2f3   : > { %2359 = vperm.xlu0 %20538, %v1839_v32  }
 0x2f6   : > { %2384 = vperm.xlu1 %20539, %v18623_v31  }
 0x2f7   : > { %2379 = vperm.xlu0 %20538, %v2347_v33  }
 0x371   : > { %v2365_v40 = vpop.permute.xlu1 %2364 }
 0x372   : > { %v2372_v41 = vadd.f32 %v17693_v39, %v2365_v40  ;;  %v2360_v42 = vpop.permute.xlu0 %2359 }
 0x373   : > { %v2371_v43 = vadd.f32 %v17693_v39, %v2360_v42 }
 0x374   : > { %vm2374_vm14 = vcmp.lt.f32.partialorder %v2372_v41, %v21076_v8 }
 0x375   : > { %v21153_v45 = vsel %vm2374_vm14, %v2372_v41, %v21076_v8  ;;  %vm2373_vm15 = vcmp.lt.f32.partialorder %v2371_v43, %v21056_v57  ;;  %v2385_v46 = vpop.permute.xlu1 %2384 }
 0x376   : > { %2396 = vst.msk [vmem:[#allocation2 + $0x8] sm:$0xff] %vm262_vm1, %v21153_v45  ;;  %v2411_v47 = vsel %vm262_vm1, %v21153_v45, 0  ;;  %v21163_v48 = vsel %vm2373_vm15, %v2371_v43, %v21056_v57  ;;  %v2392_v49 = vadd.f32 %v17694_v44, %v2385_v46  ;;  %v2380_v50 = vpop.permute.xlu0 %2379 }
 0x377   : > { %v21165_v51 = vand.u32 4294901760, %v2411_v47  ;;  %2395 = vst.msk [vmem:[#allocation2] sm:$0xff] %vm262_vm1, %v21163_v48  ;;  %v2408_v52 = vsel %vm262_vm1, %v21163_v48, 0  ;;  %v2391_v53 = vadd.f32 %v17694_v44, %v2380_v50 }
 0x378   : > { %v2480_v54 = vand.u32 4294901760, %v2408_v52  ;;  %v21172_v55 = vsel %vm2374_vm14, %v2392_v49, %v21079_v10 }
 0x379   : > { %v2491_v56 = vsub.f32 %v2411_v47, %v21165_v51  ;;  %2398 = vst.msk [vmem:[#allocation3 + $0x8] sm:$0xff] %vm262_vm1, %v21172_v55  ;;  %v2919_v59 = vsel %vm262_vm1, %v21172_v55, 0  ;;  %v21182_v60 = vsel %vm2373_vm15, %v2391_v53, %v21059_v58 }
 0x37a   : > { %v2998_v61 = vand.u32 4294901760, %v2919_v59  ;;  %2397 = vst.msk [vmem:[#allocation3] sm:$0xff] %vm262_vm1, %v21182_v60  ;;  %v2916_v62 = vsel %vm262_vm1, %v21182_v60, 0  ;;  %v2481_v63 = vsub.f32 %v2408_v52, %v2480_v54 }
 0x37b   : > { %v2988_v0 = vand.u32 4294901760, %v2916_v62  ;;  %v2492_v4 = vand.u32 4294901760, %v2491_v56 }
 0x37c   : > { %v2999_v5 = vsub.f32 %v2919_v59, %v2998_v61  ;;  %v2482_v7 = vand.u32 4294901760, %v2481_v63 }
 0x37d   : > { %v2989_v8 = vsub.f32 %v2916_v62, %v2988_v0  ;;  %v2493_v10 = vsub.f32 %v2491_v56, %v2492_v4 }
 0x37e   : > { %v2483_v11 = vsub.f32 %v2481_v63, %v2482_v7  ;;  %v3000_v12 = vand.u32 4294901760, %v2999_v5  ;;  %v17702_v27 = vld [vmem:[#allocation2 + $0x2] ss:$0 sm:$0xff] }
 0x37f   : > { %v2990_v13 = vand.u32 4294901760, %v2989_v8  ;;  %v2494_v14 = vand.u32 4294901760, %v2493_v10 }
 0x380   : > { %v2484_v57 = vand.u32 4294901760, %v2483_v11  ;;  %v3001_v58 = vsub.f32 %v2999_v5, %v3000_v12 }
 0x381   : > { %v2991_v15 = vsub.f32 %v2989_v8, %v2990_v13  ;;  %v17703_v32 = vld [vmem:[#allocation3 + $0x2] ss:$0 sm:$0xff] }
 0x382   : > { %18626 = vmatprep.mubr.f32.mxu0 %v2484_v57  ;;  %v3002_v17 = vand.u32 4294901760, %v3001_v58 }
 0x383   : > { %18627 = vmatmul.mubr.f32.vlgmr.msra.gmra.mrb[4].mxu0 %v2494_v14  ;;  %v2992_v16 = vand.u32 4294901760, %v2991_v15 }
 0x384   : > { %18630 = vmatpush3.msra.mxu0 %v2505_v38  ;;  %18631 = vmatprep.mubr.f32.mxu0 %v2480_v54 }
 0x385   : > { %18656 = vmatprep.mubr.f32.mxu1 %v2992_v16  ;;  %18634 = vmatprep.subr.mxu0 %v21141_v35 }
 0x386   : > { %18657 = vmatmul.mubr.f32.vlgmr.msra.gmra.mrb[4].mxu1 %v3002_v17 }
 0x387   : > { %18661 = vmatprep.mubr.f32.mxu1 %v2988_v0  ;;  %18660 = vmatpush3.msra.mxu1 %v2505_v38 }
 0x388   : > { %18664 = vmatprep.subr.mxu1 %v21141_v35 }
 0x38b   : > { %18632 = vmatmul.mubr.f32.vlgmr.msra.gmra.mrb[4].mxu0 %v21165_v51 }
 0x38c   : > { %18635 = vmatpush3.msra.mxu0 %v21141_v35  ;;  %18636 = vmatprep.mubr.f32.mxu0 %v2481_v63 }
 0x38d   : > { %18639 = vmatprep.subr.msk.mxu0 %vm2401_vm13, %v20708_v2 }
 0x38e   : > { %18662 = vmatmul.mubr.f32.vlgmr.msra.gmra.mrb[4].mxu1 %v2998_v61 }
 0x38f   : > { %18666 = vmatprep.mubr.f32.mxu1 %v2989_v8  ;;  %18665 = vmatpush3.msra.mxu1 %v21141_v35 }
 0x390   : > { %18669 = vmatprep.subr.msk.mxu1 %vm2401_vm13, %v20708_v2 }
 0x393   : > { %18637 = vmatmul.mubr.f32.vlgmr.msra.gmra.mrb[4].mxu0 %v2491_v56 }
 0x394   : > { %18640 = vmatpush3.msk.msra.mxu0 %vm2401_vm13, %v20708_v2  ;;  %18641 = vmatprep.mubr.f32.mxu0 %v2482_v7 }
 0x395   : > { %18644 = vmatprep.subr.mxu0 %v21147_v36 }
 0x396   : > { %18667 = vmatmul.mubr.f32.vlgmr.msra.gmra.mrb[4].mxu1 %v2999_v5 }
 0x397   : > { %18671 = vmatprep.mubr.f32.mxu1 %v2990_v13  ;;  %18670 = vmatpush3.msk.msra.mxu1 %vm2401_vm13, %v20708_v2 }
 0x398   : > { %18674 = vmatprep.subr.mxu1 %v21147_v36 }
 0x39b   : > { %18642 = vmatmul.mubr.f32.vlgmr.msra.gmra.mrb[4].mxu0 %v2492_v4 }
 0x39c   : > { %18645 = vmatpush3.msra.mxu0 %v21147_v36  ;;  %18646 = vmatprep.mubr.f32.mxu0 %v2480_v54 }
 0x39d   : > { %18649 = vmatprep.subr.msk.mxu0 %vm2401_vm13, %v20708_v2 }
 0x39e   : > { %18672 = vmatmul.mubr.f32.vlgmr.msra.gmra.mrb[4].mxu1 %v3000_v12  ;;  %v17713_v12 = vsel %vm4533_vm4, 1.0, %v20709_v3 }
 0x39f   : > { %18676 = vmatprep.mubr.f32.mxu1 %v2988_v0  ;;  %18675 = vmatpush3.msra.mxu1 %v21147_v36  ;;  %v21331_v13 = vsub.f32 %v17713_v12, %v17713_v12 }
 0x3a0   : > { %18679 = vmatprep.subr.msk.mxu1 %vm2401_vm13, %v20708_v2 }
 0x3a1   : > { %v21337_v57 = vand.u32 4294901760, %v21331_v13 }
 0x3a3   : > { %18647 = vmatmul.mubr.f32.vlgmr.msra.gmra.mrb[4].mxu0 %v21165_v51  ;;  %v4636_v58 = vsub.f32 %v21331_v13, %v21337_v57 }
 0x3a4   : > { %18650 = vmatpush3.msk.msra.mxu0 %vm2401_vm13, %v20708_v2  ;;  %18651 = vmatprep.mubr.f32.mxu0 %v2480_v54 }
 0x3a5   : > { %18684 = vmatprep.subr.msk.mxu0 %vm3467_vm0, %v20708_v2  ;;  %v4637_v14 = vand.u32 4294901760, %v4636_v58 }
 0x3a6   : > { %18677 = vmatmul.mubr.f32.vlgmr.msra.gmra.mrb[4].mxu1 %v2998_v61 }
 0x3a7   : > { %18681 = vmatprep.mubr.f32.mxu1 %v2988_v0  ;;  %18680 = vmatpush3.msk.msra.mxu1 %vm2401_vm13, %v20708_v2  ;;  %vm7731_vm13 = vcmp.eq.s32.totalorder %v20913_v1, 7 }
 0x3a8   : > { %18714 = vmatprep.subr.msk.mxu1 %vm3467_vm0, %v20708_v2 }
 0x3ab   : > { %18652 = vmatmul.mubr.f32.vlgmr.msra.gmra.mrb[4].mxu0 %v21165_v51 }
 0x3ac   : > { %18685 = vmatpush3.msk.msra.mxu0 %vm3467_vm0, %v20708_v2 }
 0x3ad   : > { %18689 = vmatprep.subr.mxu0 %v3571_v26 }
 0x3ae   : > { %18682 = vmatmul.mubr.f32.vlgmr.msra.gmra.mrb[4].mxu1 %v2998_v61 }
 0x3af   : > { %18715 = vmatpush3.msk.msra.mxu1 %vm3467_vm0, %v20708_v2 }
 0x3b0   : > { %18719 = vmatprep.subr.mxu1 %v3571_v26 }
 0x47e   : > { %v18653_v18 = vpop.f32.mrb[4].mxu0 }
 0x47f   : > { %v2905_v19 = vpop.f32.mrb[5].mxu0  ;;  %3430 = vperm.xlu1 %20539, %v18653_v18  }
 0x480   : > { %3425 = vperm.xlu0 %20538, %v2905_v19  }
 0x481   : > { %v18683_v20 = vpop.f32.mrb[4].mxu1 }
 0x482   : > { %v3413_v21 = vpop.f32.mrb[5].mxu1 }
 0x483   : > { %3450 = vperm.xlu1 %20539, %v18683_v20  }
 0x484   : > { %3445 = vperm.xlu0 %20538, %v3413_v21  }
 0x4fe   : > { %v3431_v28 = vpop.permute.xlu1 %3430 }
 0x4ff   : > { %v3438_v29 = vadd.f32 %v17702_v27, %v3431_v28  ;;  %v3426_v30 = vpop.permute.xlu0 %3425 }
 0x500   : > { %v3437_v31 = vadd.f32 %v17702_v27, %v3426_v30 }
 0x501   : > { %vm3440_vm2 = vcmp.lt.f32.partialorder %v3438_v29, %v21153_v45 }
 0x502   : > { %v21248_v33 = vsel %vm3440_vm2, %v3438_v29, %v21153_v45  ;;  %vm3439_vm3 = vcmp.lt.f32.partialorder %v3437_v31, %v21163_v48  ;;  %v3451_v34 = vpop.permute.xlu1 %3450 }
 0x503   : > { %3462 = vst.msk [vmem:[#allocation2 + $0x8] sm:$0xff] %vm262_vm1, %v21248_v33  ;;  %v3477_v35 = vsel %vm262_vm1, %v21248_v33, 0  ;;  %v21258_v36 = vsel %vm3439_vm3, %v3437_v31, %v21163_v48  ;;  %v3458_v37 = vadd.f32 %v17703_v32, %v3451_v34  ;;  %v3446_v38 = vpop.permute.xlu0 %3445 }
 0x504   : > { %v21260_v39 = vand.u32 4294901760, %v3477_v35  ;;  %3461 = vst.msk [vmem:[#allocation2] sm:$0xff] %vm262_vm1, %v21258_v36  ;;  %v3474_v40 = vsel %vm262_vm1, %v21258_v36, 0  ;;  %v3457_v41 = vadd.f32 %v17703_v32, %v3446_v38 }
 0x505   : > { %v3546_v42 = vand.u32 4294901760, %v3474_v40  ;;  %v21267_v43 = vsel %vm3440_vm2, %v3458_v37, %v21172_v55  ;;  %vm20711_vm2 = vmmov 1  }
 0x506   : > { %v3557_v44 = vsub.f32 %v3477_v35, %v21260_v39  ;;  %3464 = vst.msk [vmem:[#allocation3 + $0x8] sm:$0xff] %vm262_vm1, %v21267_v43  ;;  %v3985_v45 = vsel %vm262_vm1, %v21267_v43, 0  ;;  %v21277_v46 = vsel %vm3439_vm3, %v3457_v41, %v21182_v60 }
 0x507   : > { %v4064_v47 = vand.u32 4294901760, %v3985_v45  ;;  %3463 = vst.msk [vmem:[#allocation3] sm:$0xff] %vm262_vm1, %v21277_v46  ;;  %v3982_v49 = vsel %vm262_vm1, %v21277_v46, 0  ;;  %v3547_v50 = vsub.f32 %v3474_v40, %v3546_v42 }
 0x508   : > { %v4054_v51 = vand.u32 4294901760, %v3982_v49  ;;  %v3558_v52 = vand.u32 4294901760, %v3557_v44 }
 0x509   : > { %v4065_v53 = vsub.f32 %v3985_v45, %v4064_v47  ;;  %v3548_v54 = vand.u32 4294901760, %v3547_v50 }
 0x50a   : > { %v4055_v55 = vsub.f32 %v3982_v49, %v4054_v51  ;;  %v3559_v56 = vsub.f32 %v3557_v44, %v3558_v52 }
 0x50b   : > { %v3549_v59 = vsub.f32 %v3547_v50, %v3548_v54  ;;  %v4066_v61 = vand.u32 4294901760, %v4065_v53  ;;  %v17711_v15 = vld [vmem:[#allocation2 + $0x3] ss:$0 sm:$0xff] }
 0x50c   : > { %v4056_v62 = vand.u32 4294901760, %v4055_v55  ;;  %v3560_v63 = vand.u32 4294901760, %v3559_v56 }
 0x50d   : > { %v3550_v48 = vand.u32 4294901760, %v3549_v59  ;;  %v4067_v60 = vsub.f32 %v4065_v53, %v4066_v61 }
 0x50e   : > { %v4057_v0 = vsub.f32 %v4055_v55, %v4056_v62  ;;  %v17712_v20 = vld [vmem:[#allocation3 + $0x3] ss:$0 sm:$0xff] }
 0x50f   : > { %18686 = vmatprep.mubr.f32.mxu0 %v3550_v48  ;;  %v4068_v5 = vand.u32 4294901760, %v4067_v60 }
 0x510   : > { %18687 = vmatmul.mubr.f32.vlgmr.msra.gmra.mrb[6].mxu0 %v3560_v63  ;;  %v4058_v4 = vand.u32 4294901760, %v4057_v0 }
 0x511   : > { %18690 = vmatpush3.msra.mxu0 %v3571_v26  ;;  %18691 = vmatprep.mubr.f32.mxu0 %v3546_v42 }
 0x512   : > { %18716 = vmatprep.mubr.f32.mxu1 %v4058_v4  ;;  %18694 = vmatprep.subr.mxu0 %v21236_v23 }
 0x513   : > { %18717 = vmatmul.mubr.f32.vlgmr.msra.gmra.mrb[6].mxu1 %v4068_v5 }
 0x514   : > { %18721 = vmatprep.mubr.f32.mxu1 %v4054_v51  ;;  %18720 = vmatpush3.msra.mxu1 %v3571_v26 }
 0x515   : > { %18724 = vmatprep.subr.mxu1 %v21236_v23 }
 0x518   : > { %18692 = vmatmul.mubr.f32.vlgmr.msra.gmra.mrb[6].mxu0 %v21260_v39 }
 0x519   : > { %18695 = vmatpush3.msra.mxu0 %v21236_v23  ;;  %18696 = vmatprep.mubr.f32.mxu0 %v3547_v50 }
 0x51a   : > { %18699 = vmatprep.subr.msk.mxu0 %vm3467_vm0, %v20708_v2 }
 0x51b   : > { %18722 = vmatmul.mubr.f32.vlgmr.msra.gmra.mrb[6].mxu1 %v4064_v47 }
 0x51c   : > { %18726 = vmatprep.mubr.f32.mxu1 %v4055_v55  ;;  %18725 = vmatpush3.msra.mxu1 %v21236_v23 }
 0x51d   : > { %18729 = vmatprep.subr.msk.mxu1 %vm3467_vm0, %v20708_v2 }
 0x520   : > { %18697 = vmatmul.mubr.f32.vlgmr.msra.gmra.mrb[6].mxu0 %v3557_v44 }
 0x521   : > { %18700 = vmatpush3.msk.msra.mxu0 %vm3467_vm0, %v20708_v2  ;;  %18701 = vmatprep.mubr.f32.mxu0 %v3548_v54 }
 0x522   : > { %18704 = vmatprep.subr.mxu0 %v21242_v24 }
 0x523   : > { %18727 = vmatmul.mubr.f32.vlgmr.msra.gmra.mrb[6].mxu1 %v4065_v53 }
 0x524   : > { %18731 = vmatprep.mubr.f32.mxu1 %v4056_v62  ;;  %18730 = vmatpush3.msk.msra.mxu1 %vm3467_vm0, %v20708_v2 }
 0x525   : > { %18734 = vmatprep.subr.mxu1 %v21242_v24 }
 0x528   : > { %18702 = vmatmul.mubr.f32.vlgmr.msra.gmra.mrb[6].mxu0 %v3558_v52 }
 0x529   : > { %18705 = vmatpush3.msra.mxu0 %v21242_v24  ;;  %18706 = vmatprep.mubr.f32.mxu0 %v3546_v42 }
 0x52a   : > { %18709 = vmatprep.subr.msk.mxu0 %vm3467_vm0, %v20708_v2 }
 0x52b   : > { %18732 = vmatmul.mubr.f32.vlgmr.msra.gmra.mrb[6].mxu1 %v4066_v61  ;;  %v17722_v61 = vsel %vm5599_vm7, 1.0, %v20709_v3 }
 0x52c   : > { %18736 = vmatprep.mubr.f32.mxu1 %v4054_v51  ;;  %18735 = vmatpush3.msra.mxu1 %v21242_v24  ;;  %v21429_v62 = vsub.f32 %v17722_v61, %v17722_v61 }
 0x52d   : > { %18739 = vmatprep.subr.msk.mxu1 %vm3467_vm0, %v20708_v2 }
 0x52e   : > { %v21432_v48 = vand.u32 4294901760, %v21429_v62 }
 0x530   : > { %18707 = vmatmul.mubr.f32.vlgmr.msra.gmra.mrb[6].mxu0 %v21260_v39  ;;  %v5702_v60 = vsub.f32 %v21429_v62, %v21432_v48 }
 0x531   : > { %18710 = vmatpush3.msk.msra.mxu0 %vm3467_vm0, %v20708_v2  ;;  %18711 = vmatprep.mubr.f32.mxu0 %v3546_v42 }
 0x532   : > { %18744 = vmatprep.subr.msk.mxu0 %vm4533_vm4, %v20708_v2  ;;  %v5703_v63 = vand.u32 4294901760, %v5702_v60 }
 0x533   : > { %18737 = vmatmul.mubr.f32.vlgmr.msra.gmra.mrb[6].mxu1 %v4064_v47 }
 0x534   : > { %18741 = vmatprep.mubr.f32.mxu1 %v4054_v51  ;;  %18740 = vmatpush3.msk.msra.mxu1 %vm3467_vm0, %v20708_v2  ;;  %vm8798_vm0 = vcmp.eq.s32.totalorder %v20936_v9, 8 }
 0x535   : > { %18774 = vmatprep.subr.msk.mxu1 %vm4533_vm4, %v20708_v2  ;;  %v17749_v1 = vsel %vm8798_vm0, 1.0, %v20709_v3  ;;  %vm21705_vm3 = vmpackc.low %vm8798_vm0, %vm20711_vm2 }
 0x538   : > { %18712 = vmatmul.mubr.f32.vlgmr.msra.gmra.mrb[6].mxu0 %v21260_v39 }
 0x539   : > { %18745 = vmatpush3.msk.msra.mxu0 %vm4533_vm4, %v20708_v2 }
 0x53a   : > { %18749 = vmatprep.subr.mxu0 %v4637_v14 }
 0x53b   : > { %18742 = vmatmul.mubr.f32.vlgmr.msra.gmra.mrb[6].mxu1 %v4064_v47 }
 0x53c   : > { %18775 = vmatpush3.msk.msra.mxu1 %vm4533_vm4, %v20708_v2 }
 0x53d   : > { %18779 = vmatprep.subr.mxu1 %v4637_v14 }
 0x60b   : > { %v18713_v7 = vpop.f32.mrb[6].mxu0 }
 0x60c   : > { %v3971_v8 = vpop.f32.mrb[7].mxu0  ;;  %4496 = vperm.xlu1 %20539, %v18713_v7  }
 0x60d   : > { %4491 = vperm.xlu0 %20538, %v3971_v8  }
 0x60e   : > { %v18743_v10 = vpop.f32.mrb[6].mxu1 }
 0x60f   : > { %v4479_v11 = vpop.f32.mrb[7].mxu1 }
 0x610   : > { %4516 = vperm.xlu1 %20539, %v18743_v10  }
 0x611   : > { %4511 = vperm.xlu0 %20538, %v4479_v11  }
 0x68b   : > { %v4497_v16 = vpop.permute.xlu1 %4496 }
 0x68c   : > { %v4504_v17 = vadd.f32 %v17711_v15, %v4497_v16  ;;  %v4492_v18 = vpop.permute.xlu0 %4491 }
 0x68d   : > { %v4503_v19 = vadd.f32 %v17711_v15, %v4492_v18 }
 0x68e   : > { %vm4506_vm5 = vcmp.lt.f32.partialorder %v4504_v17, %v21248_v33 }
 0x68f   : > { %v21343_v21 = vsel %vm4506_vm5, %v4504_v17, %v21248_v33  ;;  %vm4505_vm6 = vcmp.lt.f32.partialorder %v4503_v19, %v21258_v36  ;;  %v4517_v22 = vpop.permute.xlu1 %4516 }
 0x690   : > { %4528 = vst.msk [vmem:[#allocation2 + $0x8] sm:$0xff] %vm262_vm1, %v21343_v21  ;;  %v4543_v23 = vsel %vm262_vm1, %v21343_v21, 0  ;;  %v21353_v24 = vsel %vm4505_vm6, %v4503_v19, %v21258_v36  ;;  %v4524_v25 = vadd.f32 %v17712_v20, %v4517_v22  ;;  %v4512_v26 = vpop.permute.xlu0 %4511 }
 0x691   : > { %v21355_v27 = vand.u32 4294901760, %v4543_v23  ;;  %4527 = vst.msk [vmem:[#allocation2] sm:$0xff] %vm262_vm1, %v21353_v24  ;;  %v4540_v28 = vsel %vm262_vm1, %v21353_v24, 0  ;;  %v4523_v29 = vadd.f32 %v17712_v20, %v4512_v26 }
 0x692   : > { %v4612_v30 = vand.u32 4294901760, %v4540_v28  ;;  %v21362_v31 = vsel %vm4506_vm5, %v4524_v25, %v21267_v43 }
 0x693   : > { %v4623_v32 = vsub.f32 %v4543_v23, %v21355_v27  ;;  %4530 = vst.msk [vmem:[#allocation3 + $0x8] sm:$0xff] %vm262_vm1, %v21362_v31  ;;  %v5051_v33 = vsel %vm262_vm1, %v21362_v31, 0  ;;  %v21372_v34 = vsel %vm4505_vm6, %v4523_v29, %v21277_v46  ;;  %vm9864_vm6 = vcmp.eq.s32.totalorder %v20936_v9, 9 }
 0x694   : > { %v5130_v35 = vand.u32 4294901760, %v5051_v33  ;;  %4529 = vst.msk [vmem:[#allocation3] sm:$0xff] %vm262_vm1, %v21372_v34  ;;  %v5048_v37 = vsel %vm262_vm1, %v21372_v34, 0  ;;  %v4613_v38 = vsub.f32 %v4540_v28, %v4612_v30 }
 0x695   : > { %v5120_v39 = vand.u32 4294901760, %v5048_v37  ;;  %v4624_v40 = vand.u32 4294901760, %v4623_v32 }
 0x696   : > { %v5131_v41 = vsub.f32 %v5051_v33, %v5130_v35  ;;  %v4614_v42 = vand.u32 4294901760, %v4613_v38 }
 0x697   : > { %v5121_v43 = vsub.f32 %v5048_v37, %v5120_v39  ;;  %v4625_v44 = vsub.f32 %v4623_v32, %v4624_v40 }
 0x698   : > { %v4615_v45 = vsub.f32 %v4613_v38, %v4614_v42  ;;  %v5132_v47 = vand.u32 4294901760, %v5131_v41  ;;  %v17720_v0 = vld [vmem:[#allocation2 + $0x4] ss:$0 sm:$0xff] }
 0x699   : > { %v5122_v49 = vand.u32 4294901760, %v5121_v43  ;;  %v4626_v50 = vand.u32 4294901760, %v4625_v44 }
 0x69a   : > { %v4616_v36 = vand.u32 4294901760, %v4615_v45  ;;  %v5133_v46 = vsub.f32 %v5131_v41, %v5132_v47 }
 0x69b   : > { %v5123_v51 = vsub.f32 %v5121_v43, %v5122_v49  ;;  %v17721_v10 = vld [vmem:[#allocation3 + $0x4] ss:$0 sm:$0xff] }
 0x69c   : > { %18746 = vmatprep.mubr.f32.mxu0 %v4616_v36  ;;  %v5134_v53 = vand.u32 4294901760, %v5133_v46 }
 0x69d   : > { %18747 = vmatmul.mubr.f32.vlgmr.msra.gmra.mrb[8].mxu0 %v4626_v50  ;;  %v5124_v52 = vand.u32 4294901760, %v5123_v51 }
 0x69e   : > { %18750 = vmatpush3.msra.mxu0 %v4637_v14  ;;  %18751 = vmatprep.mubr.f32.mxu0 %v4612_v30 }
 0x69f   : > { %18776 = vmatprep.mubr.f32.mxu1 %v5124_v52  ;;  %18754 = vmatprep.subr.mxu0 %v21331_v13 }
 0x6a0   : > { %18777 = vmatmul.mubr.f32.vlgmr.msra.gmra.mrb[8].mxu1 %v5134_v53 }
 0x6a1   : > { %18781 = vmatprep.mubr.f32.mxu1 %v5120_v39  ;;  %18780 = vmatpush3.msra.mxu1 %v4637_v14 }
 0x6a2   : > { %18784 = vmatprep.subr.mxu1 %v21331_v13 }
 0x6a5   : > { %18752 = vmatmul.mubr.f32.vlgmr.msra.gmra.mrb[8].mxu0 %v21355_v27 }
 0x6a6   : > { %18755 = vmatpush3.msra.mxu0 %v21331_v13  ;;  %18756 = vmatprep.mubr.f32.mxu0 %v4613_v38 }
 0x6a7   : > { %18759 = vmatprep.subr.msk.mxu0 %vm4533_vm4, %v20708_v2 }
 0x6a8   : > { %18782 = vmatmul.mubr.f32.vlgmr.msra.gmra.mrb[8].mxu1 %v5130_v35 }
 0x6a9   : > { %18786 = vmatprep.mubr.f32.mxu1 %v5121_v43  ;;  %18785 = vmatpush3.msra.mxu1 %v21331_v13 }
 0x6aa   : > { %18789 = vmatprep.subr.msk.mxu1 %vm4533_vm4, %v20708_v2 }
 0x6ad   : > { %18757 = vmatmul.mubr.f32.vlgmr.msra.gmra.mrb[8].mxu0 %v4623_v32 }
 0x6ae   : > { %18760 = vmatpush3.msk.msra.mxu0 %vm4533_vm4, %v20708_v2  ;;  %18761 = vmatprep.mubr.f32.mxu0 %v4614_v42 }
 0x6af   : > { %18764 = vmatprep.subr.mxu0 %v21337_v57 }
 0x6b0   : > { %18787 = vmatmul.mubr.f32.vlgmr.msra.gmra.mrb[8].mxu1 %v5131_v41 }
 0x6b1   : > { %18791 = vmatprep.mubr.f32.mxu1 %v5122_v49  ;;  %18790 = vmatpush3.msk.msra.mxu1 %vm4533_vm4, %v20708_v2 }
 0x6b2   : > { %18794 = vmatprep.subr.mxu1 %v21337_v57 }
 0x6b5   : > { %18762 = vmatmul.mubr.f32.vlgmr.msra.gmra.mrb[8].mxu0 %v4624_v40 }
 0x6b6   : > { %18765 = vmatpush3.msra.mxu0 %v21337_v57  ;;  %18766 = vmatprep.mubr.f32.mxu0 %v4612_v30 }
 0x6b7   : > { %18769 = vmatprep.subr.msk.mxu0 %vm4533_vm4, %v20708_v2 }
 0x6b8   : > { %18792 = vmatmul.mubr.f32.vlgmr.msra.gmra.mrb[8].mxu1 %v5132_v47  ;;  %v17731_v47 = vsel %vm6665_vm10, 1.0, %v20709_v3 }
 0x6b9   : > { %18796 = vmatprep.mubr.f32.mxu1 %v5120_v39  ;;  %18795 = vmatpush3.msra.mxu1 %v21337_v57  ;;  %v21524_v49 = vsub.f32 %v17731_v47, %v17731_v47 }
 0x6ba   : > { %18799 = vmatprep.subr.msk.mxu1 %vm4533_vm4, %v20708_v2 }
 0x6bb   : > { %v21527_v36 = vand.u32 4294901760, %v21524_v49 }
 0x6bd   : > { %18767 = vmatmul.mubr.f32.vlgmr.msra.gmra.mrb[8].mxu0 %v21355_v27  ;;  %v6768_v46 = vsub.f32 %v21524_v49, %v21527_v36 }
 0x6be   : > { %18770 = vmatpush3.msk.msra.mxu0 %vm4533_vm4, %v20708_v2  ;;  %18771 = vmatprep.mubr.f32.mxu0 %v4612_v30 }
 0x6bf   : > { %18804 = vmatprep.subr.msk.mxu0 %vm5599_vm7, %v20708_v2  ;;  %v6769_v50 = vand.u32 4294901760, %v6768_v46 }
 0x6c0   : > { %18797 = vmatmul.mubr.f32.vlgmr.msra.gmra.mrb[8].mxu1 %v5130_v35 }
 0x6c1   : > { %18801 = vmatprep.mubr.f32.mxu1 %v5120_v39  ;;  %18800 = vmatpush3.msk.msra.mxu1 %vm4533_vm4, %v20708_v2 }
 0x6c2   : > { %18834 = vmatprep.subr.msk.mxu1 %vm5599_vm7, %v20708_v2 }
 0x6c5   : > { %18772 = vmatmul.mubr.f32.vlgmr.msra.gmra.mrb[8].mxu0 %v21355_v27 }
 0x6c6   : > { %18805 = vmatpush3.msk.msra.mxu0 %vm5599_vm7, %v20708_v2 }
 0x6c7   : > { %18809 = vmatprep.subr.mxu0 %v5703_v63 }
 0x6c8   : > { %18802 = vmatmul.mubr.f32.vlgmr.msra.gmra.mrb[8].mxu1 %v5130_v35 }
 0x6c9   : > { %18835 = vmatpush3.msk.msra.mxu1 %vm5599_vm7, %v20708_v2 }
 0x6ca   : > { %18839 = vmatprep.subr.mxu1 %v5703_v63 }
 0x798   : > { %v18773_v54 = vpop.f32.mrb[8].mxu0 }
 0x799   : > { %v5037_v55 = vpop.f32.mrb[9].mxu0  ;;  %5562 = vperm.xlu1 %20539, %v18773_v54  }
 0x79a   : > { %5557 = vperm.xlu0 %20538, %v5037_v55  }
 0x79b   : > { %v18803_v56 = vpop.f32.mrb[8].mxu1 }
 0x79c   : > { %v5545_v59 = vpop.f32.mrb[9].mxu1 }
 0x79d   : > { %5582 = vperm.xlu1 %20539, %v18803_v56  }
 0x79e   : > { %5577 = vperm.xlu0 %20538, %v5545_v59  }
 0x818   : > { %v5563_v4 = vpop.permute.xlu1 %5562 }
 0x819   : > { %v5570_v5 = vadd.f32 %v17720_v0, %v5563_v4  ;;  %v5558_v7 = vpop.permute.xlu0 %5557 }
 0x81a   : > { %v5569_v8 = vadd.f32 %v17720_v0, %v5558_v7 }
 0x81b   : > { %vm5572_vm8 = vcmp.lt.f32.partialorder %v5570_v5, %v21343_v21 }
 0x81c   : > { %v21438_v11 = vsel %vm5572_vm8, %v5570_v5, %v21343_v21  ;;  %vm5571_vm9 = vcmp.lt.f32.partialorder %v5569_v8, %v21353_v24  ;;  %v5583_v12 = vpop.permute.xlu1 %5582 }
 0x81d   : > { %5594 = vst.msk [vmem:[#allocation2 + $0x8] sm:$0xff] %vm262_vm1, %v21438_v11  ;;  %v5609_v13 = vsel %vm262_vm1, %v21438_v11, 0  ;;  %v21448_v57 = vsel %vm5571_vm9, %v5569_v8, %v21353_v24  ;;  %v5590_v58 = vadd.f32 %v17721_v10, %v5583_v12  ;;  %v5578_v14 = vpop.permute.xlu0 %5577 }
 0x81e   : > { %v21450_v15 = vand.u32 4294901760, %v5609_v13  ;;  %5593 = vst.msk [vmem:[#allocation2] sm:$0xff] %vm262_vm1, %v21448_v57  ;;  %v5606_v16 = vsel %vm262_vm1, %v21448_v57, 0  ;;  %v5589_v17 = vadd.f32 %v17721_v10, %v5578_v14 }
 0x81f   : > { %v5678_v18 = vand.u32 4294901760, %v5606_v16  ;;  %v21457_v19 = vsel %vm5572_vm8, %v5590_v58, %v21362_v31 }
 0x820   : > { %v5689_v20 = vsub.f32 %v5609_v13, %v21450_v15  ;;  %5596 = vst.msk [vmem:[#allocation3 + $0x8] sm:$0xff] %vm262_vm1, %v21457_v19  ;;  %v6117_v21 = vsel %vm262_vm1, %v21457_v19, 0  ;;  %v21467_v22 = vsel %vm5571_vm9, %v5589_v17, %v21372_v34 }
 0x821   : > { %v6196_v23 = vand.u32 4294901760, %v6117_v21  ;;  %5595 = vst.msk [vmem:[#allocation3] sm:$0xff] %vm262_vm1, %v21467_v22  ;;  %v6114_v25 = vsel %vm262_vm1, %v21467_v22, 0  ;;  %v5679_v26 = vsub.f32 %v5606_v16, %v5678_v18 }
 0x822   : > { %v6186_v27 = vand.u32 4294901760, %v6114_v25  ;;  %v5690_v28 = vand.u32 4294901760, %v5689_v20 }
 0x823   : > { %v6197_v29 = vsub.f32 %v6117_v21, %v6196_v23  ;;  %v5680_v30 = vand.u32 4294901760, %v5679_v26 }
 0x824   : > { %v6187_v31 = vsub.f32 %v6114_v25, %v6186_v27  ;;  %v5691_v32 = vsub.f32 %v5689_v20, %v5690_v28 }
 0x825   : > { %v5681_v33 = vsub.f32 %v5679_v26, %v5680_v30  ;;  %v6198_v35 = vand.u32 4294901760, %v6197_v29  ;;  %v17729_v51 = vld [vmem:[#allocation2 + $0x5] ss:$0 sm:$0xff] }
 0x826   : > { %v6188_v37 = vand.u32 4294901760, %v6187_v31  ;;  %v5692_v38 = vand.u32 4294901760, %v5691_v32 }
 0x827   : > { %v5682_v24 = vand.u32 4294901760, %v5681_v33  ;;  %v6199_v34 = vsub.f32 %v6197_v29, %v6198_v35 }
 0x828   : > { %v6189_v39 = vsub.f32 %v6187_v31, %v6188_v37  ;;  %v17730_v61 = vld [vmem:[#allocation3 + $0x5] ss:$0 sm:$0xff] }
 0x829   : > { %18806 = vmatprep.mubr.f32.mxu0 %v5682_v24  ;;  %v6200_v41 = vand.u32 4294901760, %v6199_v34 }
 0x82a   : > { %18807 = vmatmul.mubr.f32.vlgmr.msra.gmra.mrb[10].mxu0 %v5692_v38  ;;  %v6190_v40 = vand.u32 4294901760, %v6189_v39 }
 0x82b   : > { %18810 = vmatpush3.msra.mxu0 %v5703_v63  ;;  %18811 = vmatprep.mubr.f32.mxu0 %v5678_v18 }
 0x82c   : > { %18836 = vmatprep.mubr.f32.mxu1 %v6190_v40  ;;  %18814 = vmatprep.subr.mxu0 %v21429_v62 }
 0x82d   : > { %18837 = vmatmul.mubr.f32.vlgmr.msra.gmra.mrb[10].mxu1 %v6200_v41 }
 0x82e   : > { %18841 = vmatprep.mubr.f32.mxu1 %v6186_v27  ;;  %18840 = vmatpush3.msra.mxu1 %v5703_v63 }
 0x82f   : > { %18844 = vmatprep.subr.mxu1 %v21429_v62 }
 0x832   : > { %18812 = vmatmul.mubr.f32.vlgmr.msra.gmra.mrb[10].mxu0 %v21450_v15 }
 0x833   : > { %18815 = vmatpush3.msra.mxu0 %v21429_v62  ;;  %18816 = vmatprep.mubr.f32.mxu0 %v5679_v26 }
 0x834   : > { %18819 = vmatprep.subr.msk.mxu0 %vm5599_vm7, %v20708_v2 }
 0x835   : > { %18842 = vmatmul.mubr.f32.vlgmr.msra.gmra.mrb[10].mxu1 %v6196_v23 }
 0x836   : > { %18846 = vmatprep.mubr.f32.mxu1 %v6187_v31  ;;  %18845 = vmatpush3.msra.mxu1 %v21429_v62 }
 0x837   : > { %18849 = vmatprep.subr.msk.mxu1 %vm5599_vm7, %v20708_v2 }
 0x83a   : > { %18817 = vmatmul.mubr.f32.vlgmr.msra.gmra.mrb[10].mxu0 %v5689_v20 }
 0x83b   : > { %18820 = vmatpush3.msk.msra.mxu0 %vm5599_vm7, %v20708_v2  ;;  %18821 = vmatprep.mubr.f32.mxu0 %v5680_v30 }
 0x83c   : > { %18824 = vmatprep.subr.mxu0 %v21432_v48 }
 0x83d   : > { %18847 = vmatmul.mubr.f32.vlgmr.msra.gmra.mrb[10].mxu1 %v6197_v29 }
 0x83e   : > { %18851 = vmatprep.mubr.f32.mxu1 %v6188_v37  ;;  %18850 = vmatpush3.msk.msra.mxu1 %vm5599_vm7, %v20708_v2 }
 0x83f   : > { %18854 = vmatprep.subr.mxu1 %v21432_v48 }
 0x842   : > { %18822 = vmatmul.mubr.f32.vlgmr.msra.gmra.mrb[10].mxu0 %v5690_v28 }
 0x843   : > { %18825 = vmatpush3.msra.mxu0 %v21432_v48  ;;  %18826 = vmatprep.mubr.f32.mxu0 %v5678_v18 }
 0x844   : > { %18829 = vmatprep.subr.msk.mxu0 %vm5599_vm7, %v20708_v2 }
 0x845   : > { %18852 = vmatmul.mubr.f32.vlgmr.msra.gmra.mrb[10].mxu1 %v6198_v35  ;;  %v17740_v35 = vsel %vm7731_vm13, 1.0, %v20709_v3 }
 0x846   : > { %18856 = vmatprep.mubr.f32.mxu1 %v6186_v27  ;;  %18855 = vmatpush3.msra.mxu1 %v21432_v48  ;;  %v21619_v37 = vsub.f32 %v17740_v35, %v17740_v35 }
 0x847   : > { %18859 = vmatprep.subr.msk.mxu1 %vm5599_vm7, %v20708_v2 }
 0x848   : > { %v21622_v24 = vand.u32 4294901760, %v21619_v37 }
 0x84a   : > { %18827 = vmatmul.mubr.f32.vlgmr.msra.gmra.mrb[10].mxu0 %v21450_v15  ;;  %v7834_v34 = vsub.f32 %v21619_v37, %v21622_v24 }
 0x84b   : > { %18830 = vmatpush3.msk.msra.mxu0 %vm5599_vm7, %v20708_v2  ;;  %18831 = vmatprep.mubr.f32.mxu0 %v5678_v18 }
 0x84c   : > { %18864 = vmatprep.subr.msk.mxu0 %vm6665_vm10, %v20708_v2  ;;  %v7835_v38 = vand.u32 4294901760, %v7834_v34 }
 0x84d   : > { %18857 = vmatmul.mubr.f32.vlgmr.msra.gmra.mrb[10].mxu1 %v6196_v23 }
 0x84e   : > { %18861 = vmatprep.mubr.f32.mxu1 %v6186_v27  ;;  %18860 = vmatpush3.msk.msra.mxu1 %vm5599_vm7, %v20708_v2  ;;  %vm21805_vm7 = vmpackc.low %vm9864_vm6, %vm20711_vm2 }
 0x84f   : > { %18894 = vmatprep.subr.msk.mxu1 %vm6665_vm10, %v20708_v2 }
 0x852   : > { %18832 = vmatmul.mubr.f32.vlgmr.msra.gmra.mrb[10].mxu0 %v21450_v15 }
 0x853   : > { %18865 = vmatpush3.msk.msra.mxu0 %vm6665_vm10, %v20708_v2 }
 0x854   : > { %18869 = vmatprep.subr.mxu0 %v6769_v50 }
 0x855   : > { %18862 = vmatmul.mubr.f32.vlgmr.msra.gmra.mrb[10].mxu1 %v6196_v23 }
 0x856   : > { %18895 = vmatpush3.msk.msra.mxu1 %vm6665_vm10, %v20708_v2 }
 0x857   : > { %18899 = vmatprep.subr.mxu1 %v6769_v50 }
 0x925   : > { %v18833_v42 = vpop.f32.mrb[10].mxu0 }
 0x926   : > { %v6103_v43 = vpop.f32.mrb[11].mxu0  ;;  %6628 = vperm.xlu1 %20539, %v18833_v42  }
 0x927   : > { %6623 = vperm.xlu0 %20538, %v6103_v43  }
 0x928   : > { %v18863_v44 = vpop.f32.mrb[10].mxu1 }
 0x929   : > { %v6611_v45 = vpop.f32.mrb[11].mxu1 }
 0x92a   : > { %6648 = vperm.xlu1 %20539, %v18863_v44  }
 0x92b   : > { %6643 = vperm.xlu0 %20538, %v6611_v45  }
 0x9a5   : > { %v6629_v52 = vpop.permute.xlu1 %6628 }
 0x9a6   : > { %v6636_v53 = vadd.f32 %v17729_v51, %v6629_v52  ;;  %v6624_v54 = vpop.permute.xlu0 %6623 }
 0x9a7   : > { %v6635_v55 = vadd.f32 %v17729_v51, %v6624_v54 }
 0x9a8   : > { %vm6638_vm11 = vcmp.lt.f32.partialorder %v6636_v53, %v21438_v11 }
 0x9a9   : > { %v21533_v56 = vsel %vm6638_vm11, %v6636_v53, %v21438_v11  ;;  %vm6637_vm12 = vcmp.lt.f32.partialorder %v6635_v55, %v21448_v57  ;;  %v6649_v59 = vpop.permute.xlu1 %6648 }
 0x9aa   : > { %6660 = vst.msk [vmem:[#allocation2 + $0x8] sm:$0xff] %vm262_vm1, %v21533_v56  ;;  %v6675_v62 = vsel %vm262_vm1, %v21533_v56, 0  ;;  %v21543_v48 = vsel %vm6637_vm12, %v6635_v55, %v21448_v57  ;;  %v6656_v60 = vadd.f32 %v17730_v61, %v6649_v59  ;;  %v6644_v63 = vpop.permute.xlu0 %6643 }
 0x9ab   : > { %v21545_v0 = vand.u32 4294901760, %v6675_v62  ;;  %6659 = vst.msk [vmem:[#allocation2] sm:$0xff] %vm262_vm1, %v21543_v48  ;;  %v6672_v4 = vsel %vm262_vm1, %v21543_v48, 0  ;;  %v6655_v5 = vadd.f32 %v17730_v61, %v6644_v63 }
 0x9ac   : > { %v6744_v7 = vand.u32 4294901760, %v6672_v4  ;;  %v21552_v8 = vsel %vm6638_vm11, %v6656_v60, %v21457_v19 }
 0x9ad   : > { %v6755_v10 = vsub.f32 %v6675_v62, %v21545_v0  ;;  %6662 = vst.msk [vmem:[#allocation3 + $0x8] sm:$0xff] %vm262_vm1, %v21552_v8  ;;  %v7183_v11 = vsel %vm262_vm1, %v21552_v8, 0  ;;  %v21562_v12 = vsel %vm6637_vm12, %v6655_v5, %v21467_v22 }
 0x9ae   : > { %v7262_v13 = vand.u32 4294901760, %v7183_v11  ;;  %6661 = vst.msk [vmem:[#allocation3] sm:$0xff] %vm262_vm1, %v21562_v12  ;;  %v7180_v58 = vsel %vm262_vm1, %v21562_v12, 0  ;;  %v6745_v14 = vsub.f32 %v6672_v4, %v6744_v7 }
 0x9af   : > { %v7252_v15 = vand.u32 4294901760, %v7180_v58  ;;  %v6756_v16 = vand.u32 4294901760, %v6755_v10 }
 0x9b0   : > { %v7263_v17 = vsub.f32 %v7183_v11, %v7262_v13  ;;  %v6746_v18 = vand.u32 4294901760, %v6745_v14 }
 0x9b1   : > { %v7253_v19 = vsub.f32 %v7180_v58, %v7252_v15  ;;  %v6757_v20 = vsub.f32 %v6755_v10, %v6756_v16 }
 0x9b2   : > { %v6747_v21 = vsub.f32 %v6745_v14, %v6746_v18  ;;  %v7264_v23 = vand.u32 4294901760, %v7263_v17  ;;  %v17738_v39 = vld [vmem:[#allocation2 + $0x6] ss:$0 sm:$0xff] }
 0x9b3   : > { %v7254_v25 = vand.u32 4294901760, %v7253_v19  ;;  %v6758_v26 = vand.u32 4294901760, %v6757_v20 }
 0x9b4   : > { %v6748_v57 = vand.u32 4294901760, %v6747_v21  ;;  %v7265_v22 = vsub.f32 %v7263_v17, %v7264_v23 }
 0x9b5   : > { %v7255_v27 = vsub.f32 %v7253_v19, %v7254_v25  ;;  %v17739_v47 = vld [vmem:[#allocation3 + $0x6] ss:$0 sm:$0xff] }
 0x9b6   : > { %18866 = vmatprep.mubr.f32.mxu0 %v6748_v57  ;;  %v7266_v29 = vand.u32 4294901760, %v7265_v22  ;;  %v21709_v57 = vsub.f32 %v17749_v1, %v17749_v1 }
 0x9b7   : > { %18867 = vmatmul.mubr.f32.vlgmr.msra.gmra.mrb[12].mxu0 %v6758_v26  ;;  %v7256_v28 = vand.u32 4294901760, %v7255_v27 }
 0x9b8   : > { %18870 = vmatpush3.msra.mxu0 %v6769_v50  ;;  %18871 = vmatprep.mubr.f32.mxu0 %v6744_v7 }
 0x9b9   : > { %18896 = vmatprep.mubr.f32.mxu1 %v7256_v28  ;;  %18874 = vmatprep.subr.mxu0 %v21524_v49 }
 0x9ba   : > { %18897 = vmatmul.mubr.f32.vlgmr.msra.gmra.mrb[12].mxu1 %v7266_v29 }
 0x9bb   : > { %18901 = vmatprep.mubr.f32.mxu1 %v7252_v15  ;;  %18900 = vmatpush3.msra.mxu1 %v6769_v50 }
 0x9bc   : > { %18904 = vmatprep.subr.mxu1 %v21524_v49 }
 0x9bf   : > { %18872 = vmatmul.mubr.f32.vlgmr.msra.gmra.mrb[12].mxu0 %v21545_v0 }
 0x9c0   : > { %18875 = vmatpush3.msra.mxu0 %v21524_v49  ;;  %18876 = vmatprep.mubr.f32.mxu0 %v6745_v14 }
 0x9c1   : > { %18879 = vmatprep.subr.msk.mxu0 %vm6665_vm10, %v20708_v2 }
 0x9c2   : > { %18902 = vmatmul.mubr.f32.vlgmr.msra.gmra.mrb[12].mxu1 %v7262_v13 }
 0x9c3   : > { %18906 = vmatprep.mubr.f32.mxu1 %v7253_v19  ;;  %18905 = vmatpush3.msra.mxu1 %v21524_v49 }
 0x9c4   : > { %18909 = vmatprep.subr.msk.mxu1 %vm6665_vm10, %v20708_v2 }
 0x9c7   : > { %18877 = vmatmul.mubr.f32.vlgmr.msra.gmra.mrb[12].mxu0 %v6755_v10 }
 0x9c8   : > { %18880 = vmatpush3.msk.msra.mxu0 %vm6665_vm10, %v20708_v2  ;;  %18881 = vmatprep.mubr.f32.mxu0 %v6746_v18 }
 0x9c9   : > { %18884 = vmatprep.subr.mxu0 %v21527_v36 }
 0x9ca   : > { %18907 = vmatmul.mubr.f32.vlgmr.msra.gmra.mrb[12].mxu1 %v7263_v17 }
 0x9cb   : > { %18911 = vmatprep.mubr.f32.mxu1 %v7254_v25  ;;  %18910 = vmatpush3.msk.msra.mxu1 %vm6665_vm10, %v20708_v2 }
 0x9cc   : > { %18914 = vmatprep.subr.mxu1 %v21527_v36 }
 0x9cf   : > { %18882 = vmatmul.mubr.f32.vlgmr.msra.gmra.mrb[12].mxu0 %v6756_v16 }
 0x9d0   : > { %18885 = vmatpush3.msra.mxu0 %v21527_v36  ;;  %18886 = vmatprep.mubr.f32.mxu0 %v6744_v7 }
 0x9d1   : > { %18889 = vmatprep.subr.msk.mxu0 %vm6665_vm10, %v20708_v2 }
 0x9d2   : > { %18912 = vmatmul.mubr.f32.vlgmr.msra.gmra.mrb[12].mxu1 %v7264_v23  ;;  %v21701_v23 = vpack.c.bf16 %v20708_v2, %v20709_v3 }
 0x9d3   : > { %18916 = vmatprep.mubr.f32.mxu1 %v7252_v15  ;;  %18915 = vmatpush3.msra.mxu1 %v21527_v36 }
 0x9d4   : > { %18919 = vmatprep.subr.msk.mxu1 %vm6665_vm10, %v20708_v2 }
 0x9d7   : > { %18887 = vmatmul.mubr.f32.vlgmr.msra.gmra.mrb[12].mxu0 %v21545_v0 }
 0x9d8   : > { %18890 = vmatpush3.msk.msra.mxu0 %vm6665_vm10, %v20708_v2  ;;  %18891 = vmatprep.mubr.f32.mxu0 %v6744_v7 }
 0x9d9   : > { %18924 = vmatprep.subr.msk.mxu0 %vm7731_vm13, %v20708_v2 }
 0x9da   : > { %18917 = vmatmul.mubr.f32.vlgmr.msra.gmra.mrb[12].mxu1 %v7262_v13 }
 0x9db   : > { %18921 = vmatprep.mubr.f32.mxu1 %v7252_v15  ;;  %18920 = vmatpush3.msk.msra.mxu1 %vm6665_vm10, %v20708_v2  ;;  %vm10930_vm10 = vcmp.eq.s32.totalorder %v20936_v9, 10 }
 0x9dc   : > { %18954 = vmatprep.subr.msk.mxu1 %vm7731_vm13, %v20708_v2  ;;  %vm21906_vm11 = vmpackc.low %vm10930_vm10, %vm20711_vm2 }
 0x9df   : > { %18892 = vmatmul.mubr.f32.vlgmr.msra.gmra.mrb[12].mxu0 %v21545_v0 }
 0x9e0   : > { %18925 = vmatpush3.msk.msra.mxu0 %vm7731_vm13, %v20708_v2 }
 0x9e1   : > { %18929 = vmatprep.subr.mxu0 %v7835_v38 }
 0x9e2   : > { %18922 = vmatmul.mubr.f32.vlgmr.msra.gmra.mrb[12].mxu1 %v7262_v13 }
 0x9e3   : > { %18955 = vmatpush3.msk.msra.mxu1 %vm7731_vm13, %v20708_v2 }
 0x9e4   : > { %18959 = vmatprep.subr.mxu1 %v7835_v38 }
 0xab2   : > { %v18893_v30 = vpop.f32.mrb[12].mxu0 }
 0xab3   : > { %v7169_v31 = vpop.f32.mrb[13].mxu0  ;;  %7694 = vperm.xlu1 %20539, %v18893_v30  }
 0xab4   : > { %7689 = vperm.xlu0 %20538, %v7169_v31  }
 0xab5   : > { %v18923_v32 = vpop.f32.mrb[12].mxu1 }
 0xab6   : > { %v7677_v33 = vpop.f32.mrb[13].mxu1 }
 0xab7   : > { %7714 = vperm.xlu1 %20539, %v18923_v32  }
 0xab8   : > { %7709 = vperm.xlu0 %20538, %v7677_v33  }
 0xb32   : > { %v7695_v40 = vpop.permute.xlu1 %7694 }
 0xb33   : > { %v7702_v41 = vadd.f32 %v17738_v39, %v7695_v40  ;;  %v7690_v42 = vpop.permute.xlu0 %7689 }
 0xb34   : > { %v7701_v43 = vadd.f32 %v17738_v39, %v7690_v42 }
 0xb35   : > { %vm7704_vm14 = vcmp.lt.f32.partialorder %v7702_v41, %v21533_v56 }
 0xb36   : > { %v21628_v44 = vsel %vm7704_vm14, %v7702_v41, %v21533_v56  ;;  %vm7703_vm15 = vcmp.lt.f32.partialorder %v7701_v43, %v21543_v48  ;;  %v7715_v45 = vpop.permute.xlu1 %7714 }
 0xb37   : > { %7726 = vst.msk [vmem:[#allocation2 + $0x8] sm:$0xff] %vm262_vm1, %v21628_v44  ;;  %v7741_v49 = vsel %vm262_vm1, %v21628_v44, 0  ;;  %v21638_v36 = vsel %vm7703_vm15, %v7701_v43, %v21543_v48  ;;  %v7722_v46 = vadd.f32 %v17739_v47, %v7715_v45  ;;  %v7710_v50 = vpop.permute.xlu0 %7709 }
 0xb38   : > { %v21640_v51 = vand.u32 4294901760, %v7741_v49  ;;  %7725 = vst.msk [vmem:[#allocation2] sm:$0xff] %vm262_vm1, %v21638_v36  ;;  %v7738_v52 = vsel %vm262_vm1, %v21638_v36, 0  ;;  %v7721_v53 = vadd.f32 %v17739_v47, %v7710_v50 }
 0xb39   : > { %v7810_v54 = vand.u32 4294901760, %v7738_v52  ;;  %v21647_v55 = vsel %vm7704_vm14, %v7722_v46, %v21552_v8  ;;  %vm11996_vm14 = vcmp.eq.s32.totalorder %v20936_v9, 11 }
 0xb3a   : > { %v7821_v56 = vsub.f32 %v7741_v49, %v21640_v51  ;;  %7728 = vst.msk [vmem:[#allocation3 + $0x8] sm:$0xff] %vm262_vm1, %v21647_v55  ;;  %v8249_v59 = vsel %vm262_vm1, %v21647_v55, 0  ;;  %v21657_v61 = vsel %vm7703_vm15, %v7721_v53, %v21562_v12  ;;  %vm22007_vm15 = vmpackc.low %vm11996_vm14, %vm20711_vm2 }
 0xb3b   : > { %v8328_v62 = vand.u32 4294901760, %v8249_v59  ;;  %7727 = vst.msk [vmem:[#allocation3] sm:$0xff] %vm262_vm1, %v21657_v61  ;;  %v8246_v60 = vsel %vm262_vm1, %v21657_v61, 0  ;;  %v7811_v63 = vsub.f32 %v7738_v52, %v7810_v54 }
 0xb3c   : > { %v8318_v0 = vand.u32 4294901760, %v8246_v60  ;;  %v7822_v4 = vand.u32 4294901760, %v7821_v56 }
 0xb3d   : > { %v8329_v5 = vsub.f32 %v8249_v59, %v8328_v62  ;;  %v7812_v7 = vand.u32 4294901760, %v7811_v63 }
 0xb3e   : > { %v8319_v8 = vsub.f32 %v8246_v60, %v8318_v0  ;;  %v7823_v10 = vsub.f32 %v7821_v56, %v7822_v4 }
 0xb3f   : > { %v7813_v11 = vsub.f32 %v7811_v63, %v7812_v7  ;;  %v8330_v13 = vand.u32 4294901760, %v8329_v5  ;;  %v17747_v28 = vld [vmem:[#allocation2 + $0x7] ss:$0 sm:$0xff] }
 0xb40   : > { %v8320_v58 = vand.u32 4294901760, %v8319_v8  ;;  %v7824_v14 = vand.u32 4294901760, %v7823_v10 }
 0xb41   : > { %v7814_v48 = vand.u32 4294901760, %v7813_v11  ;;  %v8331_v12 = vsub.f32 %v8329_v5, %v8330_v13 }
 0xb42   : > { %v8321_v15 = vsub.f32 %v8319_v8, %v8320_v58 }
 0xb43   : > { %18926 = vmatprep.mubr.f32.mxu0 %v7814_v48  ;;  %v8332_v17 = vand.u32 4294901760, %v8331_v12 }
 0xb44   : > { %18927 = vmatmul.mubr.f32.vlgmr.msra.gmra.mrb[14].mxu0 %v7824_v14  ;;  %v8322_v16 = vand.u32 4294901760, %v8321_v15  ;;  %v17758_v14 = vsel %vm9864_vm6, 1.0, %v20709_v3 }
 0xb45   : > { %18930 = vmatpush3.msra.mxu0 %v7835_v38  ;;  %18931 = vmatprep.mubr.f32.mxu0 %v7810_v54  ;;  %v21813_v15 = vsub.f32 %v17758_v14, %v17758_v14 }
 0xb46   : > { %18956 = vmatprep.mubr.f32.mxu1 %v8322_v16  ;;  %18934 = vmatprep.subr.mxu0 %v21619_v37 }
 0xb47   : > { %18957 = vmatmul.mubr.f32.vlgmr.msra.gmra.mrb[14].mxu1 %v8332_v17  ;;  %v9972_v16 = vand.u32 4294901760, %v21813_v15 }
 0xb48   : > { %18961 = vmatprep.mubr.f32.mxu1 %v8318_v0  ;;  %18960 = vmatpush3.msra.mxu1 %v7835_v38 }
 0xb49   : > { %18964 = vmatprep.subr.mxu1 %v21619_v37  ;;  %v9973_v17 = vsub.f32 %v21813_v15, %v9972_v16 }
 0xb4c   : > { %18932 = vmatmul.mubr.f32.vlgmr.msra.gmra.mrb[14].mxu0 %v21640_v51 }
 0xb4d   : > { %18935 = vmatpush3.msra.mxu0 %v21619_v37  ;;  %18936 = vmatprep.mubr.f32.mxu0 %v7811_v63 }
 0xb4e   : > { %18939 = vmatprep.subr.msk.mxu0 %vm7731_vm13, %v20708_v2 }
 0xb4f   : > { %18962 = vmatmul.mubr.f32.vlgmr.msra.gmra.mrb[14].mxu1 %v8328_v62 }
 0xb50   : > { %18966 = vmatprep.mubr.f32.mxu1 %v8319_v8  ;;  %18965 = vmatpush3.msra.mxu1 %v21619_v37  ;;  %v17748_v37 = vld [vmem:[#allocation3 + $0x7] ss:$0 sm:$0xff] }
 0xb51   : > { %18969 = vmatprep.subr.msk.mxu1 %vm7731_vm13, %v20708_v2 }
 0xb54   : > { %18937 = vmatmul.mubr.f32.vlgmr.msra.gmra.mrb[14].mxu0 %v7821_v56 }
 0xb55   : > { %18940 = vmatpush3.msk.msra.mxu0 %vm7731_vm13, %v20708_v2  ;;  %18941 = vmatprep.mubr.f32.mxu0 %v7812_v7 }
 0xb56   : > { %18944 = vmatprep.subr.mxu0 %v21622_v24 }
 0xb57   : > { %18967 = vmatmul.mubr.f32.vlgmr.msra.gmra.mrb[14].mxu1 %v8329_v5  ;;  %v19666_v5 = vpack.c.bf16 %v21709_v57, %v20709_v3 }
 0xb58   : > { %18971 = vmatprep.mubr.f32.mxu1 %v8320_v58  ;;  %18970 = vmatpush3.msk.msra.mxu1 %vm7731_vm13, %v20708_v2 }
 0xb59   : > { %18974 = vmatprep.subr.mxu1 %v21622_v24 }
 0xb5c   : > { %18942 = vmatmul.mubr.f32.vlgmr.msra.gmra.mrb[14].mxu0 %v7822_v4 }
 0xb5d   : > { %18945 = vmatpush3.msra.mxu0 %v21622_v24  ;;  %18946 = vmatprep.mubr.f32.mxu0 %v7810_v54 }
 0xb5e   : > { %18949 = vmatprep.subr.msk.mxu0 %vm7731_vm13, %v20708_v2 }
 0xb5f   : > { %18972 = vmatmul.mubr.f32.vlgmr.msra.gmra.mrb[14].mxu1 %v8330_v13 }
 0xb60   : > { %18976 = vmatprep.mubr.f32.mxu1 %v8318_v0  ;;  %18975 = vmatpush3.msra.mxu1 %v21622_v24 }
 0xb61   : > { %18979 = vmatprep.subr.msk.mxu1 %vm7731_vm13, %v20708_v2 }
 0xb64   : > { %18947 = vmatmul.mubr.f32.vlgmr.msra.gmra.mrb[14].mxu0 %v21640_v51 }
 0xb65   : > { %18950 = vmatpush3.msk.msra.mxu0 %vm7731_vm13, %v20708_v2  ;;  %18951 = vmatprep.mubr.f32.mxu0 %v7810_v54 }
 0xb66   : > { %19658 = vmatprep.subr.msk.bf16.mxu0 %vm21705_vm3, %v21701_v23 }
 0xb67   : > { %18977 = vmatmul.mubr.f32.vlgmr.msra.gmra.mrb[14].mxu1 %v8328_v62 }
 0xb68   : > { %18981 = vmatprep.mubr.f32.mxu1 %v8318_v0  ;;  %18980 = vmatpush3.msk.msra.mxu1 %vm7731_vm13, %v20708_v2  ;;  %v8906_v2 = vand.u32 4294901760, %v21709_v57 }
 0xb69   : > { %19688 = vmatprep.subr.msk.bf16.mxu1 %vm21705_vm3, %v21701_v23 }
 0xb6a   : > { %v8907_v22 = vsub.f32 %v21709_v57, %v8906_v2  ;;  %v19676_v10 = vpack.c.bf16 %v8906_v2, %v20709_v3 }
 0xb6c   : > { %18952 = vmatmul.mubr.f32.vlgmr.msra.gmra.mrb[14].mxu0 %v21640_v51  ;;  %v8908_v26 = vand.u32 4294901760, %v8907_v22 }
 0xb6d   : > { %19661 = vmatpush3.bf16.msk.msra.mxu0 %vm21705_vm3, %v21701_v23 }
 0xb6e   : > { %v19662_v27 = vpack.c.bf16 %v8908_v26, %v20709_v3 }
 0xb6f   : > { %18982 = vmatmul.mubr.f32.vlgmr.msra.gmra.mrb[14].mxu1 %v8328_v62 }
 0xb70   : > { %19691 = vmatpush3.bf16.msk.msra.mxu1 %vm21705_vm3, %v21701_v23  ;;  %19663 = vmatprep.subr.bf16.mxu0 %v19662_v27 }
 0xb71   : > { %19693 = vmatprep.subr.bf16.mxu1 %v19662_v27 }
 0xc3f   : > { %v18953_v18 = vpop.f32.mrb[14].mxu0 }
 0xc40   : > { %v8235_v19 = vpop.f32.mrb[15].mxu0  ;;  %8760 = vperm.xlu1 %20539, %v18953_v18   ;;  %v9974_v18 = vand.u32 4294901760, %v9973_v17 }
 0xc41   : > { %8755 = vperm.xlu0 %20538, %v8235_v19  }
 0xc42   : > { %v18983_v20 = vpop.f32.mrb[14].mxu1  ;;  %v19722_v19 = vpack.c.bf16 %v9974_v18, %v20709_v3 }
 0xc43   : > { %v8743_v21 = vpop.f32.mrb[15].mxu1 }
 0xc44   : > { %8780 = vperm.xlu1 %20539, %v18983_v20  }
 0xc45   : > { %8775 = vperm.xlu0 %20538, %v8743_v21  }
 0xcbf   : > { %v8761_v29 = vpop.permute.xlu1 %8760 }
 0xcc0   : > { %v8768_v30 = vadd.f32 %v17747_v28, %v8761_v29  ;;  %v8756_v31 = vpop.permute.xlu0 %8755 }
 0xcc1   : > { %v8767_v32 = vadd.f32 %v17747_v28, %v8756_v31 }
 0xcc2   : > { %vm8770_vm4 = vcmp.lt.f32.partialorder %v8768_v30, %v21628_v44 }
 0xcc3   : > { %v21730_v33 = vsel %vm8770_vm4, %v8768_v30, %v21628_v44  ;;  %vm8769_vm5 = vcmp.lt.f32.partialorder %v8767_v32, %v21638_v36  ;;  %v8781_v35 = vpop.permute.xlu1 %8780 }
 0xcc4   : > { %8792 = vst.msk [vmem:[#allocation2 + $0x8] sm:$0xff] %vm262_vm1, %v21730_v33  ;;  %v8807_v24 = vsel %vm262_vm1, %v21730_v33, 0  ;;  %v21740_v34 = vsel %vm8769_vm5, %v8767_v32, %v21638_v36  ;;  %v8788_v38 = vadd.f32 %v17748_v37, %v8781_v35  ;;  %v8776_v39 = vpop.permute.xlu0 %8775 }
 0xcc5   : > { %v21742_v40 = vand.u32 4294901760, %v8807_v24  ;;  %8791 = vst.msk [vmem:[#allocation2] sm:$0xff] %vm262_vm1, %v21740_v34  ;;  %v8804_v41 = vsel %vm262_vm1, %v21740_v34, 0  ;;  %v8787_v42 = vadd.f32 %v17748_v37, %v8776_v39 }
 0xcc6   : > { %v21748_v43 = vand.u32 4294901760, %v8804_v41  ;;  %v21751_v44 = vsel %vm8770_vm4, %v8788_v38, %v21647_v55  ;;  %vm13062_vm4 = vcmp.eq.s32.totalorder %v20936_v9, 12 }
 0xcc7   : > { %v8887_v45 = vsub.f32 %v8807_v24, %v21742_v40  ;;  %8794 = vst.msk [vmem:[#allocation3 + $0x8] sm:$0xff] %vm262_vm1, %v21751_v44  ;;  %v9315_v47 = vsel %vm262_vm1, %v21751_v44, 0  ;;  %v21761_v49 = vsel %vm8769_vm5, %v8787_v42, %v21657_v61  ;;  %vm22108_vm5 = vmpackc.low %vm13062_vm4, %vm20711_vm2 }
 0xcc8   : > { %v9394_v46 = vand.u32 4294901760, %v9315_v47  ;;  %8793 = vst.msk [vmem:[#allocation3] sm:$0xff] %vm262_vm1, %v21761_v49  ;;  %v9312_v50 = vsel %vm262_vm1, %v21761_v49, 0  ;;  %v8877_v51 = vsub.f32 %v8804_v41, %v21748_v43 }
 0xcc9   : > { %v9384_v52 = vand.u32 4294901760, %v9312_v50  ;;  %v8888_v53 = vand.u32 4294901760, %v8887_v45 }
 0xcca   : > { %v9395_v54 = vsub.f32 %v9315_v47, %v9394_v46  ;;  %v8878_v55 = vand.u32 4294901760, %v8877_v51 }
 0xccb   : > { %v9385_v56 = vsub.f32 %v9312_v50, %v9384_v52  ;;  %v8889_v59 = vsub.f32 %v8887_v45, %v8888_v53  ;;  %v17756_v20 = vld [vmem:[#allocation2 + $0x8] ss:$0 sm:$0xff] }
 0xccc   : > { %v8879_v62 = vsub.f32 %v8877_v51, %v8878_v55  ;;  %v9396_v60 = vand.u32 4294901760, %v9395_v54 }
 0xccd   : > { %v9386_v36 = vand.u32 4294901760, %v9385_v56  ;;  %v8890_v0 = vand.u32 4294901760, %v8889_v59 }
 0xcce   : > { %v8880_v61 = vand.u32 4294901760, %v8879_v62  ;;  %v9397_v63 = vsub.f32 %v9395_v54, %v9396_v60  ;;  %v17757_v22 = vld [vmem:[#allocation3 + $0x8] ss:$0 sm:$0xff] }
 0xccf   : > { %v9387_v4 = vsub.f32 %v9385_v56, %v9386_v36 }
 0xcd0   : > { %18988 = vmatprep.mubr.f32.mxu0 %v8880_v61  ;;  %v9398_v8 = vand.u32 4294901760, %v9397_v63 }
 0xcd1   : > { %18989 = vmatmul.mubr.f32.vlgmr.msra.gmra.mrb[16].mxu0 %v8890_v0  ;;  %v9388_v7 = vand.u32 4294901760, %v9387_v4 }
 0xcd2   : > { %19665 = vmatpush3.bf16.msra.mxu0 %v19662_v27  ;;  %18995 = vmatprep.mubr.f32.mxu0 %v21748_v43 }
 0xcd3   : > { %19030 = vmatprep.mubr.f32.mxu1 %v9388_v7  ;;  %19667 = vmatprep.subr.bf16.mxu0 %v19666_v5 }
 0xcd4   : > { %19031 = vmatmul.mubr.f32.vlgmr.msra.gmra.mrb[16].mxu1 %v9398_v8 }
 0xcd5   : > { %19037 = vmatprep.mubr.f32.mxu1 %v9384_v52  ;;  %19695 = vmatpush3.bf16.msra.mxu1 %v19662_v27 }
 0xcd6   : > { %19697 = vmatprep.subr.bf16.mxu1 %v19666_v5 }
 0xcd9   : > { %18996 = vmatmul.mubr.f32.vlgmr.msra.gmra.mrb[16].mxu0 %v21742_v40 }
 0xcda   : > { %19669 = vmatpush3.bf16.msra.mxu0 %v19666_v5  ;;  %19002 = vmatprep.mubr.f32.mxu0 %v8877_v51 }
 0xcdb   : > { %19672 = vmatprep.subr.msk.bf16.mxu0 %vm21705_vm3, %v21701_v23 }
 0xcdc   : > { %19038 = vmatmul.mubr.f32.vlgmr.msra.gmra.mrb[16].mxu1 %v9394_v46 }
 0xcdd   : > { %19044 = vmatprep.mubr.f32.mxu1 %v9385_v56  ;;  %19699 = vmatpush3.bf16.msra.mxu1 %v19666_v5  ;;  %v19726_v56 = vpack.c.bf16 %v21813_v15, %v20709_v3  ;;  %v17767_v5 = vsel %vm10930_vm10, 1.0, %v20709_v3 }
 0xcde   : > { %19702 = vmatprep.subr.msk.bf16.mxu1 %vm21705_vm3, %v21701_v23  ;;  %v21914_v7 = vsub.f32 %v17767_v5, %v17767_v5 }
 0xce0   : > { %v11038_v8 = vand.u32 4294901760, %v21914_v7 }
 0xce1   : > { %19003 = vmatmul.mubr.f32.vlgmr.msra.gmra.mrb[16].mxu0 %v8887_v45 }
 0xce2   : > { %19675 = vmatpush3.bf16.msk.msra.mxu0 %vm21705_vm3, %v21701_v23  ;;  %19009 = vmatprep.mubr.f32.mxu0 %v8878_v55 }
 0xce3   : > { %19677 = vmatprep.subr.bf16.mxu0 %v19676_v10 }
 0xce4   : > { %19045 = vmatmul.mubr.f32.vlgmr.msra.gmra.mrb[16].mxu1 %v9395_v54 }
 0xce5   : > { %19051 = vmatprep.mubr.f32.mxu1 %v9386_v36  ;;  %19705 = vmatpush3.bf16.msk.msra.mxu1 %vm21705_vm3, %v21701_v23 }
 0xce6   : > { %19707 = vmatprep.subr.bf16.mxu1 %v19676_v10 }
 0xce9   : > { %19010 = vmatmul.mubr.f32.vlgmr.msra.gmra.mrb[16].mxu0 %v8888_v53 }
 0xcea   : > { %19679 = vmatpush3.bf16.msra.mxu0 %v19676_v10  ;;  %19016 = vmatprep.mubr.f32.mxu0 %v21748_v43 }
 0xceb   : > { %19682 = vmatprep.subr.msk.bf16.mxu0 %vm21705_vm3, %v21701_v23 }
 0xcec   : > { %19052 = vmatmul.mubr.f32.vlgmr.msra.gmra.mrb[16].mxu1 %v9396_v60  ;;  %v19736_v60 = vpack.c.bf16 %v9972_v16, %v20709_v3 }
 0xced   : > { %19058 = vmatprep.mubr.f32.mxu1 %v9384_v52  ;;  %19709 = vmatpush3.bf16.msra.mxu1 %v19676_v10  ;;  %v11039_v10 = vsub.f32 %v21914_v7, %v11038_v8 }
 0xcee   : > { %19712 = vmatprep.subr.msk.bf16.mxu1 %vm21705_vm3, %v21701_v23 }
 0xcf1   : > { %19017 = vmatmul.mubr.f32.vlgmr.msra.gmra.mrb[16].mxu0 %v21742_v40 }
 0xcf2   : > { %19685 = vmatpush3.bf16.msk.msra.mxu0 %vm21705_vm3, %v21701_v23  ;;  %19023 = vmatprep.mubr.f32.mxu0 %v21748_v43 }
 0xcf3   : > { %19718 = vmatprep.subr.msk.bf16.mxu0 %vm21805_vm7, %v21701_v23 }
 0xcf4   : > { %19059 = vmatmul.mubr.f32.vlgmr.msra.gmra.mrb[16].mxu1 %v9394_v46 }
 0xcf5   : > { %19065 = vmatprep.mubr.f32.mxu1 %v9384_v52  ;;  %19715 = vmatpush3.bf16.msk.msra.mxu1 %vm21705_vm3, %v21701_v23 }
 0xcf6   : > { %19748 = vmatprep.subr.msk.bf16.mxu1 %vm21805_vm7, %v21701_v23 }
 0xcf9   : > { %19024 = vmatmul.mubr.f32.vlgmr.msra.gmra.mrb[16].mxu0 %v21742_v40 }
 0xcfa   : > { %19721 = vmatpush3.bf16.msk.msra.mxu0 %vm21805_vm7, %v21701_v23 }
 0xcfb   : > { %19723 = vmatprep.subr.bf16.mxu0 %v19722_v19 }
 0xcfc   : > { %19066 = vmatmul.mubr.f32.vlgmr.msra.gmra.mrb[16].mxu1 %v9394_v46 }
 0xcfd   : > { %19751 = vmatpush3.bf16.msk.msra.mxu1 %vm21805_vm7, %v21701_v23 }
 0xcfe   : > { %19753 = vmatprep.subr.bf16.mxu1 %v19722_v19 }
 0xdcc   : > { %v19025_v11 = vpop.f32.mrb[16].mxu0 }
 0xdcd   : > { %v9301_v13 = vpop.f32.mrb[17].mxu0  ;;  %9826 = vperm.xlu1 %20539, %v19025_v11   ;;  %v11040_v11 = vand.u32 4294901760, %v11039_v10 }
 0xdce   : > { %9821 = vperm.xlu0 %20538, %v9301_v13  }
 0xdcf   : > { %v19067_v58 = vpop.f32.mrb[16].mxu1  ;;  %v19782_v13 = vpack.c.bf16 %v11040_v11, %v20709_v3 }
 0xdd0   : > { %v9809_v48 = vpop.f32.mrb[17].mxu1 }
 0xdd1   : > { %9846 = vperm.xlu1 %20539, %v19067_v58  }
 0xdd2   : > { %9841 = vperm.xlu0 %20538, %v9809_v48  }
 0xe4c   : > { %v9827_v21 = vpop.permute.xlu1 %9826 }
 0xe4d   : > { %v9834_v1 = vadd.f32 %v17756_v20, %v9827_v21  ;;  %v9822_v25 = vpop.permute.xlu0 %9821 }
 0xe4e   : > { %v9833_v57 = vadd.f32 %v17756_v20, %v9822_v25 }
 0xe4f   : > { %vm9836_vm8 = vcmp.lt.f32.partialorder %v9834_v1, %v21730_v33 }
 0xe50   : > { %v21831_v2 = vsel %vm9836_vm8, %v9834_v1, %v21730_v33  ;;  %vm9835_vm9 = vcmp.lt.f32.partialorder %v9833_v57, %v21740_v34  ;;  %v9847_v26 = vpop.permute.xlu1 %9846 }
 0xe51   : > { %9858 = vst.msk [vmem:[#allocation2 + $0x8] sm:$0xff] %vm262_vm1, %v21831_v2  ;;  %v9873_v27 = vsel %vm262_vm1, %v21831_v2, 0  ;;  %v21841_v28 = vsel %vm9835_vm9, %v9833_v57, %v21740_v34  ;;  %v9854_v29 = vadd.f32 %v17757_v22, %v9847_v26  ;;  %v9842_v30 = vpop.permute.xlu0 %9841 }
 0xe52   : > { %v21843_v31 = vand.u32 4294901760, %v9873_v27  ;;  %9857 = vst.msk [vmem:[#allocation2] sm:$0xff] %vm262_vm1, %v21841_v28  ;;  %v9870_v32 = vsel %vm262_vm1, %v21841_v28, 0  ;;  %v9853_v33 = vadd.f32 %v17757_v22, %v9842_v30 }
 0xe53   : > { %v21849_v35 = vand.u32 4294901760, %v9870_v32  ;;  %v21852_v37 = vsel %vm9836_vm8, %v9854_v29, %v21751_v44  ;;  %vm14128_vm8 = vcmp.eq.s32.totalorder %v20936_v9, 13 }
 0xe54   : > { %v9953_v24 = vsub.f32 %v9873_v27, %v21843_v31  ;;  %9860 = vst.msk [vmem:[#allocation3 + $0x8] sm:$0xff] %vm262_vm1, %v21852_v37  ;;  %v10381_v38 = vsel %vm262_vm1, %v21852_v37, 0  ;;  %v21862_v39 = vsel %vm9835_vm9, %v9853_v33, %v21761_v49  ;;  %vm22209_vm9 = vmpackc.low %vm14128_vm8, %vm20711_vm2 }
 0xe55   : > { %v10460_v40 = vand.u32 4294901760, %v10381_v38  ;;  %9859 = vst.msk [vmem:[#allocation3] sm:$0xff] %vm262_vm1, %v21862_v39  ;;  %v10378_v41 = vsel %vm262_vm1, %v21862_v39, 0  ;;  %v9943_v42 = vsub.f32 %v9870_v32, %v21849_v35 }
 0xe56   : > { %v10450_v43 = vand.u32 4294901760, %v10378_v41  ;;  %v9954_v44 = vand.u32 4294901760, %v9953_v24 }
 0xe57   : > { %v10461_v45 = vsub.f32 %v10381_v38, %v10460_v40  ;;  %v9944_v47 = vand.u32 4294901760, %v9943_v42 }
 0xe58   : > { %v10451_v46 = vsub.f32 %v10378_v41, %v10450_v43  ;;  %v9955_v50 = vsub.f32 %v9953_v24, %v9954_v44  ;;  %v17765_v58 = vld [vmem:[#allocation2 + $0x9] ss:$0 sm:$0xff] }
 0xe59   : > { %v9945_v51 = vsub.f32 %v9943_v42, %v9944_v47  ;;  %v10462_v52 = vand.u32 4294901760, %v10461_v45 }
 0xe5a   : > { %v10452_v34 = vand.u32 4294901760, %v10451_v46  ;;  %v9956_v54 = vand.u32 4294901760, %v9955_v50 }
 0xe5b   : > { %v9946_v49 = vand.u32 4294901760, %v9945_v51  ;;  %v10463_v53 = vsub.f32 %v10461_v45, %v10462_v52  ;;  %v17766_v17 = vld [vmem:[#allocation3 + $0x9] ss:$0 sm:$0xff] }
 0xe5c   : > { %v10453_v55 = vsub.f32 %v10451_v46, %v10452_v34 }
 0xe5d   : > { %19072 = vmatprep.mubr.f32.mxu0 %v9946_v49  ;;  %v10464_v62 = vand.u32 4294901760, %v10463_v53 }
 0xe5e   : > { %19073 = vmatmul.mubr.f32.vlgmr.msra.gmra.mrb[18].mxu0 %v9956_v54  ;;  %v10454_v59 = vand.u32 4294901760, %v10453_v55 }
 0xe5f   : > { %19725 = vmatpush3.bf16.msra.mxu0 %v19722_v19  ;;  %19079 = vmatprep.mubr.f32.mxu0 %v21849_v35 }
 0xe60   : > { %19114 = vmatprep.mubr.f32.mxu1 %v10454_v59  ;;  %19727 = vmatprep.subr.bf16.mxu0 %v19726_v56 }
 0xe61   : > { %19115 = vmatmul.mubr.f32.vlgmr.msra.gmra.mrb[18].mxu1 %v10464_v62 }
 0xe62   : > { %19121 = vmatprep.mubr.f32.mxu1 %v10450_v43  ;;  %19755 = vmatpush3.bf16.msra.mxu1 %v19722_v19 }
 0xe63   : > { %19757 = vmatprep.subr.bf16.mxu1 %v19726_v56 }
 0xe66   : > { %19080 = vmatmul.mubr.f32.vlgmr.msra.gmra.mrb[18].mxu0 %v21843_v31 }
 0xe67   : > { %19729 = vmatpush3.bf16.msra.mxu0 %v19726_v56  ;;  %19086 = vmatprep.mubr.f32.mxu0 %v9943_v42 }
 0xe68   : > { %19732 = vmatprep.subr.msk.bf16.mxu0 %vm21805_vm7, %v21701_v23 }
 0xe69   : > { %19122 = vmatmul.mubr.f32.vlgmr.msra.gmra.mrb[18].mxu1 %v10460_v40 }
 0xe6a   : > { %19128 = vmatprep.mubr.f32.mxu1 %v10451_v46  ;;  %19759 = vmatpush3.bf16.msra.mxu1 %v19726_v56  ;;  %v19786_v46 = vpack.c.bf16 %v21914_v7, %v20709_v3  ;;  %v17776_v56 = vsel %vm11996_vm14, 1.0, %v20709_v3 }
 0xe6b   : > { %19762 = vmatprep.subr.msk.bf16.mxu1 %vm21805_vm7, %v21701_v23  ;;  %v22015_v59 = vsub.f32 %v17776_v56, %v17776_v56 }
 0xe6d   : > { %v12104_v62 = vand.u32 4294901760, %v22015_v59 }
 0xe6e   : > { %19087 = vmatmul.mubr.f32.vlgmr.msra.gmra.mrb[18].mxu0 %v9953_v24 }
 0xe6f   : > { %19735 = vmatpush3.bf16.msk.msra.mxu0 %vm21805_vm7, %v21701_v23  ;;  %19093 = vmatprep.mubr.f32.mxu0 %v9944_v47 }
 0xe70   : > { %19737 = vmatprep.subr.bf16.mxu0 %v19736_v60 }
 0xe71   : > { %19129 = vmatmul.mubr.f32.vlgmr.msra.gmra.mrb[18].mxu1 %v10461_v45 }
 0xe72   : > { %19135 = vmatprep.mubr.f32.mxu1 %v10452_v34  ;;  %19765 = vmatpush3.bf16.msk.msra.mxu1 %vm21805_vm7, %v21701_v23 }
 0xe73   : > { %19767 = vmatprep.subr.bf16.mxu1 %v19736_v60 }
 0xe76   : > { %19094 = vmatmul.mubr.f32.vlgmr.msra.gmra.mrb[18].mxu0 %v9954_v44 }
 0xe77   : > { %19739 = vmatpush3.bf16.msra.mxu0 %v19736_v60  ;;  %19100 = vmatprep.mubr.f32.mxu0 %v21849_v35 }
 0xe78   : > { %19742 = vmatprep.subr.msk.bf16.mxu0 %vm21805_vm7, %v21701_v23 }
 0xe79   : > { %19136 = vmatmul.mubr.f32.vlgmr.msra.gmra.mrb[18].mxu1 %v10462_v52  ;;  %v19796_v52 = vpack.c.bf16 %v11038_v8, %v20709_v3 }
 0xe7a   : > { %19142 = vmatprep.mubr.f32.mxu1 %v10450_v43  ;;  %19769 = vmatpush3.bf16.msra.mxu1 %v19736_v60  ;;  %v12105_v60 = vsub.f32 %v22015_v59, %v12104_v62 }
 0xe7b   : > { %19772 = vmatprep.subr.msk.bf16.mxu1 %vm21805_vm7, %v21701_v23 }
 0xe7e   : > { %19101 = vmatmul.mubr.f32.vlgmr.msra.gmra.mrb[18].mxu0 %v21843_v31 }
 0xe7f   : > { %19745 = vmatpush3.bf16.msk.msra.mxu0 %vm21805_vm7, %v21701_v23  ;;  %19107 = vmatprep.mubr.f32.mxu0 %v21849_v35 }
 0xe80   : > { %19778 = vmatprep.subr.msk.bf16.mxu0 %vm21906_vm11, %v21701_v23 }
 0xe81   : > { %19143 = vmatmul.mubr.f32.vlgmr.msra.gmra.mrb[18].mxu1 %v10460_v40 }
 0xe82   : > { %19149 = vmatprep.mubr.f32.mxu1 %v10450_v43  ;;  %19775 = vmatpush3.bf16.msk.msra.mxu1 %vm21805_vm7, %v21701_v23 }
 0xe83   : > { %19808 = vmatprep.subr.msk.bf16.mxu1 %vm21906_vm11, %v21701_v23 }
 0xe86   : > { %19108 = vmatmul.mubr.f32.vlgmr.msra.gmra.mrb[18].mxu0 %v21843_v31 }
 0xe87   : > { %19781 = vmatpush3.bf16.msk.msra.mxu0 %vm21906_vm11, %v21701_v23 }
 0xe88   : > { %19783 = vmatprep.subr.bf16.mxu0 %v19782_v13 }
 0xe89   : > { %19150 = vmatmul.mubr.f32.vlgmr.msra.gmra.mrb[18].mxu1 %v10460_v40 }
 0xe8a   : > { %19811 = vmatpush3.bf16.msk.msra.mxu1 %vm21906_vm11, %v21701_v23 }
 0xe8b   : > { %19813 = vmatprep.subr.bf16.mxu1 %v19782_v13 }
 0xf59   : > { %v19109_v36 = vpop.f32.mrb[18].mxu0 }
 0xf5a   : > { %v10367_v61 = vpop.f32.mrb[19].mxu0  ;;  %10892 = vperm.xlu1 %20539, %v19109_v36   ;;  %v12106_v36 = vand.u32 4294901760, %v12105_v60 }
 0xf5b   : > { %10887 = vperm.xlu0 %20538, %v10367_v61  }
 0xf5c   : > { %v19151_v63 = vpop.f32.mrb[18].mxu1  ;;  %v19842_v61 = vpack.c.bf16 %v12106_v36, %v20709_v3 }
 0xf5d   : > { %v10875_v0 = vpop.f32.mrb[19].mxu1 }
 0xf5e   : > { %10912 = vperm.xlu1 %20539, %v19151_v63  }
 0xf5f   : > { %10907 = vperm.xlu0 %20538, %v10875_v0  }
 0xfd9   : > { %v10893_v48 = vpop.permute.xlu1 %10892 }
 0xfda   : > { %v10900_v12 = vadd.f32 %v17765_v58, %v10893_v48  ;;  %v10888_v14 = vpop.permute.xlu0 %10887 }
 0xfdb   : > { %v10899_v15 = vadd.f32 %v17765_v58, %v10888_v14 }
 0xfdc   : > { %vm10902_vm12 = vcmp.lt.f32.partialorder %v10900_v12, %v21831_v2 }
 0xfdd   : > { %v21932_v16 = vsel %vm10902_vm12, %v10900_v12, %v21831_v2  ;;  %vm10901_vm13 = vcmp.lt.f32.partialorder %v10899_v15, %v21841_v28  ;;  %v10913_v18 = vpop.permute.xlu1 %10912 }
 0xfde   : > { %10924 = vst.msk [vmem:[#allocation2 + $0x8] sm:$0xff] %vm262_vm1, %v21932_v16  ;;  %v10939_v19 = vsel %vm262_vm1, %v21932_v16, 0  ;;  %v21942_v20 = vsel %vm10901_vm13, %v10899_v15, %v21841_v28  ;;  %v10920_v21 = vadd.f32 %v17766_v17, %v10913_v18  ;;  %v10908_v1 = vpop.permute.xlu0 %10907 }
 0xfdf   : > { %v21944_v25 = vand.u32 4294901760, %v10939_v19  ;;  %10923 = vst.msk [vmem:[#allocation2] sm:$0xff] %vm262_vm1, %v21942_v20  ;;  %v10936_v57 = vsel %vm262_vm1, %v21942_v20, 0  ;;  %v10919_v2 = vadd.f32 %v17766_v17, %v10908_v1 }
 0xfe0   : > { %v21950_v22 = vand.u32 4294901760, %v10936_v57  ;;  %v21953_v26 = vsel %vm10902_vm12, %v10920_v21, %v21852_v37  ;;  %vm15194_vm12 = vcmp.eq.s32.totalorder %v20936_v9, 14 }
 0xfe1   : > { %v11019_v27 = vsub.f32 %v10939_v19, %v21944_v25  ;;  %10926 = vst.msk [vmem:[#allocation3 + $0x8] sm:$0xff] %vm262_vm1, %v21953_v26  ;;  %v11447_v29 = vsel %vm262_vm1, %v21953_v26, 0  ;;  %v21963_v30 = vsel %vm10901_vm13, %v10919_v2, %v21862_v39  ;;  %vm22310_vm13 = vmpackc.low %vm15194_vm12, %vm20711_vm2 }
 0xfe2   : > { %v11526_v31 = vand.u32 4294901760, %v11447_v29  ;;  %10925 = vst.msk [vmem:[#allocation3] sm:$0xff] %vm262_vm1, %v21963_v30  ;;  %v11444_v32 = vsel %vm262_vm1, %v21963_v30, 0  ;;  %v11009_v33 = vsub.f32 %v10936_v57, %v21950_v22 }
 0xfe3   : > { %v11516_v35 = vand.u32 4294901760, %v11444_v32  ;;  %v11020_v37 = vand.u32 4294901760, %v11019_v27 }
 0xfe4   : > { %v11527_v24 = vsub.f32 %v11447_v29, %v11526_v31  ;;  %v11010_v38 = vand.u32 4294901760, %v11009_v33 }
 0xfe5   : > { %v11517_v40 = vsub.f32 %v11444_v32, %v11516_v35  ;;  %v11021_v41 = vsub.f32 %v11019_v27, %v11020_v37  ;;  %v17774_v63 = vld [vmem:[#allocation2 + $0xa] ss:$0 sm:$0xff] }
 0xfe6   : > { %v11011_v42 = vsub.f32 %v11009_v33, %v11010_v38  ;;  %v11528_v43 = vand.u32 4294901760, %v11527_v24 }
 0xfe7   : > { %v11518_v28 = vand.u32 4294901760, %v11517_v40  ;;  %v11022_v45 = vand.u32 4294901760, %v11021_v41 }
 0xfe8   : > { %v11012_v39 = vand.u32 4294901760, %v11011_v42  ;;  %v11529_v44 = vsub.f32 %v11527_v24, %v11528_v43  ;;  %v17775_v10 = vld [vmem:[#allocation3 + $0xa] ss:$0 sm:$0xff] }
 0xfe9   : > { %v11519_v47 = vsub.f32 %v11517_v40, %v11518_v28 }
 0xfea   : > { %19156 = vmatprep.mubr.f32.mxu0 %v11012_v39  ;;  %v11530_v51 = vand.u32 4294901760, %v11529_v44 }
 0xfeb   : > { %19157 = vmatmul.mubr.f32.vlgmr.msra.gmra.mrb[20].mxu0 %v11022_v45  ;;  %v11520_v50 = vand.u32 4294901760, %v11519_v47 }
 0xfec   : > { %19785 = vmatpush3.bf16.msra.mxu0 %v19782_v13  ;;  %19163 = vmatprep.mubr.f32.mxu0 %v21950_v22 }
 0xfed   : > { %19198 = vmatprep.mubr.f32.mxu1 %v11520_v50  ;;  %19787 = vmatprep.subr.bf16.mxu0 %v19786_v46 }
 0xfee   : > { %19199 = vmatmul.mubr.f32.vlgmr.msra.gmra.mrb[20].mxu1 %v11530_v51 }
 0xfef   : > { %19205 = vmatprep.mubr.f32.mxu1 %v11516_v35  ;;  %19815 = vmatpush3.bf16.msra.mxu1 %v19782_v13 }
 0xff0   : > { %19817 = vmatprep.subr.bf16.mxu1 %v19786_v46 }
 0xff3   : > { %19164 = vmatmul.mubr.f32.vlgmr.msra.gmra.mrb[20].mxu0 %v21944_v25 }
 0xff4   : > { %19789 = vmatpush3.bf16.msra.mxu0 %v19786_v46  ;;  %19170 = vmatprep.mubr.f32.mxu0 %v11009_v33 }
 0xff5   : > { %19792 = vmatprep.subr.msk.bf16.mxu0 %vm21906_vm11, %v21701_v23 }
 0xff6   : > { %19206 = vmatmul.mubr.f32.vlgmr.msra.gmra.mrb[20].mxu1 %v11526_v31 }
 0xff7   : > { %19212 = vmatprep.mubr.f32.mxu1 %v11517_v40  ;;  %19819 = vmatpush3.bf16.msra.mxu1 %v19786_v46  ;;  %v19846_v40 = vpack.c.bf16 %v22015_v59, %v20709_v3  ;;  %v17785_v46 = vsel %vm13062_vm4, 1.0, %v20709_v3 }
 0xff8   : > { %19822 = vmatprep.subr.msk.bf16.mxu1 %vm21906_vm11, %v21701_v23  ;;  %v22116_v50 = vsub.f32 %v17785_v46, %v17785_v46 }
 0xffa   : > { %v13170_v51 = vand.u32 4294901760, %v22116_v50 }
 0xffb   : > { %19171 = vmatmul.mubr.f32.vlgmr.msra.gmra.mrb[20].mxu0 %v11019_v27 }
 0xffc   : > { %19795 = vmatpush3.bf16.msk.msra.mxu0 %vm21906_vm11, %v21701_v23  ;;  %19177 = vmatprep.mubr.f32.mxu0 %v11010_v38 }
 0xffd   : > { %19797 = vmatprep.subr.bf16.mxu0 %v19796_v52 }
 0xffe   : > { %19213 = vmatmul.mubr.f32.vlgmr.msra.gmra.mrb[20].mxu1 %v11527_v24 }
 0xfff   : > { %19219 = vmatprep.mubr.f32.mxu1 %v11518_v28  ;;  %19825 = vmatpush3.bf16.msk.msra.mxu1 %vm21906_vm11, %v21701_v23 }
0x1000   : > { %19827 = vmatprep.subr.bf16.mxu1 %v19796_v52 }
0x1003   : > { %19178 = vmatmul.mubr.f32.vlgmr.msra.gmra.mrb[20].mxu0 %v11020_v37 }
0x1004   : > { %19799 = vmatpush3.bf16.msra.mxu0 %v19796_v52  ;;  %19184 = vmatprep.mubr.f32.mxu0 %v21950_v22 }
0x1005   : > { %19802 = vmatprep.subr.msk.bf16.mxu0 %vm21906_vm11, %v21701_v23 }
0x1006   : > { %19220 = vmatmul.mubr.f32.vlgmr.msra.gmra.mrb[20].mxu1 %v11528_v43  ;;  %v19856_v43 = vpack.c.bf16 %v12104_v62, %v20709_v3 }
0x1007   : > { %19226 = vmatprep.mubr.f32.mxu1 %v11516_v35  ;;  %19829 = vmatpush3.bf16.msra.mxu1 %v19796_v52  ;;  %v13171_v52 = vsub.f32 %v22116_v50, %v13170_v51 }
0x1008   : > { %19832 = vmatprep.subr.msk.bf16.mxu1 %vm21906_vm11, %v21701_v23 }
0x100b   : > { %19185 = vmatmul.mubr.f32.vlgmr.msra.gmra.mrb[20].mxu0 %v21944_v25 }
0x100c   : > { %19805 = vmatpush3.bf16.msk.msra.mxu0 %vm21906_vm11, %v21701_v23  ;;  %19191 = vmatprep.mubr.f32.mxu0 %v21950_v22 }
0x100d   : > { %19838 = vmatprep.subr.msk.bf16.mxu0 %vm22007_vm15, %v21701_v23 }
0x100e   : > { %19227 = vmatmul.mubr.f32.vlgmr.msra.gmra.mrb[20].mxu1 %v11526_v31 }
0x100f   : > { %19233 = vmatprep.mubr.f32.mxu1 %v11516_v35  ;;  %19835 = vmatpush3.bf16.msk.msra.mxu1 %vm21906_vm11, %v21701_v23 }
0x1010   : > { %19868 = vmatprep.subr.msk.bf16.mxu1 %vm22007_vm15, %v21701_v23 }
0x1013   : > { %19192 = vmatmul.mubr.f32.vlgmr.msra.gmra.mrb[20].mxu0 %v21944_v25 }
0x1014   : > { %19841 = vmatpush3.bf16.msk.msra.mxu0 %vm22007_vm15, %v21701_v23 }
0x1015   : > { %19843 = vmatprep.subr.bf16.mxu0 %v19842_v61 }
0x1016   : > { %19234 = vmatmul.mubr.f32.vlgmr.msra.gmra.mrb[20].mxu1 %v11526_v31 }
0x1017   : > { %19871 = vmatpush3.bf16.msk.msra.mxu1 %vm22007_vm15, %v21701_v23 }
0x1018   : > { %19873 = vmatprep.subr.bf16.mxu1 %v19842_v61 }
0x10e6   : > { %v19193_v34 = vpop.f32.mrb[20].mxu0 }
0x10e7   : > { %11958 = vperm.xlu1 %20539, %v19193_v34   ;;  %v11433_v49 = vpop.f32.mrb[21].mxu0  ;;  %v13172_v34 = vand.u32 4294901760, %v13171_v52 }
0x10e8   : > { %11953 = vperm.xlu0 %20538, %v11433_v49  }
0x10e9   : > { %v19235_v53 = vpop.f32.mrb[20].mxu1  ;;  %v19902_v49 = vpack.c.bf16 %v13172_v34, %v20709_v3 }
0x10ea   : > { %v11941_v54 = vpop.f32.mrb[21].mxu1 }
0x10eb   : > { %11978 = vperm.xlu1 %20539, %v19235_v53  }
0x10ec   : > { %11973 = vperm.xlu0 %20538, %v11941_v54  }
0x1166   : > { %v11959_v0 = vpop.permute.xlu1 %11958 }
0x1167   : > { %v11966_v4 = vadd.f32 %v17774_v63, %v11959_v0  ;;  %v11954_v5 = vpop.permute.xlu0 %11953 }
0x1168   : > { %v11965_v7 = vadd.f32 %v17774_v63, %v11954_v5 }
0x1169   : > { %vm11968_vm0 = vcmp.lt.f32.partialorder %v11966_v4, %v21932_v16 }
0x116a   : > { %v22033_v8 = vsel %vm11968_vm0, %v11966_v4, %v21932_v16  ;;  %vm11967_vm3 = vcmp.lt.f32.partialorder %v11965_v7, %v21942_v20  ;;  %v11979_v11 = vpop.permute.xlu1 %11978 }
0x116b   : > { %11990 = vst.msk [vmem:[#allocation2 + $0x8] sm:$0xff] %vm262_vm1, %v22033_v8  ;;  %v12005_v13 = vsel %vm262_vm1, %v22033_v8, 0  ;;  %v22043_v58 = vsel %vm11967_vm3, %v11965_v7, %v21942_v20  ;;  %v11986_v48 = vadd.f32 %v17775_v10, %v11979_v11  ;;  %v11974_v12 = vpop.permute.xlu0 %11973 }
0x116c   : > { %v22045_v14 = vand.u32 4294901760, %v12005_v13  ;;  %11989 = vst.msk [vmem:[#allocation2] sm:$0xff] %vm262_vm1, %v22043_v58  ;;  %v12002_v15 = vsel %vm262_vm1, %v22043_v58, 0  ;;  %v11985_v16 = vadd.f32 %v17775_v10, %v11974_v12 }
0x116d   : > { %v22051_v17 = vand.u32 4294901760, %v12002_v15  ;;  %v22054_v18 = vsel %vm11968_vm0, %v11986_v48, %v21953_v26  ;;  %vm16260_vm0 = vcmp.eq.s32.totalorder %v20936_v9, 15 }
0x116e   : > { %v12085_v19 = vsub.f32 %v12005_v13, %v22045_v14  ;;  %11992 = vst.msk [vmem:[#allocation3 + $0x8] sm:$0xff] %vm262_vm1, %v22054_v18  ;;  %v12513_v21 = vsel %vm262_vm1, %v22054_v18, 0  ;;  %v22064_v1 = vsel %vm11967_vm3, %v11985_v16, %v21963_v30  ;;  %vm22411_vm3 = vmpackc.low %vm16260_vm0, %vm20711_vm2 }
0x116f   : > { %v12592_v25 = vand.u32 4294901760, %v12513_v21  ;;  %11991 = vst.msk [vmem:[#allocation3] sm:$0xff] %vm262_vm1, %v22064_v1  ;;  %v12510_v57 = vsel %vm262_vm1, %v22064_v1, 0  ;;  %v12075_v2 = vsub.f32 %v12002_v15, %v22051_v17 }
0x1170   : > { %v12582_v22 = vand.u32 4294901760, %v12510_v57  ;;  %v12086_v26 = vand.u32 4294901760, %v12085_v19 }
0x1171   : > { %v12593_v27 = vsub.f32 %v12513_v21, %v12592_v25  ;;  %v12076_v29 = vand.u32 4294901760, %v12075_v2 }
0x1172   : > { %v12583_v31 = vsub.f32 %v12510_v57, %v12582_v22  ;;  %v12087_v32 = vsub.f32 %v12085_v19, %v12086_v26  ;;  %v17783_v53 = vld [vmem:[#allocation2 + $0xb] ss:$0 sm:$0xff] }
0x1173   : > { %v12077_v33 = vsub.f32 %v12075_v2, %v12076_v29  ;;  %v12594_v35 = vand.u32 4294901760, %v12593_v27 }
0x1174   : > { %v12584_v20 = vand.u32 4294901760, %v12583_v31  ;;  %v12088_v24 = vand.u32 4294901760, %v12087_v32 }
0x1175   : > { %v12078_v30 = vand.u32 4294901760, %v12077_v33  ;;  %v12595_v37 = vsub.f32 %v12593_v27, %v12594_v35  ;;  %v17784_v60 = vld [vmem:[#allocation3 + $0xb] ss:$0 sm:$0xff] }
0x1176   : > { %v12585_v38 = vsub.f32 %v12583_v31, %v12584_v20 }
0x1177   : > { %19240 = vmatprep.mubr.f32.mxu0 %v12078_v30  ;;  %v12596_v42 = vand.u32 4294901760, %v12595_v37 }
0x1178   : > { %19241 = vmatmul.mubr.f32.vlgmr.msra.gmra.mrb[22].mxu0 %v12088_v24  ;;  %v12586_v41 = vand.u32 4294901760, %v12585_v38 }
0x1179   : > { %19845 = vmatpush3.bf16.msra.mxu0 %v19842_v61  ;;  %19247 = vmatprep.mubr.f32.mxu0 %v22051_v17 }
0x117a   : > { %19282 = vmatprep.mubr.f32.mxu1 %v12586_v41  ;;  %19847 = vmatprep.subr.bf16.mxu0 %v19846_v40 }
0x117b   : > { %19283 = vmatmul.mubr.f32.vlgmr.msra.gmra.mrb[22].mxu1 %v12596_v42 }
0x117c   : > { %19289 = vmatprep.mubr.f32.mxu1 %v12582_v22  ;;  %19875 = vmatpush3.bf16.msra.mxu1 %v19842_v61 }
0x117d   : > { %19877 = vmatprep.subr.bf16.mxu1 %v19846_v40 }
0x1180   : > { %19248 = vmatmul.mubr.f32.vlgmr.msra.gmra.mrb[22].mxu0 %v22045_v14 }
0x1181   : > { %19849 = vmatpush3.bf16.msra.mxu0 %v19846_v40  ;;  %19254 = vmatprep.mubr.f32.mxu0 %v12075_v2 }
0x1182   : > { %19852 = vmatprep.subr.msk.bf16.mxu0 %vm22007_vm15, %v21701_v23 }
0x1183   : > { %19290 = vmatmul.mubr.f32.vlgmr.msra.gmra.mrb[22].mxu1 %v12592_v25 }
0x1184   : > { %19296 = vmatprep.mubr.f32.mxu1 %v12583_v31  ;;  %19879 = vmatpush3.bf16.msra.mxu1 %v19846_v40  ;;  %v19906_v31 = vpack.c.bf16 %v22116_v50, %v20709_v3  ;;  %v17794_v40 = vsel %vm14128_vm8, 1.0, %v20709_v3 }
0x1185   : > { %19882 = vmatprep.subr.msk.bf16.mxu1 %vm22007_vm15, %v21701_v23  ;;  %v22217_v41 = vsub.f32 %v17794_v40, %v17794_v40 }
0x1187   : > { %v14236_v42 = vand.u32 4294901760, %v22217_v41 }
0x1188   : > { %19255 = vmatmul.mubr.f32.vlgmr.msra.gmra.mrb[22].mxu0 %v12085_v19 }
0x1189   : > { %19855 = vmatpush3.bf16.msk.msra.mxu0 %vm22007_vm15, %v21701_v23  ;;  %19261 = vmatprep.mubr.f32.mxu0 %v12076_v29 }
0x118a   : > { %19857 = vmatprep.subr.bf16.mxu0 %v19856_v43 }
0x118b   : > { %19297 = vmatmul.mubr.f32.vlgmr.msra.gmra.mrb[22].mxu1 %v12593_v27 }
0x118c   : > { %19303 = vmatprep.mubr.f32.mxu1 %v12584_v20  ;;  %19885 = vmatpush3.bf16.msk.msra.mxu1 %vm22007_vm15, %v21701_v23 }
0x118d   : > { %19887 = vmatprep.subr.bf16.mxu1 %v19856_v43 }
0x1190   : > { %19262 = vmatmul.mubr.f32.vlgmr.msra.gmra.mrb[22].mxu0 %v12086_v26 }
0x1191   : > { %19859 = vmatpush3.bf16.msra.mxu0 %v19856_v43  ;;  %19268 = vmatprep.mubr.f32.mxu0 %v22051_v17 }
0x1192   : > { %19862 = vmatprep.subr.msk.bf16.mxu0 %vm22007_vm15, %v21701_v23 }
0x1193   : > { %19304 = vmatmul.mubr.f32.vlgmr.msra.gmra.mrb[22].mxu1 %v12594_v35  ;;  %v19916_v35 = vpack.c.bf16 %v13170_v51, %v20709_v3 }
0x1194   : > { %19310 = vmatprep.mubr.f32.mxu1 %v12582_v22  ;;  %19889 = vmatpush3.bf16.msra.mxu1 %v19856_v43  ;;  %v14237_v43 = vsub.f32 %v22217_v41, %v14236_v42 }
0x1195   : > { %19892 = vmatprep.subr.msk.bf16.mxu1 %vm22007_vm15, %v21701_v23 }
0x1198   : > { %19269 = vmatmul.mubr.f32.vlgmr.msra.gmra.mrb[22].mxu0 %v22045_v14 }
0x1199   : > { %19865 = vmatpush3.bf16.msk.msra.mxu0 %vm22007_vm15, %v21701_v23  ;;  %19275 = vmatprep.mubr.f32.mxu0 %v22051_v17 }
0x119a   : > { %19898 = vmatprep.subr.msk.bf16.mxu0 %vm22108_vm5, %v21701_v23 }
0x119b   : > { %19311 = vmatmul.mubr.f32.vlgmr.msra.gmra.mrb[22].mxu1 %v12592_v25 }
0x119c   : > { %19317 = vmatprep.mubr.f32.mxu1 %v12582_v22  ;;  %19895 = vmatpush3.bf16.msk.msra.mxu1 %vm22007_vm15, %v21701_v23 }
0x119d   : > { %19928 = vmatprep.subr.msk.bf16.mxu1 %vm22108_vm5, %v21701_v23 }
0x11a0   : > { %19276 = vmatmul.mubr.f32.vlgmr.msra.gmra.mrb[22].mxu0 %v22045_v14 }
0x11a1   : > { %19901 = vmatpush3.bf16.msk.msra.mxu0 %vm22108_vm5, %v21701_v23 }
0x11a2   : > { %19903 = vmatprep.subr.bf16.mxu0 %v19902_v49 }
0x11a3   : > { %19318 = vmatmul.mubr.f32.vlgmr.msra.gmra.mrb[22].mxu1 %v12592_v25 }
0x11a4   : > { %19931 = vmatpush3.bf16.msk.msra.mxu1 %vm22108_vm5, %v21701_v23 }
0x11a5   : > { %19933 = vmatprep.subr.bf16.mxu1 %v19902_v49 }
0x1273   : > { %v19277_v28 = vpop.f32.mrb[22].mxu0 }
0x1274   : > { %13024 = vperm.xlu1 %20539, %v19277_v28   ;;  %v12499_v39 = vpop.f32.mrb[23].mxu0  ;;  %v14238_v28 = vand.u32 4294901760, %v14237_v43 }
0x1275   : > { %13019 = vperm.xlu0 %20538, %v12499_v39  }
0x1276   : > { %v19319_v44 = vpop.f32.mrb[22].mxu1  ;;  %v19962_v39 = vpack.c.bf16 %v14238_v28, %v20709_v3 }
0x1277   : > { %v13007_v45 = vpop.f32.mrb[23].mxu1 }
0x1278   : > { %13044 = vperm.xlu1 %20539, %v19319_v44  }
0x1279   : > { %13039 = vperm.xlu0 %20538, %v13007_v45  }
0x12f3   : > { %v13025_v54 = vpop.permute.xlu1 %13024 }
0x12f4   : > { %v13032_v55 = vadd.f32 %v17783_v53, %v13025_v54  ;;  %v13020_v56 = vpop.permute.xlu0 %13019 }
0x12f5   : > { %v13031_v59 = vadd.f32 %v17783_v53, %v13020_v56 }
0x12f6   : > { %vm13034_vm6 = vcmp.lt.f32.partialorder %v13032_v55, %v22033_v8 }
0x12f7   : > { %v22134_v62 = vsel %vm13034_vm6, %v13032_v55, %v22033_v8  ;;  %vm13033_vm7 = vcmp.lt.f32.partialorder %v13031_v59, %v22043_v58  ;;  %v13045_v36 = vpop.permute.xlu1 %13044 }
0x12f8   : > { %13056 = vst.msk [vmem:[#allocation2 + $0x8] sm:$0xff] %vm262_vm1, %v22134_v62  ;;  %v13071_v61 = vsel %vm262_vm1, %v22134_v62, 0  ;;  %v22144_v63 = vsel %vm13033_vm7, %v13031_v59, %v22043_v58  ;;  %v13052_v0 = vadd.f32 %v17784_v60, %v13045_v36  ;;  %v13040_v4 = vpop.permute.xlu0 %13039 }
0x12f9   : > { %v22146_v5 = vand.u32 4294901760, %v13071_v61  ;;  %13055 = vst.msk [vmem:[#allocation2] sm:$0xff] %vm262_vm1, %v22144_v63  ;;  %v13068_v7 = vsel %vm262_vm1, %v22144_v63, 0  ;;  %v13051_v8 = vadd.f32 %v17784_v60, %v13040_v4 }
0x12fa   : > { %v22152_v10 = vand.u32 4294901760, %v13068_v7  ;;  %v22155_v11 = vsel %vm13034_vm6, %v13052_v0, %v22054_v18 }
0x12fb   : > { %v13151_v13 = vsub.f32 %v13071_v61, %v22146_v5  ;;  %13058 = vst.msk [vmem:[#allocation3 + $0x8] sm:$0xff] %vm262_vm1, %v22155_v11  ;;  %v13579_v48 = vsel %vm262_vm1, %v22155_v11, 0  ;;  %v22165_v12 = vsel %vm13033_vm7, %v13051_v8, %v22064_v1 }
0x12fc   : > { %v13658_v14 = vand.u32 4294901760, %v13579_v48  ;;  %13057 = vst.msk [vmem:[#allocation3] sm:$0xff] %vm262_vm1, %v22165_v12  ;;  %v13576_v15 = vsel %vm262_vm1, %v22165_v12, 0  ;;  %v13141_v16 = vsub.f32 %v13068_v7, %v22152_v10 }
0x12fd   : > { %v13648_v17 = vand.u32 4294901760, %v13576_v15  ;;  %v13152_v18 = vand.u32 4294901760, %v13151_v13 }
0x12fe   : > { %v13659_v19 = vsub.f32 %v13579_v48, %v13658_v14  ;;  %v13142_v21 = vand.u32 4294901760, %v13141_v16 }
0x12ff   : > { %v13649_v25 = vsub.f32 %v13576_v15, %v13648_v17  ;;  %v13153_v57 = vsub.f32 %v13151_v13, %v13152_v18  ;;  %v17792_v44 = vld [vmem:[#allocation2 + $0xc] ss:$0 sm:$0xff] }
0x1300   : > { %v13143_v2 = vsub.f32 %v13141_v16, %v13142_v21  ;;  %v13660_v22 = vand.u32 4294901760, %v13659_v19 }
0x1301   : > { %v13650_v58 = vand.u32 4294901760, %v13649_v25  ;;  %v13154_v27 = vand.u32 4294901760, %v13153_v57 }
0x1302   : > { %v13144_v1 = vand.u32 4294901760, %v13143_v2  ;;  %v13661_v26 = vsub.f32 %v13659_v19, %v13660_v22  ;;  %v17793_v52 = vld [vmem:[#allocation3 + $0xc] ss:$0 sm:$0xff] }
0x1303   : > { %v13651_v29 = vsub.f32 %v13649_v25, %v13650_v58 }
0x1304   : > { %19324 = vmatprep.mubr.f32.mxu0 %v13144_v1  ;;  %v13662_v33 = vand.u32 4294901760, %v13661_v26 }
0x1305   : > { %19325 = vmatmul.mubr.f32.vlgmr.msra.gmra.mrb[24].mxu0 %v13154_v27  ;;  %v13652_v32 = vand.u32 4294901760, %v13651_v29 }
0x1306   : > { %19905 = vmatpush3.bf16.msra.mxu0 %v19902_v49  ;;  %19331 = vmatprep.mubr.f32.mxu0 %v22152_v10 }
0x1307   : > { %19366 = vmatprep.mubr.f32.mxu1 %v13652_v32  ;;  %19907 = vmatprep.subr.bf16.mxu0 %v19906_v31 }
0x1308   : > { %19367 = vmatmul.mubr.f32.vlgmr.msra.gmra.mrb[24].mxu1 %v13662_v33 }
0x1309   : > { %19373 = vmatprep.mubr.f32.mxu1 %v13648_v17  ;;  %19935 = vmatpush3.bf16.msra.mxu1 %v19902_v49 }
0x130a   : > { %19937 = vmatprep.subr.bf16.mxu1 %v19906_v31 }
0x130d   : > { %19332 = vmatmul.mubr.f32.vlgmr.msra.gmra.mrb[24].mxu0 %v22146_v5 }
0x130e   : > { %19909 = vmatpush3.bf16.msra.mxu0 %v19906_v31  ;;  %19338 = vmatprep.mubr.f32.mxu0 %v13141_v16 }
0x130f   : > { %19912 = vmatprep.subr.msk.bf16.mxu0 %vm22108_vm5, %v21701_v23 }
0x1310   : > { %19374 = vmatmul.mubr.f32.vlgmr.msra.gmra.mrb[24].mxu1 %v13658_v14 }
0x1311   : > { %19380 = vmatprep.mubr.f32.mxu1 %v13649_v25  ;;  %19939 = vmatpush3.bf16.msra.mxu1 %v19906_v31  ;;  %v19966_v25 = vpack.c.bf16 %v22217_v41, %v20709_v3  ;;  %v17803_v31 = vsel %vm15194_vm12, 1.0, %v20709_v3 }
0x1312   : > { %19942 = vmatprep.subr.msk.bf16.mxu1 %vm22108_vm5, %v21701_v23  ;;  %v22318_v32 = vsub.f32 %v17803_v31, %v17803_v31 }
0x1314   : > { %v15302_v33 = vand.u32 4294901760, %v22318_v32 }
0x1315   : > { %19339 = vmatmul.mubr.f32.vlgmr.msra.gmra.mrb[24].mxu0 %v13151_v13 }
0x1316   : > { %19915 = vmatpush3.bf16.msk.msra.mxu0 %vm22108_vm5, %v21701_v23  ;;  %19345 = vmatprep.mubr.f32.mxu0 %v13142_v21 }
0x1317   : > { %19917 = vmatprep.subr.bf16.mxu0 %v19916_v35 }
0x1318   : > { %19381 = vmatmul.mubr.f32.vlgmr.msra.gmra.mrb[24].mxu1 %v13659_v19 }
0x1319   : > { %19387 = vmatprep.mubr.f32.mxu1 %v13650_v58  ;;  %19945 = vmatpush3.bf16.msk.msra.mxu1 %vm22108_vm5, %v21701_v23 }
0x131a   : > { %19947 = vmatprep.subr.bf16.mxu1 %v19916_v35 }
0x131d   : > { %19346 = vmatmul.mubr.f32.vlgmr.msra.gmra.mrb[24].mxu0 %v13152_v18 }
0x131e   : > { %19919 = vmatpush3.bf16.msra.mxu0 %v19916_v35  ;;  %19352 = vmatprep.mubr.f32.mxu0 %v22152_v10 }
0x131f   : > { %19922 = vmatprep.subr.msk.bf16.mxu0 %vm22108_vm5, %v21701_v23 }
0x1320   : > { %19388 = vmatmul.mubr.f32.vlgmr.msra.gmra.mrb[24].mxu1 %v13660_v22  ;;  %v19976_v22 = vpack.c.bf16 %v14236_v42, %v20709_v3 }
0x1321   : > { %19394 = vmatprep.mubr.f32.mxu1 %v13648_v17  ;;  %19949 = vmatpush3.bf16.msra.mxu1 %v19916_v35  ;;  %v15303_v35 = vsub.f32 %v22318_v32, %v15302_v33 }
0x1322   : > { %19952 = vmatprep.subr.msk.bf16.mxu1 %vm22108_vm5, %v21701_v23 }
0x1325   : > { %19353 = vmatmul.mubr.f32.vlgmr.msra.gmra.mrb[24].mxu0 %v22146_v5 }
0x1326   : > { %19925 = vmatpush3.bf16.msk.msra.mxu0 %vm22108_vm5, %v21701_v23  ;;  %19359 = vmatprep.mubr.f32.mxu0 %v22152_v10 }
0x1327   : > { %19958 = vmatprep.subr.msk.bf16.mxu0 %vm22209_vm9, %v21701_v23 }
0x1328   : > { %19395 = vmatmul.mubr.f32.vlgmr.msra.gmra.mrb[24].mxu1 %v13658_v14 }
0x1329   : > { %19401 = vmatprep.mubr.f32.mxu1 %v13648_v17  ;;  %19955 = vmatpush3.bf16.msk.msra.mxu1 %vm22108_vm5, %v21701_v23 }
0x132a   : > { %19988 = vmatprep.subr.msk.bf16.mxu1 %vm22209_vm9, %v21701_v23 }
0x132d   : > { %19360 = vmatmul.mubr.f32.vlgmr.msra.gmra.mrb[24].mxu0 %v22146_v5 }
0x132e   : > { %19961 = vmatpush3.bf16.msk.msra.mxu0 %vm22209_vm9, %v21701_v23 }
0x132f   : > { %19963 = vmatprep.subr.bf16.mxu0 %v19962_v39 }
0x1330   : > { %19402 = vmatmul.mubr.f32.vlgmr.msra.gmra.mrb[24].mxu1 %v13658_v14 }
0x1331   : > { %19991 = vmatpush3.bf16.msk.msra.mxu1 %vm22209_vm9, %v21701_v23 }
0x1332   : > { %19993 = vmatprep.subr.bf16.mxu1 %v19962_v39 }
0x1400   : > { %v19361_v20 = vpop.f32.mrb[24].mxu0 }
0x1401   : > { %14090 = vperm.xlu1 %20539, %v19361_v20   ;;  %v13565_v30 = vpop.f32.mrb[25].mxu0  ;;  %v15304_v20 = vand.u32 4294901760, %v15303_v35 }
0x1402   : > { %14085 = vperm.xlu0 %20538, %v13565_v30  }
0x1403   : > { %v19403_v37 = vpop.f32.mrb[24].mxu1  ;;  %v20022_v30 = vpack.c.bf16 %v15304_v20, %v20709_v3 }
0x1404   : > { %v14073_v24 = vpop.f32.mrb[25].mxu1 }
0x1405   : > { %14110 = vperm.xlu1 %20539, %v19403_v37  }
0x1406   : > { %14105 = vperm.xlu0 %20538, %v14073_v24  }
0x1480   : > { %v14091_v45 = vpop.permute.xlu1 %14090 }
0x1481   : > { %v14098_v47 = vadd.f32 %v17792_v44, %v14091_v45  ;;  %v14086_v46 = vpop.permute.xlu0 %14085 }
0x1482   : > { %v14097_v50 = vadd.f32 %v17792_v44, %v14086_v46 }
0x1483   : > { %vm14100_vm10 = vcmp.lt.f32.partialorder %v14098_v47, %v22134_v62 }
0x1484   : > { %v22235_v51 = vsel %vm14100_vm10, %v14098_v47, %v22134_v62  ;;  %vm14099_vm11 = vcmp.lt.f32.partialorder %v14097_v50, %v22144_v63  ;;  %v14111_v34 = vpop.permute.xlu1 %14110 }
0x1485   : > { %14122 = vst.msk [vmem:[#allocation2 + $0x8] sm:$0xff] %vm262_vm1, %v22235_v51  ;;  %v14137_v49 = vsel %vm262_vm1, %v22235_v51, 0  ;;  %v22245_v53 = vsel %vm14099_vm11, %v14097_v50, %v22144_v63  ;;  %v14118_v54 = vadd.f32 %v17793_v52, %v14111_v34  ;;  %v14106_v55 = vpop.permute.xlu0 %14105 }
0x1486   : > { %v22247_v56 = vand.u32 4294901760, %v14137_v49  ;;  %14121 = vst.msk [vmem:[#allocation2] sm:$0xff] %vm262_vm1, %v22245_v53  ;;  %v14134_v59 = vsel %vm262_vm1, %v22245_v53, 0  ;;  %v14117_v62 = vadd.f32 %v17793_v52, %v14106_v55 }
0x1487   : > { %v22253_v60 = vand.u32 4294901760, %v14134_v59  ;;  %v22256_v36 = vsel %vm14100_vm10, %v14118_v54, %v22155_v11 }
0x1488   : > { %v14217_v61 = vsub.f32 %v14137_v49, %v22247_v56  ;;  %14124 = vst.msk [vmem:[#allocation3 + $0x8] sm:$0xff] %vm262_vm1, %v22256_v36  ;;  %v14645_v0 = vsel %vm262_vm1, %v22256_v36, 0  ;;  %v22266_v4 = vsel %vm14099_vm11, %v14117_v62, %v22165_v12 }
0x1489   : > { %v14724_v5 = vand.u32 4294901760, %v14645_v0  ;;  %14123 = vst.msk [vmem:[#allocation3] sm:$0xff] %vm262_vm1, %v22266_v4  ;;  %v14642_v7 = vsel %vm262_vm1, %v22266_v4, 0  ;;  %v14207_v8 = vsub.f32 %v14134_v59, %v22253_v60 }
0x148a   : > { %v14714_v10 = vand.u32 4294901760, %v14642_v7  ;;  %v14218_v11 = vand.u32 4294901760, %v14217_v61 }
0x148b   : > { %v14725_v13 = vsub.f32 %v14645_v0, %v14724_v5  ;;  %v14208_v48 = vand.u32 4294901760, %v14207_v8 }
0x148c   : > { %v14715_v14 = vsub.f32 %v14642_v7, %v14714_v10  ;;  %v14219_v15 = vsub.f32 %v14217_v61, %v14218_v11  ;;  %v17801_v37 = vld [vmem:[#allocation2 + $0xd] ss:$0 sm:$0xff] }
0x148d   : > { %v14209_v16 = vsub.f32 %v14207_v8, %v14208_v48  ;;  %v14726_v17 = vand.u32 4294901760, %v14725_v13 }
0x148e   : > { %v14716_v63 = vand.u32 4294901760, %v14715_v14  ;;  %v14220_v19 = vand.u32 4294901760, %v14219_v15 }
0x148f   : > { %v14210_v12 = vand.u32 4294901760, %v14209_v16  ;;  %v14727_v18 = vsub.f32 %v14725_v13, %v14726_v17  ;;  %v17802_v43 = vld [vmem:[#allocation3 + $0xd] ss:$0 sm:$0xff] }
0x1490   : > { %v14717_v21 = vsub.f32 %v14715_v14, %v14716_v63 }
0x1491   : > { %19408 = vmatprep.mubr.f32.mxu0 %v14210_v12  ;;  %v14728_v2 = vand.u32 4294901760, %v14727_v18 }
0x1492   : > { %19409 = vmatmul.mubr.f32.vlgmr.msra.gmra.mrb[26].mxu0 %v14220_v19  ;;  %v14718_v57 = vand.u32 4294901760, %v14717_v21 }
0x1493   : > { %19965 = vmatpush3.bf16.msra.mxu0 %v19962_v39  ;;  %19415 = vmatprep.mubr.f32.mxu0 %v22253_v60 }
0x1494   : > { %19450 = vmatprep.mubr.f32.mxu1 %v14718_v57  ;;  %19967 = vmatprep.subr.bf16.mxu0 %v19966_v25 }
0x1495   : > { %19451 = vmatmul.mubr.f32.vlgmr.msra.gmra.mrb[26].mxu1 %v14728_v2 }
0x1496   : > { %19457 = vmatprep.mubr.f32.mxu1 %v14714_v10  ;;  %19995 = vmatpush3.bf16.msra.mxu1 %v19962_v39 }
0x1497   : > { %19997 = vmatprep.subr.bf16.mxu1 %v19966_v25 }
0x149a   : > { %19416 = vmatmul.mubr.f32.vlgmr.msra.gmra.mrb[26].mxu0 %v22247_v56 }
0x149b   : > { %19969 = vmatpush3.bf16.msra.mxu0 %v19966_v25  ;;  %19422 = vmatprep.mubr.f32.mxu0 %v14207_v8 }
0x149c   : > { %19972 = vmatprep.subr.msk.bf16.mxu0 %vm22209_vm9, %v21701_v23 }
0x149d   : > { %19458 = vmatmul.mubr.f32.vlgmr.msra.gmra.mrb[26].mxu1 %v14724_v5 }
0x149e   : > { %19464 = vmatprep.mubr.f32.mxu1 %v14715_v14  ;;  %19999 = vmatpush3.bf16.msra.mxu1 %v19966_v25  ;;  %v20026_v14 = vpack.c.bf16 %v22318_v32, %v20709_v3  ;;  %v17812_v25 = vsel %vm16260_vm0, 1.0, %v20709_v3 }
0x149f   : > { %20002 = vmatprep.subr.msk.bf16.mxu1 %vm22209_vm9, %v21701_v23  ;;  %v22419_v57 = vsub.f32 %v17812_v25, %v17812_v25 }
0x14a1   : > { %v16368_v9 = vand.u32 4294901760, %v22419_v57 }
0x14a2   : > { %19423 = vmatmul.mubr.f32.vlgmr.msra.gmra.mrb[26].mxu0 %v14217_v61 }
0x14a3   : > { %19975 = vmatpush3.bf16.msk.msra.mxu0 %vm22209_vm9, %v21701_v23  ;;  %19429 = vmatprep.mubr.f32.mxu0 %v14208_v48  ;;  %v16369_v2 = vsub.f32 %v22419_v57, %v16368_v9 }
0x14a4   : > { %19977 = vmatprep.subr.bf16.mxu0 %v19976_v22 }
0x14a5   : > { %19465 = vmatmul.mubr.f32.vlgmr.msra.gmra.mrb[26].mxu1 %v14725_v13 }
0x14a6   : > { %19471 = vmatprep.mubr.f32.mxu1 %v14716_v63  ;;  %20005 = vmatpush3.bf16.msk.msra.mxu1 %vm22209_vm9, %v21701_v23 }
0x14a7   : > { %20007 = vmatprep.subr.bf16.mxu1 %v19976_v22 }
0x14aa   : > { %19430 = vmatmul.mubr.f32.vlgmr.msra.gmra.mrb[26].mxu0 %v14218_v11 }
0x14ab   : > { %19979 = vmatpush3.bf16.msra.mxu0 %v19976_v22  ;;  %19436 = vmatprep.mubr.f32.mxu0 %v22253_v60 }
0x14ac   : > { %19982 = vmatprep.subr.msk.bf16.mxu0 %vm22209_vm9, %v21701_v23 }
0x14ad   : > { %19472 = vmatmul.mubr.f32.vlgmr.msra.gmra.mrb[26].mxu1 %v14726_v17  ;;  %v20036_v17 = vpack.c.bf16 %v15302_v33, %v20709_v3 }
0x14ae   : > { %19478 = vmatprep.mubr.f32.mxu1 %v14714_v10  ;;  %20009 = vmatpush3.bf16.msra.mxu1 %v19976_v22  ;;  %v16370_v22 = vand.u32 4294901760, %v16369_v2 }
0x14af   : > { %20012 = vmatprep.subr.msk.bf16.mxu1 %vm22209_vm9, %v21701_v23 }
0x14b2   : > { %19437 = vmatmul.mubr.f32.vlgmr.msra.gmra.mrb[26].mxu0 %v22247_v56 }
0x14b3   : > { %19985 = vmatpush3.bf16.msk.msra.mxu0 %vm22209_vm9, %v21701_v23  ;;  %19443 = vmatprep.mubr.f32.mxu0 %v22253_v60 }
0x14b4   : > { %20018 = vmatprep.subr.msk.bf16.mxu0 %vm22310_vm13, %v21701_v23 }
0x14b5   : > { %19479 = vmatmul.mubr.f32.vlgmr.msra.gmra.mrb[26].mxu1 %v14724_v5 }
0x14b6   : > { %19485 = vmatprep.mubr.f32.mxu1 %v14714_v10  ;;  %20015 = vmatpush3.bf16.msk.msra.mxu1 %vm22209_vm9, %v21701_v23 }
0x14b7   : > { %20048 = vmatprep.subr.msk.bf16.mxu1 %vm22310_vm13, %v21701_v23 }
0x14ba   : > { %19444 = vmatmul.mubr.f32.vlgmr.msra.gmra.mrb[26].mxu0 %v22247_v56 }
0x14bb   : > { %20021 = vmatpush3.bf16.msk.msra.mxu0 %vm22310_vm13, %v21701_v23 }
0x14bc   : > { %20023 = vmatprep.subr.bf16.mxu0 %v20022_v30 }
0x14bd   : > { %19486 = vmatmul.mubr.f32.vlgmr.msra.gmra.mrb[26].mxu1 %v14724_v5 }
0x14be   : > { %20051 = vmatpush3.bf16.msk.msra.mxu1 %vm22310_vm13, %v21701_v23 }
0x14bf   : > { %20053 = vmatprep.subr.bf16.mxu1 %v20022_v30 }
0x158d   : > { %v19445_v58 = vpop.f32.mrb[26].mxu0 }
0x158e   : > { %15156 = vperm.xlu1 %20539, %v19445_v58   ;;  %v14631_v1 = vpop.f32.mrb[27].mxu0  ;;  %v20082_v58 = vpack.c.bf16 %v16370_v22, %v20709_v3 }
0x158f   : > { %15151 = vperm.xlu0 %20538, %v14631_v1  }
0x1590   : > { %v19487_v26 = vpop.f32.mrb[26].mxu1 }
0x1591   : > { %v15139_v27 = vpop.f32.mrb[27].mxu1 }
0x1592   : > { %15176 = vperm.xlu1 %20539, %v19487_v26  }
0x1593   : > { %15171 = vperm.xlu0 %20538, %v15139_v27  }
0x160d   : > { %v15157_v24 = vpop.permute.xlu1 %15156 }
0x160e   : > { %v15164_v38 = vadd.f32 %v17801_v37, %v15157_v24  ;;  %v15152_v40 = vpop.permute.xlu0 %15151 }
0x160f   : > { %v15163_v41 = vadd.f32 %v17801_v37, %v15152_v40 }
0x1610   : > { %vm15166_vm14 = vcmp.lt.f32.partialorder %v15164_v38, %v22235_v51 }
0x1611   : > { %v22336_v42 = vsel %vm15166_vm14, %v15164_v38, %v22235_v51  ;;  %vm15165_vm15 = vcmp.lt.f32.partialorder %v15163_v41, %v22245_v53  ;;  %v15177_v28 = vpop.permute.xlu1 %15176 }
0x1612   : > { %15188 = vst.msk [vmem:[#allocation2 + $0x8] sm:$0xff] %vm262_vm1, %v22336_v42  ;;  %v15203_v39 = vsel %vm262_vm1, %v22336_v42, 0  ;;  %v22346_v44 = vsel %vm15165_vm15, %v15163_v41, %v22245_v53  ;;  %v15184_v45 = vadd.f32 %v17802_v43, %v15177_v28  ;;  %v15172_v47 = vpop.permute.xlu0 %15171 }
0x1613   : > { %v22348_v46 = vand.u32 4294901760, %v15203_v39  ;;  %15187 = vst.msk [vmem:[#allocation2] sm:$0xff] %vm262_vm1, %v22346_v44  ;;  %v15200_v50 = vsel %vm262_vm1, %v22346_v44, 0  ;;  %v15183_v51 = vadd.f32 %v17802_v43, %v15172_v47 }
0x1614   : > { %v22354_v52 = vand.u32 4294901760, %v15200_v50  ;;  %v22357_v34 = vsel %vm15166_vm14, %v15184_v45, %v22256_v36 }
0x1615   : > { %v15283_v49 = vsub.f32 %v15203_v39, %v22348_v46  ;;  %15190 = vst.msk [vmem:[#allocation3 + $0x8] sm:$0xff] %vm262_vm1, %v22357_v34  ;;  %v15711_v54 = vsel %vm262_vm1, %v22357_v34, 0  ;;  %v22367_v55 = vsel %vm15165_vm15, %v15183_v51, %v22266_v4 }
0x1616   : > { %v15790_v56 = vand.u32 4294901760, %v15711_v54  ;;  %15189 = vst.msk [vmem:[#allocation3] sm:$0xff] %vm262_vm1, %v22367_v55  ;;  %v15708_v59 = vsel %vm262_vm1, %v22367_v55, 0  ;;  %v15273_v62 = vsub.f32 %v15200_v50, %v22354_v52 }
0x1617   : > { %v15780_v60 = vand.u32 4294901760, %v15708_v59  ;;  %v15284_v36 = vand.u32 4294901760, %v15283_v49 }
0x1618   : > { %v15791_v61 = vsub.f32 %v15711_v54, %v15790_v56  ;;  %v15274_v0 = vand.u32 4294901760, %v15273_v62 }
0x1619   : > { %v15781_v5 = vsub.f32 %v15708_v59, %v15780_v60  ;;  %v15285_v7 = vsub.f32 %v15283_v49, %v15284_v36  ;;  %v17810_v1 = vld [vmem:[#allocation2 + $0xe] ss:$0 sm:$0xff] }
0x161a   : > { %v15275_v8 = vsub.f32 %v15273_v62, %v15274_v0  ;;  %v15792_v10 = vand.u32 4294901760, %v15791_v61 }
0x161b   : > { %v15782_v53 = vand.u32 4294901760, %v15781_v5  ;;  %v15286_v13 = vand.u32 4294901760, %v15285_v7 }
0x161c   : > { %v15276_v4 = vand.u32 4294901760, %v15275_v8  ;;  %v15793_v11 = vsub.f32 %v15791_v61, %v15792_v10  ;;  %v17811_v33 = vld [vmem:[#allocation3 + $0xe] ss:$0 sm:$0xff]  ;;  %v20096_v8 = vpack.c.bf16 %v16368_v9, %v20709_v3 }
0x161d   : > { %v15783_v48 = vsub.f32 %v15781_v5, %v15782_v53 }
0x161e   : > { %19492 = vmatprep.mubr.f32.mxu0 %v15276_v4  ;;  %v15794_v16 = vand.u32 4294901760, %v15793_v11 }
0x161f   : > { %19493 = vmatmul.mubr.f32.vlgmr.msra.gmra.mrb[28].mxu0 %v15286_v13  ;;  %v15784_v15 = vand.u32 4294901760, %v15783_v48  ;;  %v22512_v13 = vld [vmem:[%s207_s9] sm:$0xff]  ;;  %v22516_v48 = vld [vmem:[%s207_s9 + $0x8] sm:$0xff] }
0x1620   : > { %20025 = vmatpush3.bf16.msra.mxu0 %v20022_v30  ;;  %19499 = vmatprep.mubr.f32.mxu0 %v22354_v52  ;;  %vm17393_vm6 = vcmp.gt.f32.partialorder %v22516_v48, 0.0  ;;  %vm17392_vm8 = vcmp.gt.f32.partialorder %v22512_v13, 0.0 }
0x1621   : > { %19534 = vmatprep.mubr.f32.mxu1 %v15784_v15  ;;  %20027 = vmatprep.subr.bf16.mxu0 %v20026_v14 }
0x1622   : > { %19535 = vmatmul.mubr.f32.vlgmr.msra.gmra.mrb[28].mxu1 %v15794_v16 }
0x1623   : > { %19541 = vmatprep.mubr.f32.mxu1 %v15780_v60  ;;  %20055 = vmatpush3.bf16.msra.mxu1 %v20022_v30 }
0x1624   : > { %20057 = vmatprep.subr.bf16.mxu1 %v20026_v14 }
0x1627   : > { %19500 = vmatmul.mubr.f32.vlgmr.msra.gmra.mrb[28].mxu0 %v22348_v46 }
0x1628   : > { %20029 = vmatpush3.bf16.msra.mxu0 %v20026_v14  ;;  %19506 = vmatprep.mubr.f32.mxu0 %v15273_v62 }
0x1629   : > { %20032 = vmatprep.subr.msk.bf16.mxu0 %vm22310_vm13, %v21701_v23 }
0x162a   : > { %19542 = vmatmul.mubr.f32.vlgmr.msra.gmra.mrb[28].mxu1 %v15790_v56 }
0x162b   : > { %19548 = vmatprep.mubr.f32.mxu1 %v15781_v5  ;;  %20059 = vmatpush3.bf16.msra.mxu1 %v20026_v14  ;;  %v17340_v14 = vsel %vm262_vm1, %v22516_v48, 0.0 }
0x162c   : > { %20062 = vmatprep.subr.msk.bf16.mxu1 %vm22310_vm13, %v21701_v23 }
0x162f   : > { %19507 = vmatmul.mubr.f32.vlgmr.msra.gmra.mrb[28].mxu0 %v15283_v49 }
0x1630   : > { %20035 = vmatpush3.bf16.msk.msra.mxu0 %vm22310_vm13, %v21701_v23  ;;  %19513 = vmatprep.mubr.f32.mxu0 %v15274_v0  ;;  %v20086_v0 = vpack.c.bf16 %v22419_v57, %v20709_v3 }
0x1631   : > { %20037 = vmatprep.subr.bf16.mxu0 %v20036_v17 }
0x1632   : > { %19549 = vmatmul.mubr.f32.vlgmr.msra.gmra.mrb[28].mxu1 %v15791_v61 }
0x1633   : > { %19555 = vmatprep.mubr.f32.mxu1 %v15782_v53  ;;  %20065 = vmatpush3.bf16.msk.msra.mxu1 %vm22310_vm13, %v21701_v23 }
0x1634   : > { %20067 = vmatprep.subr.bf16.mxu1 %v20036_v17 }
0x1637   : > { %19514 = vmatmul.mubr.f32.vlgmr.msra.gmra.mrb[28].mxu0 %v15284_v36 }
0x1638   : > { %20039 = vmatpush3.bf16.msra.mxu0 %v20036_v17  ;;  %19520 = vmatprep.mubr.f32.mxu0 %v22354_v52 }
0x1639   : > { %20042 = vmatprep.subr.msk.bf16.mxu0 %vm22310_vm13, %v21701_v23 }
0x163a   : > { %19556 = vmatmul.mubr.f32.vlgmr.msra.gmra.mrb[28].mxu1 %v15792_v10 }
0x163b   : > { %19562 = vmatprep.mubr.f32.mxu1 %v15780_v60  ;;  %20069 = vmatpush3.bf16.msra.mxu1 %v20036_v17 }
0x163c   : > { %20072 = vmatprep.subr.msk.bf16.mxu1 %vm22310_vm13, %v21701_v23 }
0x163f   : > { %19521 = vmatmul.mubr.f32.vlgmr.msra.gmra.mrb[28].mxu0 %v22348_v46 }
0x1640   : > { %20045 = vmatpush3.bf16.msk.msra.mxu0 %vm22310_vm13, %v21701_v23  ;;  %19527 = vmatprep.mubr.f32.mxu0 %v22354_v52 }
0x1641   : > { %20078 = vmatprep.subr.msk.bf16.mxu0 %vm22411_vm3, %v21701_v23 }
0x1642   : > { %19563 = vmatmul.mubr.f32.vlgmr.msra.gmra.mrb[28].mxu1 %v15790_v56 }
0x1643   : > { %19569 = vmatprep.mubr.f32.mxu1 %v15780_v60  ;;  %20075 = vmatpush3.bf16.msk.msra.mxu1 %vm22310_vm13, %v21701_v23 }
0x1644   : > { %20108 = vmatprep.subr.msk.bf16.mxu1 %vm22411_vm3, %v21701_v23 }
0x1647   : > { %19528 = vmatmul.mubr.f32.vlgmr.msra.gmra.mrb[28].mxu0 %v22348_v46 }
0x1648   : > { %20081 = vmatpush3.bf16.msk.msra.mxu0 %vm22411_vm3, %v21701_v23 }
0x1649   : > { %20083 = vmatprep.subr.bf16.mxu0 %v20082_v58 }
0x164a   : > { %19570 = vmatmul.mubr.f32.vlgmr.msra.gmra.mrb[28].mxu1 %v15790_v56 }
0x164b   : > { %20111 = vmatpush3.bf16.msk.msra.mxu1 %vm22411_vm3, %v21701_v23 }
0x164c   : > { %20113 = vmatprep.subr.bf16.mxu1 %v20082_v58 }
0x171a   : > { %v19529_v63 = vpop.f32.mrb[28].mxu0 }
0x171b   : > { %16222 = vperm.xlu1 %20539, %v19529_v63   ;;  %v15697_v12 = vpop.f32.mrb[29].mxu0 }
0x171c   : > { %16217 = vperm.xlu0 %20538, %v15697_v12  }
0x171d   : > { %v19571_v18 = vpop.f32.mrb[28].mxu1 }
0x171e   : > { %v16205_v19 = vpop.f32.mrb[29].mxu1 }
0x171f   : > { %16242 = vperm.xlu1 %20539, %v19571_v18  }
0x1720   : > { %16237 = vperm.xlu0 %20538, %v16205_v19  }
0x179a   : > { %v16223_v26 = vpop.permute.xlu1 %16222 }
0x179b   : > { %v16230_v27 = vadd.f32 %v17810_v1, %v16223_v26  ;;  %v16218_v29 = vpop.permute.xlu0 %16217 }
0x179c   : > { %v16229_v31 = vadd.f32 %v17810_v1, %v16218_v29 }
0x179d   : > { %vm16232_vm2 = vcmp.lt.f32.partialorder %v16230_v27, %v22336_v42 }
0x179e   : > { %v22437_v32 = vsel %vm16232_vm2, %v16230_v27, %v22336_v42  ;;  %vm16231_vm4 = vcmp.lt.f32.partialorder %v16229_v31, %v22346_v44  ;;  %v16243_v35 = vpop.permute.xlu1 %16242 }
0x179f   : > { %16254 = vst.msk [vmem:[#allocation2 + $0x8] sm:$0xff] %vm262_vm1, %v22437_v32  ;;  %v16269_v20 = vsel %vm262_vm1, %v22437_v32, 0  ;;  %v22447_v30 = vsel %vm16231_vm4, %v16229_v31, %v22346_v44  ;;  %v16250_v37 = vadd.f32 %v17811_v33, %v16243_v35  ;;  %v16238_v24 = vpop.permute.xlu0 %16237 }
0x17a0   : > { %v22449_v38 = vand.u32 4294901760, %v16269_v20  ;;  %16253 = vst.msk [vmem:[#allocation2] sm:$0xff] %vm262_vm1, %v22447_v30  ;;  %v16266_v40 = vsel %vm262_vm1, %v22447_v30, 0  ;;  %v16249_v41 = vadd.f32 %v17811_v33, %v16238_v24 }
0x17a1   : > { %v22455_v42 = vand.u32 4294901760, %v16266_v40  ;;  %v22458_v43 = vsel %vm16232_vm2, %v16250_v37, %v22357_v34 }
0x17a2   : > { %v16349_v28 = vsub.f32 %v16269_v20, %v22449_v38  ;;  %16256 = vst.msk [vmem:[#allocation3 + $0x8] sm:$0xff] %vm262_vm1, %v22458_v43  ;;  %v16777_v39 = vsel %vm262_vm1, %v22458_v43, 0  ;;  %v22468_v45 = vsel %vm16231_vm4, %v16249_v41, %v22367_v55 }
0x17a3   : > { %v16856_v47 = vand.u32 4294901760, %v16777_v39  ;;  %16255 = vst.msk [vmem:[#allocation3] sm:$0xff] %vm262_vm1, %v22468_v45  ;;  %v16774_v46 = vsel %vm262_vm1, %v22468_v45, 0  ;;  %v16339_v50 = vsub.f32 %v16266_v40, %v22455_v42 }
0x17a4   : > { %v16846_v51 = vand.u32 4294901760, %v16774_v46  ;;  %v16350_v52 = vand.u32 4294901760, %v16349_v28 }
0x17a5   : > { %v16857_v34 = vsub.f32 %v16777_v39, %v16856_v47  ;;  %v16340_v49 = vand.u32 4294901760, %v16339_v50 }
0x17a6   : > { %v16847_v54 = vsub.f32 %v16774_v46, %v16846_v51  ;;  %v16351_v56 = vsub.f32 %v16349_v28, %v16350_v52  ;;  %v17819_v16 = vld [vmem:[#allocation2 + $0xf] ss:$0 sm:$0xff] }
0x17a7   : > { %v16341_v59 = vsub.f32 %v16339_v50, %v16340_v49  ;;  %v16858_v62 = vand.u32 4294901760, %v16857_v34 }
0x17a8   : > { %v16848_v44 = vand.u32 4294901760, %v16847_v54  ;;  %v16352_v36 = vand.u32 4294901760, %v16351_v56 }
0x17a9   : > { %v16342_v55 = vand.u32 4294901760, %v16341_v59  ;;  %v16859_v60 = vsub.f32 %v16857_v34, %v16858_v62  ;;  %v17820_v21 = vld [vmem:[#allocation3 + $0xf] ss:$0 sm:$0xff] }
0x17aa   : > { %v16849_v61 = vsub.f32 %v16847_v54, %v16848_v44 }
0x17ab   : > { %19576 = vmatprep.mubr.f32.mxu0 %v16342_v55  ;;  %v16860_v7 = vand.u32 4294901760, %v16859_v60 }
0x17ac   : > { %19577 = vmatmul.mubr.f32.vlgmr.msra.gmra.mrb[30].mxu0 %v16352_v36  ;;  %v16850_v5 = vand.u32 4294901760, %v16849_v61 }
0x17ad   : > { %20085 = vmatpush3.bf16.msra.mxu0 %v20082_v58  ;;  %19583 = vmatprep.mubr.f32.mxu0 %v22455_v42 }
0x17ae   : > { %19618 = vmatprep.mubr.f32.mxu1 %v16850_v5  ;;  %20087 = vmatprep.subr.bf16.mxu0 %v20086_v0 }
0x17af   : > { %19619 = vmatmul.mubr.f32.vlgmr.msra.gmra.mrb[30].mxu1 %v16860_v7 }
0x17b0   : > { %20115 = vmatpush3.bf16.msra.mxu1 %v20082_v58  ;;  %19625 = vmatprep.mubr.f32.mxu1 %v16846_v51 }
0x17b1   : > { %20117 = vmatprep.subr.bf16.mxu1 %v20086_v0 }
0x17b4   : > { %19584 = vmatmul.mubr.f32.vlgmr.msra.gmra.mrb[30].mxu0 %v22449_v38 }
0x17b5   : > { %20089 = vmatpush3.bf16.msra.mxu0 %v20086_v0  ;;  %19590 = vmatprep.mubr.f32.mxu0 %v16339_v50 }
0x17b6   : > { %20092 = vmatprep.subr.msk.bf16.mxu0 %vm22411_vm3, %v21701_v23 }
0x17b7   : > { %19626 = vmatmul.mubr.f32.vlgmr.msra.gmra.mrb[30].mxu1 %v16856_v47 }
0x17b8   : > { %20119 = vmatpush3.bf16.msra.mxu1 %v20086_v0  ;;  %19632 = vmatprep.mubr.f32.mxu1 %v16847_v54 }
0x17b9   : > { %20122 = vmatprep.subr.msk.bf16.mxu1 %vm22411_vm3, %v21701_v23 }
0x17bc   : > { %19591 = vmatmul.mubr.f32.vlgmr.msra.gmra.mrb[30].mxu0 %v16349_v28 }
0x17bd   : > { %20095 = vmatpush3.bf16.msk.msra.mxu0 %vm22411_vm3, %v21701_v23  ;;  %19597 = vmatprep.mubr.f32.mxu0 %v16340_v49 }
0x17be   : > { %20097 = vmatprep.subr.bf16.mxu0 %v20096_v8 }
0x17bf   : > { %19633 = vmatmul.mubr.f32.vlgmr.msra.gmra.mrb[30].mxu1 %v16857_v34 }
0x17c0   : > { %20125 = vmatpush3.bf16.msk.msra.mxu1 %vm22411_vm3, %v21701_v23  ;;  %19639 = vmatprep.mubr.f32.mxu1 %v16848_v44 }
0x17c1   : > { %20127 = vmatprep.subr.bf16.mxu1 %v20096_v8 }
0x17c4   : > { %19598 = vmatmul.mubr.f32.vlgmr.msra.gmra.mrb[30].mxu0 %v16350_v52 }
0x17c5   : > { %20099 = vmatpush3.bf16.msra.mxu0 %v20096_v8  ;;  %19604 = vmatprep.mubr.f32.mxu0 %v22455_v42 }
0x17c6   : > { %20102 = vmatprep.subr.msk.bf16.mxu0 %vm22411_vm3, %v21701_v23 }
0x17c7   : > { %19640 = vmatmul.mubr.f32.vlgmr.msra.gmra.mrb[30].mxu1 %v16858_v62 }
0x17c8   : > { %20129 = vmatpush3.bf16.msra.mxu1 %v20096_v8  ;;  %19646 = vmatprep.mubr.f32.mxu1 %v16846_v51 }
0x17c9   : > { %20132 = vmatprep.subr.msk.bf16.mxu1 %vm22411_vm3, %v21701_v23 }
0x17cc   : > { %19605 = vmatmul.mubr.f32.vlgmr.msra.gmra.mrb[30].mxu0 %v22449_v38 }
0x17cd   : > { %20105 = vmatpush3.bf16.msk.msra.mxu0 %vm22411_vm3, %v21701_v23  ;;  %19611 = vmatprep.mubr.f32.mxu0 %v22455_v42 }
0x17cf   : > { %19647 = vmatmul.mubr.f32.vlgmr.msra.gmra.mrb[30].mxu1 %v16856_v47 }
0x17d0   : > { %20135 = vmatpush3.bf16.msk.msra.mxu1 %vm22411_vm3, %v21701_v23  ;;  %19653 = vmatprep.mubr.f32.mxu1 %v16846_v51  ;;  %v17339_v23 = vsel %vm262_vm1, %v22512_v13, 0.0 }
0x17d1   : > { %v17341_v15 = vadd.f32 %v17340_v14, %v17339_v23 }
0x17d4   : > { %19612 = vmatmul.mubr.f32.vlgmr.msra.gmra.mrb[30].mxu0 %v22449_v38 }
0x17d7   : > { %19654 = vmatmul.mubr.f32.vlgmr.msra.gmra.mrb[30].mxu1 %v16856_v47 }
0x18a7   : > { %v19613_v10 = vpop.f32.mrb[30].mxu0 }
0x18a8   : > { %17288 = vperm.xlu1 %20539, %v19613_v10   ;;  %v16763_v53 = vpop.f32.mrb[31].mxu0 }
0x18a9   : > { %17283 = vperm.xlu0 %20538, %v16763_v53  }
0x18aa   : > { %v19655_v4 = vpop.f32.mrb[30].mxu1 }
0x18ab   : > { %v17271_v11 = vpop.f32.mrb[31].mxu1 }
0x18ac   : > { %17308 = vperm.xlu1 %20539, %v19655_v4  }
0x18ad   : > { %17303 = vperm.xlu0 %20538, %v17271_v11  }
0x18cc   : > { %17342 = vadd.xlane.f32.xlu0 %v17341_v15 }
0x1927   : > { %v17289_v17 = vpop.permute.xlu1 %17288 }
0x1928   : > { %v17296_v63 = vadd.f32 %v17819_v16, %v17289_v17  ;;  %v17284_v12 = vpop.permute.xlu0 %17283 }
0x1929   : > { %v17295_v18 = vadd.f32 %v17819_v16, %v17284_v12 }
0x192a   : > { %vm17298_vm5 = vcmp.lt.f32.partialorder %v17296_v63, %v22437_v32 }
0x192b   : > { %v17300_v19 = vsel %vm17298_vm5, %v17296_v63, %v22437_v32  ;;  %vm17297_vm7 = vcmp.lt.f32.partialorder %v17295_v18, %v22447_v30  ;;  %v17309_v25 = vpop.permute.xlu1 %17308 }
0x192c   : > { %17320 = vst.msk [vmem:[#allocation2 + $0x8] sm:$0xff] %vm262_vm1, %v17300_v19  ;;  %vm17324_vm9 = vcmp.ge.f32.partialorder %v17300_v19, 1e+17  ;;  %v17299_v57 = vsel %vm17297_vm7, %v17295_v18, %v22447_v30  ;;  %v17316_v9 = vadd.f32 %v17820_v21, %v17309_v25  ;;  %v17304_v2 = vpop.permute.xlu0 %17303 }
0x192d   : > { %17319 = vst.msk [vmem:[#allocation2] sm:$0xff] %vm262_vm1, %v17299_v57  ;;  %vm17323_vm10 = vcmp.ge.f32.partialorder %v17299_v57, 1e+17  ;;  %v17315_v22 = vadd.f32 %v17820_v21, %v17304_v2  ;;  %v17338_v58 = vsel %vm17324_vm9, 0.0, %v22516_v48  ;;  %vm17395_vm11 = vmand %vm17324_vm9, %vm17393_vm6 }
0x192e   : > { %v17318_v1 = vsel %vm17298_vm5, %v17316_v9, %v22458_v43  ;;  %v17337_v26 = vsel %vm17323_vm10, 0.0, %v22512_v13  ;;  %v17352_v27 = vsel %vm262_vm1, %v17338_v58, 0.0  ;;  %vm17394_vm12 = vmand %vm17323_vm10, %vm17392_vm8  ;;  %v17397_v29 = vsel %vm17395_vm11, 1.0, %v20709_v3 }
0x192f   : > { %17322 = vst.msk [vmem:[#allocation3 + $0x8] sm:$0xff] %vm262_vm1, %v17318_v1  ;;  %v17822_v31 = vadd.f32 -1.0, %v17318_v1  ;;  %v17317_v33 = vsel %vm17297_vm7, %v17315_v22, %v22468_v45  ;;  %v17351_v35 = vsel %vm262_vm1, %v17337_v26, 0.0  ;;  %v17396_v32 = vsel %vm17394_vm12, 1.0, %v20709_v3 }
0x1930   : > { %17321 = vst.msk [vmem:[#allocation3] sm:$0xff] %vm262_vm1, %v17317_v33  ;;  %v17821_v20 = vadd.f32 -1.0, %v17317_v33  ;;  %v17353_v37 = vadd.f32 %v17352_v27, %v17351_v35  ;;  %v17398_v24 = vsel %vm262_vm1, %v17396_v32, 0.0  ;;  %v17399_v38 = vsel %vm262_vm1, %v17397_v29, 0.0 }
0x1931   : > { %v17328_v40 = vsel %vm17324_vm9, 0.0, %v17822_v31  ;;  %v17400_v41 = vadd.f32 %v17399_v38, %v17398_v24 }
0x1932   : > { %v17327_v42 = vsel %vm17323_vm10, 0.0, %v17821_v20  ;;  %17354 = vadd.xlane.f32.xlu1 %v17353_v37  ;;  %v17379_v30 = vmul.f32 %v17328_v40, %v22516_v48  ;;  %vm17427_vm13 = vcmp.eq.f32.partialorder %v17328_v40, 1.0  ;;  %v17330_v43 = vmul.f32 300.0, %v17328_v40 }
0x1933   : > { %v17378_v3 = vmul.f32 %v17327_v42, %v22512_v13  ;;  %vm17426_vm14 = vcmp.eq.f32.partialorder %v17327_v42, 1.0  ;;  %v17429_v28 = vsel %vm17427_vm13, %v22516_v48, 0.0  ;;  %v17329_v39 = vmul.f32 300.0, %v17327_v42 }
0x1934   : > { %v17381_v45 = vsel %vm262_vm1, %v17379_v30, 0.0  ;;  %v17428_v47 = vsel %vm17426_vm14, %v22512_v13, 0.0  ;;  %v17431_v46 = vsel %vm262_vm1, %v17429_v28, 0.0  ;;  %v17332_v50 = vadd.f32 %v17330_v43, %v17300_v19 }
0x1935   : > { %v17380_v51 = vsel %vm262_vm1, %v17378_v3, 0.0  ;;  %v17430_v52 = vsel %vm262_vm1, %v17428_v47, 0.0  ;;  %v17331_v34 = vadd.f32 %v17329_v39, %v17299_v57  ;;  %vm17458_vm15 = vcmp.gt.f32.partialorder %v17327_v42, 2.0 }
0x1936   : > { %17401 = vadd.xlane.f32.xlu1 %v17400_v41  ;;  %v17382_v49 = vadd.f32 %v17381_v45, %v17380_v51  ;;  %v17334_v54 = vsel %vm17324_vm9, 0.0, %v17332_v50  ;;  %vm17459_vm0 = vcmp.gt.f32.partialorder %v17328_v40, 2.0  ;;  %v17460_v62 = vsel %vm17458_vm15, %v22512_v13, 0.0 }
0x1937   : > { %v17333_v56 = vsel %vm17323_vm10, 0.0, %v17331_v34  ;;  %17336 = vst.msk [vmem:[%s22569_s23 + $0x8] sm:$0xff] %vm262_vm1, %v17334_v54  ;;  %v17365_v59 = vmul.f32 %v17334_v54, %v22516_v48  ;;  %v17461_v44 = vsel %vm17459_vm0, %v22516_v48, 0.0  ;;  %v17432_v55 = vadd.f32 %v17431_v46, %v17430_v52 }
0x1938   : > { %17383 = vadd.xlane.f32.xlu0 %v17382_v49  ;;  %v17364_v60 = vmul.f32 %v17333_v56, %v22512_v13  ;;  %17335 = vst.msk [vmem:[%s22569_s23] sm:$0xff] %vm262_vm1, %v17333_v56  ;;  %v17462_v36 = vsel %vm262_vm1, %v17460_v62, 0.0  ;;  %vm17410_vm3 = vcmp.eq.f32.partialorder %v17327_v42, 0.0  ;;  %v17463_v0 = vsel %vm262_vm1, %v17461_v44, 0.0 }
0x1939   : > { %v17367_v61 = vsel %vm262_vm1, %v17365_v59, 0.0  ;;  %vm17411_vm2 = vcmp.eq.f32.partialorder %v17328_v40, 0.0  ;;  %v17412_v5 = vsel %vm17410_vm3, %v22512_v13, 0.0  ;;  %vm17442_vm4 = vcmp.eq.f32.partialorder %v17327_v42, 2.0 }
0x193a   : > { %17433 = vadd.xlane.f32.xlu1 %v17432_v55  ;;  %v17366_v7 = vsel %vm262_vm1, %v17364_v60, 0.0  ;;  %v17413_v8 = vsel %vm17411_vm2, %v22516_v48, 0.0  ;;  %vm17443_vm5 = vcmp.eq.f32.partialorder %v17328_v40, 2.0  ;;  %v17464_v53 = vadd.f32 %v17463_v0, %v17462_v36 }
0x193b   : > { %v17368_v10 = vadd.f32 %v17367_v61, %v17366_v7  ;;  %v17414_v4 = vsel %vm262_vm1, %v17412_v5, 0.0  ;;  %v17415_v11 = vsel %vm262_vm1, %v17413_v8, 0.0  ;;  %v17444_v23 = vsel %vm17442_vm4, %v22512_v13, 0.0 }
0x193c   : > { %v17445_v14 = vsel %vm17443_vm5, %v22516_v48, 0.0  ;;  %v17416_v15 = vadd.f32 %v17415_v11, %v17414_v4  ;;  %v17446_v16 = vsel %vm262_vm1, %v17444_v23, 0.0 }
0x193d   : > { %17369 = vadd.xlane.f32.xlu0 %v17368_v10  ;;  %v17447_v17 = vsel %vm262_vm1, %v17445_v14, 0.0 }
0x193e   : > { %17465 = vadd.xlane.f32.xlu1 %v17464_v53  ;;  %v17448_v63 = vadd.f32 %v17447_v17, %v17446_v16 }
0x1941   : > { %17417 = vadd.xlane.f32.xlu0 %v17416_v15 }
0x1945   : > { %17449 = vadd.xlane.f32.xlu0 %v17448_v63 }
0x1959   : > { %v17343_v12 = vpop.xlane.xlu0 %17342 }
0x195a   : > { %v17344_v18 = vrot.slane %v17343_v12, 4 }
0x195c   : > { %v17345_v19 = vadd.f32 %v17344_v18, %v17343_v12 }
0x195e   : > { %v17346_v21 = vrot.slane %v17345_v19, 2 }
0x1960   : > { %v17347_v13 = vadd.f32 %v17346_v21, %v17345_v19 }
0x1962   : > { %v17348_v25 = vrot.slane %v17347_v13, 1 }
0x1964   : > { %v17349_v48 = vadd.f32 %v17348_v25, %v17347_v13 }
0x1966   : > { %20456 = vpush %v17349_v48 }
0x1967   : > { %20613 = shalt.err (!%p20610_p11)
}
0x1968   : > { %s20614_s8 = scalar_lea.hbm %s22595_s29, 256  ;;  %s20618_s27 = scalar_lea.hbm %s22688_s2, 512 }
0x1969   : > { %p20615_p3 = scmp.ne.s32.totalorder %s22595_s29, %s20614_s8  ;;  %p20619_p2 = scmp.lt.u32.totalorder %s22595_s29, %s22688_s2 }
0x196a   : > { %p20620_p4 = scmp.lt.u32.totalorder %s20618_s27, %s20614_s8  ;;  %p20622_p13 = scmp.lt.u32.totalorder %s20614_s8, %s22595_s29 }
0x196b   : > { %p20616_p8 = pnand %p20615_p3, %p22715_p1 }
0x196c   : > { %p20621_p6 = por %p20620_p4, %p20619_p2 }
0x196d   : > { %p20617_p0 = pneg %p20616_p8 }
0x196e   : > { %p20623_p12 = por %p20622_p13, %p20621_p6 }
0x1970   : > { %p20624_p10 = pnand %p20623_p12, %p20617_p0 }
0x1972   : > { %20627 = shalt.err (!%p20624_p10)
}
0x1973   : > { %s20713_s23 = smov 128   ;;  %s20714_s10 = smov 8   ;;  %vm17475_vm1 = vcmp.eq.s32.totalorder %v20933_v6, 0  ;;  %vm17478_vm6 = vcmp.eq.s32.totalorder %v20933_v6, 1  ;;  %vm17481_vm7 = vcmp.eq.s32.totalorder %v20933_v6, 2  ;;  %vm17484_vm8 = vcmp.eq.s32.totalorder %v20933_v6, 3 }
0x1974   : > { %20478 = dma.vmem_to_hbm [thread:$0]  (%p22715_p1), %s22598_s4, 256, %s22595_s29, %s17504_s5, %s20713_s23, %s20713_s23, %s20714_s10   ;;  %vm17487_vm9 = vcmp.eq.s32.totalorder %v20933_v6, 4  ;;  %vm17490_vm10 = vcmp.eq.s32.totalorder %v20933_v6, 5  ;;  %vm17493_vm11 = vcmp.eq.s32.totalorder %v20933_v6, 6  ;;  %vm17496_vm12 = vcmp.eq.s32.totalorder %v20933_v6, 7 }
0x1975   : > { %s17826_s8 = sshll.u32 %s20757_s16, 4  ;;  %s238_s7 = scalar_lea.vmem [#allocation10], %s20896_s6  ;;  %vm17499_vm13 = vcmp.eq.s32.totalorder %v20933_v6, 8 }
0x1976   : > { %s17537_s27 = sshll.u32 %s238_s7, 4  ;;  %s22642_s10 = scalar_lea.hbm %s22689_s3, %s17826_s8  ;;  %s22644_s27 = int_to_ptr.vmem [resolvable:$true] %s17537_s27 }
0x1977   : > { %s17509_s16 = scalar_lea.sflag [#allocation11], %s20896_s6 }
0x1997   : > { %s20457_s11 = spop %20456 }
0x1998   : > { %v17485_v25 = vstv %s20457_s11 }
0x19bf   : > { %v17355_v57 = vpop.xlane.xlu1 %17354 }
0x19c0   : > { %v17356_v9 = vrot.slane %v17355_v57, 4 }
0x19c2   : > { %v17357_v2 = vadd.f32 %v17356_v9, %v17355_v57 }
0x19c3   : > { %v17402_v22 = vpop.xlane.xlu1 %17401 }
0x19c4   : > { %v17358_v58 = vrot.slane %v17357_v2, 2  ;;  %v17403_v1 = vrot.slane %v17402_v22, 4 }
0x19c5   : > { %v17384_v26 = vpop.xlane.xlu0 %17383 }
0x19c6   : > { %v17385_v27 = vrot.slane %v17384_v26, 4  ;;  %v17359_v29 = vadd.f32 %v17358_v58, %v17357_v2  ;;  %v17404_v31 = vadd.f32 %v17403_v1, %v17402_v22 }
0x19c7   : > { %v17434_v33 = vpop.xlane.xlu1 %17433 }
0x19c8   : > { %v17386_v35 = vadd.f32 %v17385_v27, %v17384_v26  ;;  %v17435_v32 = vrot.slane %v17434_v33, 4  ;;  %v17360_v20 = vrot.slane %v17359_v29, 1  ;;  %v17405_v41 = vrot.slane %v17404_v31, 2 }
0x19ca   : > { %v17387_v37 = vrot.slane %v17386_v35, 2  ;;  %v17436_v24 = vadd.f32 %v17435_v32, %v17434_v33  ;;  %v17370_v38 = vpop.xlane.xlu0 %17369  ;;  %v17361_v40 = vadd.f32 %v17360_v20, %v17359_v29  ;;  %v17406_v51 = vadd.f32 %v17405_v41, %v17404_v31 }
0x19cb   : > { %v17371_v42 = vrot.slane %v17370_v38, 4  ;;  %v17466_v30 = vpop.xlane.xlu1 %17465 }
0x19cc   : > { %v17467_v43 = vrot.slane %v17466_v30, 4  ;;  %20458 = vpush %v17361_v40  ;;  %v17437_v28 = vrot.slane %v17436_v24, 2  ;;  %v17388_v47 = vadd.f32 %v17387_v37, %v17386_v35  ;;  %v17407_v60 = vrot.slane %v17406_v51, 1 }
0x19cd   : > { %v17372_v3 = vadd.f32 %v17371_v42, %v17370_v38 }
0x19ce   : > { %v17468_v39 = vadd.f32 %v17467_v43, %v17466_v30  ;;  %v17418_v45 = vpop.xlane.xlu0 %17417  ;;  %v17389_v56 = vrot.slane %v17388_v47, 1  ;;  %v17438_v59 = vadd.f32 %v17437_v28, %v17436_v24  ;;  %v17408_v53 = vadd.f32 %v17407_v60, %v17406_v51 }
0x19cf   : > { %v17373_v46 = vrot.slane %v17372_v3, 2  ;;  %v17419_v50 = vrot.slane %v17418_v45, 4 }
0x19d0   : > { %v17469_v49 = vrot.slane %v17468_v39, 2  ;;  %v17390_v7 = vadd.f32 %v17389_v56, %v17388_v47  ;;  %v17439_v8 = vrot.slane %v17438_v59, 1 }
0x19d1   : > { %v17420_v52 = vadd.f32 %v17419_v50, %v17418_v45  ;;  %v17374_v34 = vadd.f32 %v17373_v46, %v17372_v3 }
0x19d2   : > { %v17450_v54 = vpop.xlane.xlu0 %17449  ;;  %v17470_v5 = vadd.f32 %v17469_v49, %v17468_v39  ;;  %v17440_v14 = vadd.f32 %v17439_v8, %v17438_v59 }
0x19d3   : > { %v17421_v62 = vrot.slane %v17420_v52, 2  ;;  %v17451_v44 = vrot.slane %v17450_v54, 4  ;;  %v17375_v55 = vrot.slane %v17374_v34, 1 }
0x19d4   : > { %v17471_v15 = vrot.slane %v17470_v5, 1 }
0x19d5   : > { %v17452_v36 = vadd.f32 %v17451_v44, %v17450_v54  ;;  %v17376_v61 = vadd.f32 %v17375_v55, %v17374_v34  ;;  %v17422_v0 = vadd.f32 %v17421_v62, %v17420_v52 }
0x19d6   : > { %v17472_v63 = vadd.f32 %v17471_v15, %v17470_v5 }
0x19d7   : > { %v17453_v10 = vrot.slane %v17452_v36, 2  ;;  %20460 = vpush %v17376_v61  ;;  %v17423_v4 = vrot.slane %v17422_v0, 1 }
0x19d8   : > { %20462 = vpush %v17390_v7 }
0x19d9   : > { %v17454_v11 = vadd.f32 %v17453_v10, %v17452_v36  ;;  %20464 = vpush %v17408_v53  ;;  %v17424_v23 = vadd.f32 %v17423_v4, %v17422_v0 }
0x19db   : > { %20466 = vpush %v17424_v23  ;;  %v17455_v16 = vrot.slane %v17454_v11, 1 }
0x19dc   : > { %20468 = vpush %v17440_v14 }
0x19dd   : > { %v17456_v17 = vadd.f32 %v17455_v16, %v17454_v11 }
0x19df   : > { %20470 = vpush %v17456_v17 }
0x19e0   : > { %20472 = vpush %v17472_v63 }
0x19fd   : > { %s20459_s20 = spop %20458 }
0x19fe   : > { %s22624_s29 = ssub.f32 %s20457_s11, %s20459_s20  ;;  %s20628_s11 = scalar_lea.vmem %s22644_s27, 16 }
0x19ff   : > { %p20629_p5 = scmp.ne.s32.totalorder %s22644_s27, %s20628_s11  ;;  %s20715_s20 = smov [#allocation10]  }
0x1a00   : > { %v17482_v21 = vstv %s22624_s29 }
0x1a01   : > { %p20630_p7 = pnand %p20629_p5, %p22715_p1 }
0x1a03   : > { %p20631_p9 = pneg %p20630_p7 }
0x1a08   : > { %s20461_s4 = spop %20460 }
0x1a09   : > { %v17476_v12 = vstv %s20461_s4  ;;  %s20463_s5 = spop %20462 }
0x1a0a   : > { %v17477_v18 = vsel %vm17475_vm1, %v17476_v12, 0.0  ;;  %v17479_v19 = vstv %s20463_s5  ;;  %s20465_s17 = spop %20464 }
0x1a0b   : > { %v17480_v13 = vsel %vm17478_vm6, %v17479_v19, %v17477_v18  ;;  %v17488_v9 = vstv %s20465_s17 }
0x1a0c   : > { %v17483_v48 = vsel %vm17481_vm7, %v17482_v21, %v17480_v13  ;;  %s20467_s28 = spop %20466 }
0x1a0d   : > { %v17486_v57 = vsel %vm17484_vm8, %v17485_v25, %v17483_v48  ;;  %v17491_v2 = vstv %s20467_s28  ;;  %s20469_s19 = spop %20468 }
0x1a0e   : > { %v17489_v22 = vsel %vm17487_vm9, %v17488_v9, %v17486_v57  ;;  %v17494_v1 = vstv %s20469_s19 }
0x1a0f   : > { %v17492_v58 = vsel %vm17490_vm10, %v17491_v2, %v17489_v22 }
0x1a10   : > { %v17495_v26 = vsel %vm17493_vm11, %v17494_v1, %v17492_v58  ;;  %s20471_s22 = spop %20470 }
0x1a11   : > { %v17497_v27 = vstv %s20471_s22  ;;  %s20473_s30 = spop %20472 }
0x1a12   : > { %v17498_v29 = vsel %vm17496_vm12, %v17497_v27, %v17495_v26  ;;  %s17474_s26 = sadd.f32 %s20473_s30, %s22624_s29  ;;  %s20632_s29 = sshll.u32 %s20715_s20, 4  ;;  %s20633_s29 = int_to_ptr.vmem [resolvable:$false] %s20632_s29 }
0x1a13   : > { %s20634_s4 = scalar_lea.vmem %s20633_s29, 32  ;;  %p20635_p11 = scmp.lt.s32.totalorder %s22644_s27, %s20633_s29 }
0x1a14   : > { %v17500_v31 = vstv %s17474_s26  ;;  %p20636_p3 = scmp.lt.s32.totalorder %s20634_s4, %s20628_s11 }
0x1a15   : > { %v17501_v33 = vsel %vm17499_vm13, %v17500_v31, %v17498_v29 }
0x1a16   : > { %17502 = vst [vmem:[%s238_s7] sm:$0x1] %v17501_v33  ;;  %p20637_p8 = por %p20636_p3, %p20635_p11 }
0x1a18   : > { %p20638_p0 = pnand %p20637_p8, %p20631_p9 }
0x1a1a   : > { %20641 = shalt.err (!%p20638_p0)
}
0x1a1b   : > { %s20642_s6 = scalar_lea.hbm %s22642_s10, 16  ;;  %s20646_s28 = scalar_lea.hbm %s22689_s3, 32 }
0x1a1c   : > { %p20643_p2 = scmp.ne.s32.totalorder %s22642_s10, %s20642_s6  ;;  %p20647_p13 = scmp.lt.u32.totalorder %s22642_s10, %s22689_s3 }
0x1a1d   : > { %p20648_p12 = scmp.lt.u32.totalorder %s20646_s28, %s20642_s6  ;;  %p20650_p5 = scmp.lt.u32.totalorder %s20642_s6, %s22642_s10 }
0x1a1e   : > { %p20644_p4 = pnand %p20643_p2, %p22715_p1 }
0x1a1f   : > { %p20649_p10 = por %p20648_p12, %p20647_p13 }
0x1a20   : > { %p20645_p6 = pneg %p20644_p4 }
0x1a21   : > { %p20651_p7 = por %p20650_p5, %p20649_p10 }
0x1a23   : > { %p20652_p9 = pnand %p20651_p7, %p20645_p6 }
0x1a25   : > { %20655 = shalt.err (!%p20652_p9)
}
0x1a26   : > { %20479 = dma.vmem_to_hbm [thread:$0]  (%p22715_p1), %s22644_s27, 16, %s22642_s10, %s17509_s16  }
0x1a27 PF: > { %s17549_s8 = sand.u32 1, %s20690_s12   ;;  %p22716_p11 = scmp.ne.s32.totalorder %s22695_s25, 0 }
0x1a28   : > { %p22717_p3 = scmp.ge.s32.totalorder %s20702_s15, 2  ;;  %s17550_s30 = scalar_lea.sflag [#allocation6], %s17549_s8 }
0x1a2a   : > { %p20490_p8 = pnand %p22717_p3, %p22716_p11 }
0x1a2c   : > { %20681 = dma.done.wait (!%p20490_p8), %s17550_s30, 256  }
0x1a2d   : > { %20683 = vsyncadd (!%p20490_p8), %s17550_s30, 4294967040  ;;  %s17559_s7 = scalar_lea.sflag [#allocation11], %s17549_s8 }
0x1a2e   : > { %20685 = dma.done.wait (!%p20490_p8), %s17559_s7, 16  }
0x1a2f   : > { %20687 = vsyncadd (!%p20490_p8), %s17559_s7, 4294967280  ;;  %p23_p1 = scmp.ge.s32.totalorder %s20761_s18, 4   ;;  %s22718_s12 = smov %s20694_s13 }
0x1a30   : > { %s22719_s13 = smov %s20698_s14  ;;  %s22720_s14 = smov %s20773_s21 }
0x1a31   : > { %s22721_s15 = smov %s20761_s18  ;;  %25 = sbr.rel (!%p23_p1) target bundleno = 9 (0x9), region = 103 }
0x1a38   :  { %17563 = vsyncpa [#allocation5], 1 }
0x1a39   :  { %17565 = vsyncpa [#allocation5 + $0x1], 1 }
0x1a3a   :  { %17566 = vsyncpa [#allocation8], 1 }
0x1a3b   :  { %17568 = vsyncpa [#allocation8 + $0x1], 1 }
0x1a3c   :  { %17569 = vsyncpa [#allocation6], 1 }
0x1a3d   :  { %17571 = vsyncpa [#allocation6 + $0x1], 1 }
0x1a3e   :  { %17572 = vsyncpa [#allocation11], 1 }
0x1a3f   :  { %17574 = vsyncpa [#allocation11 + $0x1], 1 }

</bundles_post_ra>
